<compile_context>
chip_gen: v5e
topology: v5e:2x2
jax: 0.10.0
libtpu: 0.0.40
codegen_flags: <defaults>
</compile_context>

<pallas_src>
import functools

import jax
import jax.numpy as jnp
from jax.experimental import pallas as pl
from jax.experimental.pallas import tpu as pltpu

NUM_CLASSES = 10
LANE = 128


# ----------------------------------------------------------------------------
# Fused conv (matmul over im2col patches) + bias + ReLU + 2x2 max-pool.
#   pe_ref / po_ref : (1, H*Wo, K) bf16  patches for even / odd output columns
#   w_ref           : (K, 128)     bf16
#   b_ref           : (1, 128)     f32
#   o_ref           : (1, Ho*Wo, 128) bf16   pooled activation, rows = ho*Wo + wo
# ----------------------------------------------------------------------------
def _conv_relu_pool_kernel(pe_ref, po_ref, w_ref, b_ref, o_ref, *, H, Wo):
    w = w_ref[...]
    b = b_ref[...]
    # Two dots against the same weight tile (even / odd output columns).
    re = jnp.dot(pe_ref[0], w, preferred_element_type=jnp.float32)   # (H*Wo, 128)
    ro = jnp.dot(po_ref[0], w, preferred_element_type=jnp.float32)   # (H*Wo, 128)
    re = jnp.maximum(re + b, 0.0)
    ro = jnp.maximum(ro + b, 0.0)
    hm = jnp.maximum(re, ro)                       # horizontal 2x1 max (pure VPU)
    n = hm.shape[-1]
    hm = hm.reshape(H // 2, 2, Wo, n)              # leading-dim split, zero data movement
    pooled = jnp.maximum(hm[:, 0], hm[:, 1])       # vertical 2x1 max -> (Ho, Wo, 128)
    o_ref[0] = pooled.reshape((H // 2) * Wo, n).astype(o_ref.dtype)


def conv_relu_pool(pe, po, w, b, *, H, Wo):
    """pe/po: (B, H*Wo, K) bf16; w: (K, 128) bf16; b: (1, 128) f32 -> (B, Ho*Wo, 128) bf16."""
    B, M, K = pe.shape
    N = w.shape[1]
    Ho = H // 2
    kernel = functools.partial(_conv_relu_pool_kernel, H=H, Wo=Wo)
    return pl.pallas_call(
        kernel,
        out_shape=jax.ShapeDtypeStruct((B, Ho * Wo, N), jnp.bfloat16),
        grid_spec=pltpu.PrefetchScalarGridSpec(
            num_scalar_prefetch=0,
            grid=(B,),
            in_specs=[
                pl.BlockSpec((1, M, K), lambda i: (i, 0, 0)),
                pl.BlockSpec((1, M, K), lambda i: (i, 0, 0)),
                pl.BlockSpec((K, N), lambda i: (0, 0)),
                pl.BlockSpec((1, N), lambda i: (0, 0)),
            ],
            out_specs=pl.BlockSpec((1, Ho * Wo, N), lambda i: (i, 0, 0)),
        ),
        compiler_params=pltpu.CompilerParams(
            dimension_semantics=("parallel",),          # batch across v7x cores
            vmem_limit_bytes=32 * 1024 * 1024,
        ),
    )(pe, po, w, b)


# ----------------------------------------------------------------------------
# im2col glue (XLA): 3x3, pad=1, stride=1 patches, pre-split into even/odd
# output columns so the kernel's horizontal pool is an element-wise max.
# ----------------------------------------------------------------------------
def _im2col_even_odd(x):
    """x: (B, H, W, C) -> (pe, po), each (B, H*(W//2), 9*C) bf16, row = h*(W//2)+wo."""
    B, H, W, C = x.shape
    x = x.astype(jnp.bfloat16)
    xp = jnp.pad(x, ((0, 0), (1, 1), (1, 1), (0, 0)))
    cols = [xp[:, kh:kh + H, kw:kw + W, :] for kh in range(3) for kw in range(3)]
    patches = jnp.stack(cols, axis=3).reshape(B, H, W, 9 * C)   # col = (kh*3+kw)*C + cin
    Wo = W // 2
    pe = patches[:, :, 0::2, :].reshape(B, H * Wo, 9 * C)
    po = patches[:, :, 1::2, :].reshape(B, H * Wo, 9 * C)
    return pe, po


# ----------------------------------------------------------------------------
# Fused fc1 + bias + ReLU + fc2 + bias.  fc1's K is chunked over the grid
# (arbitrary axis, f32 accumulator scratch); fc2 runs in the last-step epilogue.
# ----------------------------------------------------------------------------
def _fc_fused_kernel(x_ref, w1_ref, b1_ref, w2_ref, b2_ref, o_ref, acc_ref):
    k = pl.program_id(0)

    @pl.when(k == 0)
    def _():
        acc_ref[...] = jnp.zeros_like(acc_ref)

    acc_ref[...] += jnp.dot(x_ref[...], w1_ref[...], preferred_element_type=jnp.float32)

    @pl.when(k == pl.num_programs(0) - 1)
    def _():
        h = jnp.maximum(acc_ref[...] + b1_ref[...], 0.0)                  # fc1 + ReLU
        logits = jnp.dot(h.astype(jnp.bfloat16), w2_ref[...],
                         preferred_element_type=jnp.float32) + b2_ref[...]  # fc2
        o_ref[...] = logits


def fc1_relu_fc2(x, w1, b1, w2, b2, *, tk=2048):
    """x: (B, 8192) bf16; w1: (8192, 256) bf16; w2: (256, 128) bf16 -> (B, 128) f32."""
    B, K = x.shape
    N1 = w1.shape[1]
    N2 = w2.shape[1]
    assert K % tk == 0
    return pl.pallas_call(
        _fc_fused_kernel,
        out_shape=jax.ShapeDtypeStruct((B, N2), jnp.float32),
        grid_spec=pltpu.PrefetchScalarGridSpec(
            num_scalar_prefetch=0,
            grid=(K // tk,),
            in_specs=[
                pl.BlockSpec((B, tk), lambda k: (0, k)),
                pl.BlockSpec((tk, N1), lambda k: (k, 0)),
                pl.BlockSpec((1, N1), lambda k: (0, 0)),
                pl.BlockSpec((N1, N2), lambda k: (0, 0)),
                pl.BlockSpec((1, N2), lambda k: (0, 0)),
            ],
            out_specs=pl.BlockSpec((B, N2), lambda k: (0, 0)),
            scratch_shapes=[pltpu.VMEM((B, N1), jnp.float32)],
        ),
        compiler_params=pltpu.CompilerParams(
            dimension_semantics=("arbitrary",),
            vmem_limit_bytes=32 * 1024 * 1024,
        ),
    )(x, w1, b1, w2, b2)


# ----------------------------------------------------------------------------
# Parameters: generate in PyTorch layout, transform ONCE into kernel layout.
# ----------------------------------------------------------------------------
def init_params(key):
    ks = jax.random.split(key, 8)
    s = 0.05
    return {
        "conv1_w": jax.random.normal(ks[0], (64, 1, 3, 3), jnp.float32) * s,
        "conv1_b": jax.random.normal(ks[1], (64,), jnp.float32) * s,
        "conv2_w": jax.random.normal(ks[2], (128, 64, 3, 3), jnp.float32) * s,
        "conv2_b": jax.random.normal(ks[3], (128,), jnp.float32) * s,
        "fc1_w": jax.random.normal(ks[4], (256, 128 * 8 * 8), jnp.float32) * s,
        "fc1_b": jax.random.normal(ks[5], (256,), jnp.float32) * s,
        "fc2_w": jax.random.normal(ks[6], (NUM_CLASSES, 256), jnp.float32) * s,
        "fc2_b": jax.random.normal(ks[7], (NUM_CLASSES,), jnp.float32) * s,
    }


def prepare_params(p):
    """One-time static layout transforms (run outside the jitted forward)."""
    # conv1: (64,1,3,3) -> (9,64) rows ordered (kh,kw,cin); pad Cout 64->128 (lane-dense).
    c1w = jnp.transpose(p["conv1_w"], (2, 3, 1, 0)).reshape(9, 64)
    c1w = jnp.pad(c1w, ((0, 0), (0, LANE - 64)))                       # (9, 128)
    c1b = jnp.pad(p["conv1_b"], (0, LANE - 64)).reshape(1, LANE)       # (1, 128)
    # conv2: pad Cin 64->128 with zero rows (matches the zero-padded activation lanes).
    c2w = jnp.pad(p["conv2_w"], ((0, 0), (0, LANE - 64), (0, 0), (0, 0)))   # (128,128,3,3)
    c2w = jnp.transpose(c2w, (2, 3, 1, 0)).reshape(9 * LANE, LANE)          # (1152, 128)
    c2b = p["conv2_b"].reshape(1, LANE)
    # fc1: rows permuted to NHWC-flatten order so the forward's plain reshape of the
    # pooled NHWC activation reproduces PyTorch's NCHW view(-1, 128*8*8) exactly.
    f1w = p["fc1_w"].reshape(256, 128, 8, 8)
    f1w = jnp.transpose(f1w, (2, 3, 1, 0)).reshape(8 * 8 * 128, 256)        # (8192, 256)
    f1b = p["fc1_b"].reshape(1, 256)
    # fc2: transpose + pad outputs 10 -> 128 (lane-dense); slice [:, :10] outside.
    f2w = jnp.pad(p["fc2_w"].T, ((0, 0), (0, LANE - NUM_CLASSES)))          # (256, 128)
    f2b = jnp.pad(p["fc2_b"], (0, LANE - NUM_CLASSES)).reshape(1, LANE)
    return {
        "conv1_w": c1w.astype(jnp.bfloat16), "conv1_b": c1b.astype(jnp.float32),
        "conv2_w": c2w.astype(jnp.bfloat16), "conv2_b": c2b.astype(jnp.float32),
        "fc1_w": f1w.astype(jnp.bfloat16), "fc1_b": f1b.astype(jnp.float32),
        "fc2_w": f2w.astype(jnp.bfloat16), "fc2_b": f2b.astype(jnp.float32),
    }


# ----------------------------------------------------------------------------
# Forward pass (mirrors SimpleCNN.forward)
# ----------------------------------------------------------------------------
@jax.jit
def simple_cnn_forward(prepped, x_nchw):
    B = x_nchw.shape[0]
    x = jnp.transpose(x_nchw, (0, 2, 3, 1))                               # (B, 32, 32, 1)
    pe, po = _im2col_even_odd(x)                                          # (B, 512, 9)
    a1 = conv_relu_pool(pe, po, prepped["conv1_w"], prepped["conv1_b"],
                        H=32, Wo=16)                                      # (B, 256, 128) bf16
    a1 = a1.reshape(B, 16, 16, 128)                                       # NHWC
    pe2, po2 = _im2col_even_odd(a1)                                       # (B, 128, 1152)
    a2 = conv_relu_pool(pe2, po2, prepped["conv2_w"], prepped["conv2_b"],
                        H=16, Wo=8)                                       # (B, 64, 128) bf16
    feat = a2.reshape(B, 8 * 8 * 128)        # NHWC flatten == pre-permuted fc1 row order
    logits = fc1_relu_fc2(feat, prepped["fc1_w"], prepped["fc1_b"],
                          prepped["fc2_w"], prepped["fc2_b"])             # (B, 128) f32
    return logits[:, :NUM_CLASSES]


if __name__ == "__main__":
    key = jax.random.PRNGKey(0)
    pkey, xkey = jax.random.split(key)
    params = init_params(pkey)
    prepped = prepare_params(params)
    # fc1 expects 128*8*8 after two 2x2 pools -> spatial must be 32x32, 1 input channel.
    x = jax.random.normal(xkey, (2, 1, 32, 32), jnp.float32)
    out = simple_cnn_forward(prepped, x)
    jax.block_until_ready(out)
    assert out.shape == (2, NUM_CLASSES)
    print("KERNEL_OK")
</pallas_src>

<mosaic_0001>
module attributes {stable_mosaic.version = 11 : i64} {
  func.func @_conv_relu_pool_kernel(%arg0: i32, %arg1: memref<1x512x9xbf16, #tpu.memory_space<vmem>>, %arg2: memref<1x512x9xbf16, #tpu.memory_space<vmem>>, %arg3: memref<9x128xbf16, #tpu.memory_space<vmem>>, %arg4: memref<1x128xf32, #tpu.memory_space<vmem>>, %arg5: memref<1x256x128xbf16, #tpu.memory_space<vmem>>) attributes {dimension_semantics = [#tpu.dimension_semantics<parallel>], iteration_bounds = array<i64: 2>, scalar_prefetch = 0 : i64, scratch_operands = 0 : i64, tpu.core_type = #tpu.core_type<tc>, window_params = [{transform_indices = @transform_0, window_bounds = array<i64: 1, 512, 9>}, {transform_indices = @transform_1, window_bounds = array<i64: 1, 512, 9>}, {pipeline_mode = #tpu.pipeline_mode<synchronous>, transform_indices = @transform_2, window_bounds = array<i64: 9, 128>}, {pipeline_mode = #tpu.pipeline_mode<synchronous>, transform_indices = @transform_3, window_bounds = array<i64: 1, 128>}, {transform_indices = @transform_4, window_bounds = array<i64: 1, 256, 128>}]} {
    %c0 = arith.constant 0 : index
    %c0_0 = arith.constant 0 : index
    %0 = vector.load %arg3[%c0, %c0_0] : memref<9x128xbf16, #tpu.memory_space<vmem>>, vector<9x128xbf16>
    %c0_1 = arith.constant 0 : index
    %c0_2 = arith.constant 0 : index
    %1 = vector.load %arg4[%c0_1, %c0_2] : memref<1x128xf32, #tpu.memory_space<vmem>>, vector<1x128xf32>
    %c0_3 = arith.constant 0 : index
    %c0_4 = arith.constant 0 : index
    %c0_5 = arith.constant 0 : index
    %2 = vector.load %arg1[%c0_3, %c0_4, %c0_5] : memref<1x512x9xbf16, #tpu.memory_space<vmem>>, vector<1x512x9xbf16>
    %3 = vector.shape_cast %2 : vector<1x512x9xbf16> to vector<512x9xbf16>
    %cst = arith.constant dense<0.000000e+00> : vector<512x128xf32>
    %4 = tpu.matmul %3, %0, %cst {dimension_numbers = #tpu.dot_dimension_numbers<[1], [0], [0], [1], [0, 0, 1, 1], [], []>} : vector<512x9xbf16>, vector<9x128xbf16>, vector<512x128xf32> -> vector<512x128xf32>
    %c0_6 = arith.constant 0 : index
    %c0_7 = arith.constant 0 : index
    %c0_8 = arith.constant 0 : index
    %5 = vector.load %arg2[%c0_6, %c0_7, %c0_8] : memref<1x512x9xbf16, #tpu.memory_space<vmem>>, vector<1x512x9xbf16>
    %6 = vector.shape_cast %5 : vector<1x512x9xbf16> to vector<512x9xbf16>
    %cst_9 = arith.constant dense<0.000000e+00> : vector<512x128xf32>
    %7 = tpu.matmul %6, %0, %cst_9 {dimension_numbers = #tpu.dot_dimension_numbers<[1], [0], [0], [1], [0, 0, 1, 1], [], []>} : vector<512x9xbf16>, vector<9x128xbf16>, vector<512x128xf32> -> vector<512x128xf32>
    %8 = vector.broadcast %1 : vector<1x128xf32> to vector<512x128xf32>
    %9 = arith.addf %4, %8 : vector<512x128xf32>
    %cst_10 = arith.constant 0.000000e+00 : f32
    %10 = vector.broadcast %cst_10 : f32 to vector<512x128xf32>
    %11 = arith.maximumf %9, %10 : vector<512x128xf32>
    %12 = vector.broadcast %1 : vector<1x128xf32> to vector<512x128xf32>
    %13 = arith.addf %7, %12 : vector<512x128xf32>
    %cst_11 = arith.constant 0.000000e+00 : f32
    %14 = vector.broadcast %cst_11 : f32 to vector<512x128xf32>
    %15 = arith.maximumf %13, %14 : vector<512x128xf32>
    %16 = arith.maximumf %11, %15 : vector<512x128xf32>
    %17 = vector.shape_cast %16 : vector<512x128xf32> to vector<16x2x16x128xf32>
    %18 = vector.extract_strided_slice %17 {offsets = [0, 0, 0, 0], sizes = [16, 1, 16, 128], strides = [1, 1, 1, 1]} : vector<16x2x16x128xf32> to vector<16x1x16x128xf32>
    %19 = vector.shape_cast %18 : vector<16x1x16x128xf32> to vector<16x16x128xf32>
    %20 = vector.extract_strided_slice %17 {offsets = [0, 1, 0, 0], sizes = [16, 1, 16, 128], strides = [1, 1, 1, 1]} : vector<16x2x16x128xf32> to vector<16x1x16x128xf32>
    %21 = vector.shape_cast %20 : vector<16x1x16x128xf32> to vector<16x16x128xf32>
    %22 = arith.maximumf %19, %21 : vector<16x16x128xf32>
    %23 = vector.shape_cast %22 : vector<16x16x128xf32> to vector<256x128xf32>
    %24 = arith.truncf %23 : vector<256x128xf32> to vector<256x128xbf16>
    %c0_12 = arith.constant 0 : index
    %c0_13 = arith.constant 0 : index
    %c0_14 = arith.constant 0 : index
    %25 = vector.load %arg5[%c0_12, %c0_13, %c0_14] : memref<1x256x128xbf16, #tpu.memory_space<vmem>>, vector<1x256x128xbf16>
    %26 = vector.shape_cast %25 : vector<1x256x128xbf16> to vector<256x128xbf16>
    %27 = vector.shape_cast %24 : vector<256x128xbf16> to vector<1x256x128xbf16>
    tpu.vector_store %arg5[%c0_12, %c0_13, %c0_14], %27 {strides = array<i32>} : memref<1x256x128xbf16, #tpu.memory_space<vmem>>, vector<1x256x128xbf16>,
    return
  }
  func.func @transform_0(%arg0: i32) -> (i32, i32, i32) {
    %c0_i32 = arith.constant 0 : i32
    %c0_i32_0 = arith.constant 0 : i32
    %c0_i32_1 = arith.constant 0 : i32
    return %arg0, %c0_i32, %c0_i32_0 : i32, i32, i32
  }
  func.func @transform_1(%arg0: i32) -> (i32, i32, i32) {
    %c0_i32 = arith.constant 0 : i32
    %c0_i32_0 = arith.constant 0 : i32
    %c0_i32_1 = arith.constant 0 : i32
    return %arg0, %c0_i32, %c0_i32_0 : i32, i32, i32
  }
  func.func @transform_2(%arg0: i32) -> (i32, i32) {
    %c0_i32 = arith.constant 0 : i32
    %c0_i32_0 = arith.constant 0 : i32
    %c0_i32_1 = arith.constant 0 : i32
    return %c0_i32, %c0_i32_0 : i32, i32
  }
  func.func @transform_3(%arg0: i32) -> (i32, i32) {
    %c0_i32 = arith.constant 0 : i32
    %c0_i32_0 = arith.constant 0 : i32
    %c0_i32_1 = arith.constant 0 : i32
    return %c0_i32, %c0_i32_0 : i32, i32
  }
  func.func @transform_4(%arg0: i32) -> (i32, i32, i32) {
    %c0_i32 = arith.constant 0 : i32
    %c0_i32_0 = arith.constant 0 : i32
    %c0_i32_1 = arith.constant 0 : i32
    return %arg0, %c0_i32, %c0_i32_0 : i32, i32, i32
  }
}

module attributes {stable_mosaic.version = 11 : i64} {
  func.func @_conv_relu_pool_kernel(%arg0: i32, %arg1: memref<1x128x1152xbf16, #tpu.memory_space<vmem>>, %arg2: memref<1x128x1152xbf16, #tpu.memory_space<vmem>>, %arg3: memref<1152x128xbf16, #tpu.memory_space<vmem>>, %arg4: memref<1x128xf32, #tpu.memory_space<vmem>>, %arg5: memref<1x64x128xbf16, #tpu.memory_space<vmem>>) attributes {dimension_semantics = [#tpu.dimension_semantics<parallel>], iteration_bounds = array<i64: 2>, scalar_prefetch = 0 : i64, scratch_operands = 0 : i64, tpu.core_type = #tpu.core_type<tc>, window_params = [{transform_indices = @transform_0, window_bounds = array<i64: 1, 128, 1152>}, {transform_indices = @transform_1, window_bounds = array<i64: 1, 128, 1152>}, {pipeline_mode = #tpu.pipeline_mode<synchronous>, transform_indices = @transform_2, window_bounds = array<i64: 1152, 128>}, {pipeline_mode = #tpu.pipeline_mode<synchronous>, transform_indices = @transform_3, window_bounds = array<i64: 1, 128>}, {transform_indices = @transform_4, window_bounds = array<i64: 1, 64, 128>}]} {
    %c0 = arith.constant 0 : index
    %c0_0 = arith.constant 0 : index
    %0 = vector.load %arg3[%c0, %c0_0] : memref<1152x128xbf16, #tpu.memory_space<vmem>>, vector<1152x128xbf16>
    %c0_1 = arith.constant 0 : index
    %c0_2 = arith.constant 0 : index
    %1 = vector.load %arg4[%c0_1, %c0_2] : memref<1x128xf32, #tpu.memory_space<vmem>>, vector<1x128xf32>
    %c0_3 = arith.constant 0 : index
    %c0_4 = arith.constant 0 : index
    %c0_5 = arith.constant 0 : index
    %2 = vector.load %arg1[%c0_3, %c0_4, %c0_5] : memref<1x128x1152xbf16, #tpu.memory_space<vmem>>, vector<1x128x1152xbf16>
    %3 = vector.shape_cast %2 : vector<1x128x1152xbf16> to vector<128x1152xbf16>
    %cst = arith.constant dense<0.000000e+00> : vector<128x128xf32>
    %4 = tpu.matmul %3, %0, %cst {dimension_numbers = #tpu.dot_dimension_numbers<[1], [0], [0], [1], [0, 0, 1, 1], [], []>} : vector<128x1152xbf16>, vector<1152x128xbf16>, vector<128x128xf32> -> vector<128x128xf32>
    %c0_6 = arith.constant 0 : index
    %c0_7 = arith.constant 0 : index
    %c0_8 = arith.constant 0 : index
    %5 = vector.load %arg2[%c0_6, %c0_7, %c0_8] : memref<1x128x1152xbf16, #tpu.memory_space<vmem>>, vector<1x128x1152xbf16>
    %6 = vector.shape_cast %5 : vector<1x128x1152xbf16> to vector<128x1152xbf16>
    %cst_9 = arith.constant dense<0.000000e+00> : vector<128x128xf32>
    %7 = tpu.matmul %6, %0, %cst_9 {dimension_numbers = #tpu.dot_dimension_numbers<[1], [0], [0], [1], [0, 0, 1, 1], [], []>} : vector<128x1152xbf16>, vector<1152x128xbf16>, vector<128x128xf32> -> vector<128x128xf32>
    %8 = vector.broadcast %1 : vector<1x128xf32> to vector<128x128xf32>
    %9 = arith.addf %4, %8 : vector<128x128xf32>
    %cst_10 = arith.constant 0.000000e+00 : f32
    %10 = vector.broadcast %cst_10 : f32 to vector<128x128xf32>
    %11 = arith.maximumf %9, %10 : vector<128x128xf32>
    %12 = vector.broadcast %1 : vector<1x128xf32> to vector<128x128xf32>
    %13 = arith.addf %7, %12 : vector<128x128xf32>
    %cst_11 = arith.constant 0.000000e+00 : f32
    %14 = vector.broadcast %cst_11 : f32 to vector<128x128xf32>
    %15 = arith.maximumf %13, %14 : vector<128x128xf32>
    %16 = arith.maximumf %11, %15 : vector<128x128xf32>
    %17 = vector.shape_cast %16 : vector<128x128xf32> to vector<8x2x8x128xf32>
    %18 = vector.extract_strided_slice %17 {offsets = [0, 0, 0, 0], sizes = [8, 1, 8, 128], strides = [1, 1, 1, 1]} : vector<8x2x8x128xf32> to vector<8x1x8x128xf32>
    %19 = vector.shape_cast %18 : vector<8x1x8x128xf32> to vector<8x8x128xf32>
    %20 = vector.extract_strided_slice %17 {offsets = [0, 1, 0, 0], sizes = [8, 1, 8, 128], strides = [1, 1, 1, 1]} : vector<8x2x8x128xf32> to vector<8x1x8x128xf32>
    %21 = vector.shape_cast %20 : vector<8x1x8x128xf32> to vector<8x8x128xf32>
    %22 = arith.maximumf %19, %21 : vector<8x8x128xf32>
    %23 = vector.shape_cast %22 : vector<8x8x128xf32> to vector<64x128xf32>
    %24 = arith.truncf %23 : vector<64x128xf32> to vector<64x128xbf16>
    %c0_12 = arith.constant 0 : index
    %c0_13 = arith.constant 0 : index
    %c0_14 = arith.constant 0 : index
    %25 = vector.load %arg5[%c0_12, %c0_13, %c0_14] : memref<1x64x128xbf16, #tpu.memory_space<vmem>>, vector<1x64x128xbf16>
    %26 = vector.shape_cast %25 : vector<1x64x128xbf16> to vector<64x128xbf16>
    %27 = vector.shape_cast %24 : vector<64x128xbf16> to vector<1x64x128xbf16>
    tpu.vector_store %arg5[%c0_12, %c0_13, %c0_14], %27 {strides = array<i32>} : memref<1x64x128xbf16, #tpu.memory_space<vmem>>, vector<1x64x128xbf16>,
    return
  }
  func.func @transform_0(%arg0: i32) -> (i32, i32, i32) {
    %c0_i32 = arith.constant 0 : i32
    %c0_i32_0 = arith.constant 0 : i32
    %c0_i32_1 = arith.constant 0 : i32
    return %arg0, %c0_i32, %c0_i32_0 : i32, i32, i32
  }
  func.func @transform_1(%arg0: i32) -> (i32, i32, i32) {
    %c0_i32 = arith.constant 0 : i32
    %c0_i32_0 = arith.constant 0 : i32
    %c0_i32_1 = arith.constant 0 : i32
    return %arg0, %c0_i32, %c0_i32_0 : i32, i32, i32
  }
  func.func @transform_2(%arg0: i32) -> (i32, i32) {
    %c0_i32 = arith.constant 0 : i32
    %c0_i32_0 = arith.constant 0 : i32
    %c0_i32_1 = arith.constant 0 : i32
    return %c0_i32, %c0_i32_0 : i32, i32
  }
  func.func @transform_3(%arg0: i32) -> (i32, i32) {
    %c0_i32 = arith.constant 0 : i32
    %c0_i32_0 = arith.constant 0 : i32
    %c0_i32_1 = arith.constant 0 : i32
    return %c0_i32, %c0_i32_0 : i32, i32
  }
  func.func @transform_4(%arg0: i32) -> (i32, i32, i32) {
    %c0_i32 = arith.constant 0 : i32
    %c0_i32_0 = arith.constant 0 : i32
    %c0_i32_1 = arith.constant 0 : i32
    return %arg0, %c0_i32, %c0_i32_0 : i32, i32, i32
  }
}

module attributes {stable_mosaic.version = 11 : i64} {
  func.func @_fc_fused_kernel(%arg0: i32, %arg1: memref<2x2048xbf16, #tpu.memory_space<vmem>>, %arg2: memref<2048x256xbf16, #tpu.memory_space<vmem>>, %arg3: memref<1x256xf32, #tpu.memory_space<vmem>>, %arg4: memref<256x128xbf16, #tpu.memory_space<vmem>>, %arg5: memref<1x128xf32, #tpu.memory_space<vmem>>, %arg6: memref<2x128xf32, #tpu.memory_space<vmem>>, %arg7: memref<2x256xf32, #tpu.memory_space<vmem>>) attributes {dimension_semantics = [#tpu.dimension_semantics<arbitrary>], iteration_bounds = array<i64: 4>, scalar_prefetch = 0 : i64, scratch_operands = 1 : i64, tpu.core_type = #tpu.core_type<tc>, window_params = [{transform_indices = @transform_0, window_bounds = array<i64: 2, 2048>}, {transform_indices = @transform_1, window_bounds = array<i64: 2048, 256>}, {pipeline_mode = #tpu.pipeline_mode<synchronous>, transform_indices = @transform_2, window_bounds = array<i64: 1, 256>}, {pipeline_mode = #tpu.pipeline_mode<synchronous>, transform_indices = @transform_3, window_bounds = array<i64: 256, 128>}, {pipeline_mode = #tpu.pipeline_mode<synchronous>, transform_indices = @transform_4, window_bounds = array<i64: 1, 128>}, {pipeline_mode = #tpu.pipeline_mode<synchronous>, transform_indices = @transform_5, window_bounds = array<i64: 2, 128>}]} {
    %c0_i32 = arith.constant 0 : i32
    %0 = arith.cmpi eq, %arg0, %c0_i32 : i32
    %1 = arith.extui %0 : i1 to i32
    %c0_i32_0 = arith.constant 0 : i32
    %2 = arith.cmpi ne, %1, %c0_i32_0 : i32
    scf.if %2 {
      %cst_9 = arith.constant 0.000000e+00 : f32
      %12 = vector.broadcast %cst_9 : f32 to vector<2x256xf32>
      %c0_10 = arith.constant 0 : index
      %c0_11 = arith.constant 0 : index
      %13 = vector.load %arg7[%c0_10, %c0_11] : memref<2x256xf32, #tpu.memory_space<vmem>>, vector<2x256xf32>
      tpu.vector_store %arg7[%c0_10, %c0_11], %12 {strides = array<i32>} : memref<2x256xf32, #tpu.memory_space<vmem>>, vector<2x256xf32>,
    } else {
    }
    %c0 = arith.constant 0 : index
    %c0_1 = arith.constant 0 : index
    %3 = vector.load %arg7[%c0, %c0_1] : memref<2x256xf32, #tpu.memory_space<vmem>>, vector<2x256xf32>
    %c0_2 = arith.constant 0 : index
    %c0_3 = arith.constant 0 : index
    %4 = vector.load %arg1[%c0_2, %c0_3] : memref<2x2048xbf16, #tpu.memory_space<vmem>>, vector<2x2048xbf16>
    %c0_4 = arith.constant 0 : index
    %c0_5 = arith.constant 0 : index
    %5 = vector.load %arg2[%c0_4, %c0_5] : memref<2048x256xbf16, #tpu.memory_space<vmem>>, vector<2048x256xbf16>
    %cst = arith.constant dense<0.000000e+00> : vector<2x256xf32>
    %6 = tpu.matmul %4, %5, %cst {dimension_numbers = #tpu.dot_dimension_numbers<[1], [0], [0], [1], [0, 0, 1, 1], [], []>} : vector<2x2048xbf16>, vector<2048x256xbf16>, vector<2x256xf32> -> vector<2x256xf32>
    %7 = arith.addf %3, %6 : vector<2x256xf32>
    %c0_6 = arith.constant 0 : index
    %c0_7 = arith.constant 0 : index
    %8 = vector.load %arg7[%c0_6, %c0_7] : memref<2x256xf32, #tpu.memory_space<vmem>>, vector<2x256xf32>
    tpu.vector_store %arg7[%c0_6, %c0_7], %7 {strides = array<i32>} : memref<2x256xf32, #tpu.memory_space<vmem>>, vector<2x256xf32>,
    %c3_i32 = arith.constant 3 : i32
    %9 = arith.cmpi eq, %arg0, %c3_i32 : i32
    %10 = arith.extui %9 : i1 to i32
    %c0_i32_8 = arith.constant 0 : i32
    %11 = arith.cmpi ne, %10, %c0_i32_8 : i32
    scf.if %11 {
      %c0_9 = arith.constant 0 : index
      %c0_10 = arith.constant 0 : index
      %12 = vector.load %arg7[%c0_9, %c0_10] : memref<2x256xf32, #tpu.memory_space<vmem>>, vector<2x256xf32>
      %c0_11 = arith.constant 0 : index
      %c0_12 = arith.constant 0 : index
      %13 = vector.load %arg3[%c0_11, %c0_12] : memref<1x256xf32, #tpu.memory_space<vmem>>, vector<1x256xf32>
      %14 = vector.broadcast %13 : vector<1x256xf32> to vector<2x256xf32>
      %15 = arith.addf %12, %14 : vector<2x256xf32>
      %cst_13 = arith.constant 0.000000e+00 : f32
      %16 = vector.broadcast %cst_13 : f32 to vector<2x256xf32>
      %17 = arith.maximumf %15, %16 : vector<2x256xf32>
      %18 = arith.truncf %17 : vector<2x256xf32> to vector<2x256xbf16>
      %c0_14 = arith.constant 0 : index
      %c0_15 = arith.constant 0 : index
      %19 = vector.load %arg4[%c0_14, %c0_15] : memref<256x128xbf16, #tpu.memory_space<vmem>>, vector<256x128xbf16>
      %cst_16 = arith.constant dense<0.000000e+00> : vector<2x128xf32>
      %20 = tpu.matmul %18, %19, %cst_16 {dimension_numbers = #tpu.dot_dimension_numbers<[1], [0], [0], [1], [0, 0, 1, 1], [], []>} : vector<2x256xbf16>, vector<256x128xbf16>, vector<2x128xf32> -> vector<2x128xf32>
      %c0_17 = arith.constant 0 : index
      %c0_18 = arith.constant 0 : index
      %21 = vector.load %arg5[%c0_17, %c0_18] : memref<1x128xf32, #tpu.memory_space<vmem>>, vector<1x128xf32>
      %22 = vector.broadcast %21 : vector<1x128xf32> to vector<2x128xf32>
      %23 = arith.addf %20, %22 : vector<2x128xf32>
      %c0_19 = arith.constant 0 : index
      %c0_20 = arith.constant 0 : index
      %24 = vector.load %arg6[%c0_19, %c0_20] : memref<2x128xf32, #tpu.memory_space<vmem>>, vector<2x128xf32>
      tpu.vector_store %arg6[%c0_19, %c0_20], %23 {strides = array<i32>} : memref<2x128xf32, #tpu.memory_space<vmem>>, vector<2x128xf32>,
    } else {
    }
    return
  }
  func.func @transform_0(%arg0: i32) -> (i32, i32) {
    %c0_i32 = arith.constant 0 : i32
    %c0_i32_0 = arith.constant 0 : i32
    return %c0_i32, %arg0 : i32, i32
  }
  func.func @transform_1(%arg0: i32) -> (i32, i32) {
    %c0_i32 = arith.constant 0 : i32
    %c0_i32_0 = arith.constant 0 : i32
    return %arg0, %c0_i32 : i32, i32
  }
  func.func @transform_2(%arg0: i32) -> (i32, i32) {
    %c0_i32 = arith.constant 0 : i32
    %c0_i32_0 = arith.constant 0 : i32
    %c0_i32_1 = arith.constant 0 : i32
    return %c0_i32, %c0_i32_0 : i32, i32
  }
  func.func @transform_3(%arg0: i32) -> (i32, i32) {
    %c0_i32 = arith.constant 0 : i32
    %c0_i32_0 = arith.constant 0 : i32
    %c0_i32_1 = arith.constant 0 : i32
    return %c0_i32, %c0_i32_0 : i32, i32
  }
  func.func @transform_4(%arg0: i32) -> (i32, i32) {
    %c0_i32 = arith.constant 0 : i32
    %c0_i32_0 = arith.constant 0 : i32
    %c0_i32_1 = arith.constant 0 : i32
    return %c0_i32, %c0_i32_0 : i32, i32
  }
  func.func @transform_5(%arg0: i32) -> (i32, i32) {
    %c0_i32 = arith.constant 0 : i32
    %c0_i32_0 = arith.constant 0 : i32
    %c0_i32_1 = arith.constant 0 : i32
    return %c0_i32, %c0_i32_0 : i32, i32
  }
}

</mosaic_0001>

<bundles_post_ra>
// kernel: simple_cnn_forward.3
= control target key start
LH: loop header
LB: loop body
LE: loop exit
PB: predicated region body
PF: predicated region fallthrough
CT: control target
= control target key end

     0   :  { %s2118_s15 = smov 0   ;;  %s2424_s0 = inlined_call_operand.vmem [shape: bf16[2,512,9], index: 0, kind: input, shape index: {}]   ;;  %s2425_s1 = inlined_call_operand.vmem [shape: bf16[2,512,9], index: 1, kind: input, shape index: {}]   ;;  %s2426_s2 = inlined_call_operand.vmem [shape: bf16[9,128], index: 2, kind: input, shape index: {}]   ;;  %s2427_s3 = inlined_call_operand.vmem [shape: f32[1,128], index: 3, kind: input, shape index: {}]   ;;  %s2428_s4 = inlined_call_operand.vmem [shape: bf16[2,256,128], index: 4, kind: output, shape index: {}]  }
   0x1 LB: > { %s1571_s16 = sadd.s32 4294967295, %s2090_s15   ;;  %p1575_p0 = scmp.ge.s32.totalorder %s2090_s15, 1  ;;  %s2090_s15 = sphi %s2118_s15, %s14_s15  }
   0x2   : > { %p172_p1 = scmp.lt.s32.totalorder %s2090_s15, 3 }
   0x4   : > { %p173_p2 = pnand %p1575_p0, %p172_p1 }
   0x5   : > { %p203_p3 = scmp.lt.s32.totalorder (!%p173_p2), %s1571_s16, 1 }
   0x6   : > { %176 = sbr.rel (%p173_p2) target bundleno = 412 (0x19c), region = 36 }
   0xb   : > { %v1712_v0 = vld [vmem:[%s2426_s2] sm:$0xf]  ;;  %v1911_v1 = vld [vmem:[%s2426_s2] sm:$0x10]  ;;  %vm615_vm0 = vcmask 1043456   ;;  %vm616_vm1 = vcmask 1044480  }
   0xc   : > { %v1713_v2 = vor.u32 %v1911_v1, %v1712_v0  ;;  %v2092_v3 = vmov 65535   ;;  %s2430_s16 = smov (!%p203_p3, %s1571_s16), 1  ;;  %vm518_vm2 = vcmask 72704   ;;  %v2224_v56 = vld [vmem:[%s2427_s3] ss:$0 sm:$0xff] }
   0xd   : > { %v617_v4 = vsel %vm615_vm0, 4294967295, %v2092_v3  ;;  %s1908_s21 = sshll.u32 %s2430_s16, 8  ;;  %s1910_s30 = sshll.u32 %s2430_s16, 7 }
   0xe   : > { %v618_v5 = vsel %vm616_vm1, %v617_v4, 0  ;;  %s2138_s24 = scalar_lea.vmem %s2424_s0, %s1908_s21  ;;  %s2143_s27 = scalar_lea.vmem %s2425_s1, %s1908_s21 }
   0xf   : > { %v620_v6 = vand.u32 %v1713_v2, %v618_v5  ;;  %v1912_v7 = vld [vmem:[%s2138_s24] sm:$0xff]  ;;  %v1913_v11 = vld [vmem:[%s2138_s24 + $0x8] sm:$0xff]  ;;  %v1914_v15 = vld [vmem:[%s2138_s24 + $0x10] sm:$0xff]  ;;  %s2254_s7 = scalar_lea.vmem %s2428_s4, %s1910_s30 }
  0x10   : > { %v1928_v8 = vld [vmem:[%s2138_s24 + $0x80] sm:$0xff]  ;;  %v1929_v12 = vld [vmem:[%s2138_s24 + $0x88] sm:$0xff]  ;;  %v1930_v16 = vld [vmem:[%s2138_s24 + $0x90] sm:$0xff] }
  0x11   : > { %629 = vmatpush.bf16.msra.mxu0 %v620_v6  ;;  %2071 = vmatpush.bf16.msra.mxu2 %v620_v6  ;;  %v1944_v9 = vld [vmem:[%s2143_s27] sm:$0xff]  ;;  %v1945_v13 = vld [vmem:[%s2143_s27 + $0x8] sm:$0xff]  ;;  %v1946_v17 = vld [vmem:[%s2143_s27 + $0x10] sm:$0xff] }
  0x12   : > { %1118 = vmatpush.bf16.msra.mxu1 %v620_v6  ;;  %2072 = vmatpush.bf16.msra.mxu3 %v620_v6  ;;  %v1960_v10 = vld [vmem:[%s2143_s27 + $0x80] sm:$0xff]  ;;  %v1961_v14 = vld [vmem:[%s2143_s27 + $0x88] sm:$0xff]  ;;  %v1962_v18 = vld [vmem:[%s2143_s27 + $0x90] sm:$0xff] }
  0x13   : > { %v1915_v19 = vld [vmem:[%s2138_s24 + $0x18] sm:$0xff]  ;;  %v1916_v23 = vld [vmem:[%s2138_s24 + $0x20] sm:$0xff]  ;;  %v1917_v27 = vld [vmem:[%s2138_s24 + $0x28] sm:$0xff] }
  0x14   : > { %1714 = vmatmul.msk.bf16.vlgmr.msra.gmra.mxu0 %vm518_vm2, %v1912_v7  ;;  %1730 = vmatmul.msk.bf16.vlgmr.msra.gmra.mxu2 %vm518_vm2, %v1928_v8  ;;  %v1931_v20 = vld [vmem:[%s2138_s24 + $0x98] sm:$0xff]  ;;  %v1932_v24 = vld [vmem:[%s2138_s24 + $0xa0] sm:$0xff]  ;;  %v1933_v28 = vld [vmem:[%s2138_s24 + $0xa8] sm:$0xff] }
  0x15   : > { %1874 = vmatmul.msk.bf16.vlgmr.msra.gmra.mxu1 %vm518_vm2, %v1944_v9  ;;  %1890 = vmatmul.msk.bf16.vlgmr.msra.gmra.mxu3 %vm518_vm2, %v1960_v10  ;;  %v1947_v21 = vld [vmem:[%s2143_s27 + $0x18] sm:$0xff]  ;;  %v1948_v25 = vld [vmem:[%s2143_s27 + $0x20] sm:$0xff]  ;;  %v1949_v29 = vld [vmem:[%s2143_s27 + $0x28] sm:$0xff] }
  0x16   : > { %v1963_v22 = vld [vmem:[%s2143_s27 + $0x98] sm:$0xff]  ;;  %v1964_v26 = vld [vmem:[%s2143_s27 + $0xa0] sm:$0xff]  ;;  %v1965_v30 = vld [vmem:[%s2143_s27 + $0xa8] sm:$0xff] }
  0x17   : > { %v1918_v31 = vld [vmem:[%s2138_s24 + $0x30] sm:$0xff]  ;;  %v1919_v35 = vld [vmem:[%s2138_s24 + $0x38] sm:$0xff]  ;;  %v1920_v39 = vld [vmem:[%s2138_s24 + $0x40] sm:$0xff] }
  0x18   : > { %v1934_v32 = vld [vmem:[%s2138_s24 + $0xb0] sm:$0xff]  ;;  %v1935_v36 = vld [vmem:[%s2138_s24 + $0xb8] sm:$0xff]  ;;  %v1936_v40 = vld [vmem:[%s2138_s24 + $0xc0] sm:$0xff] }
  0x19   : > { %v1950_v33 = vld [vmem:[%s2143_s27 + $0x30] sm:$0xff]  ;;  %v1951_v37 = vld [vmem:[%s2143_s27 + $0x38] sm:$0xff]  ;;  %v1952_v42 = vld [vmem:[%s2143_s27 + $0x40] sm:$0xff] }
  0x1a   : > { %v1966_v34 = vld [vmem:[%s2143_s27 + $0xb0] sm:$0xff]  ;;  %v1967_v38 = vld [vmem:[%s2143_s27 + $0xb8] sm:$0xff]  ;;  %v1968_v43 = vld [vmem:[%s2143_s27 + $0xc0] sm:$0xff] }
  0x1b   : > { %v1921_v51 = vld [vmem:[%s2138_s24 + $0x48] sm:$0xff] }
  0x1c   : > { %v1937_v52 = vld [vmem:[%s2138_s24 + $0xc8] sm:$0xff] }
  0x1d   : > { %v1953_v54 = vld [vmem:[%s2143_s27 + $0x48] sm:$0xff] }
  0x1e   : > { %v1969_v55 = vld [vmem:[%s2143_s27 + $0xc8] sm:$0xff] }
  0x24   : > { %1715 = vmatmul.msk.bf16.gmra.mxu0 %vm518_vm2, %v1913_v11  ;;  %1731 = vmatmul.msk.bf16.gmra.mxu2 %vm518_vm2, %v1929_v12 }
  0x25   : > { %1875 = vmatmul.msk.bf16.gmra.mxu1 %vm518_vm2, %v1945_v13  ;;  %1891 = vmatmul.msk.bf16.gmra.mxu3 %vm518_vm2, %v1961_v14 }
  0x34   : > { %1716 = vmatmul.msk.bf16.gmra.mxu0 %vm518_vm2, %v1914_v15  ;;  %1732 = vmatmul.msk.bf16.gmra.mxu2 %vm518_vm2, %v1930_v16 }
  0x35   : > { %1876 = vmatmul.msk.bf16.gmra.mxu1 %vm518_vm2, %v1946_v17  ;;  %1892 = vmatmul.msk.bf16.gmra.mxu3 %vm518_vm2, %v1962_v18 }
  0x44   : > { %1717 = vmatmul.msk.bf16.gmra.mxu0 %vm518_vm2, %v1915_v19  ;;  %1733 = vmatmul.msk.bf16.gmra.mxu2 %vm518_vm2, %v1931_v20 }
  0x45   : > { %1877 = vmatmul.msk.bf16.gmra.mxu1 %vm518_vm2, %v1947_v21  ;;  %1893 = vmatmul.msk.bf16.gmra.mxu3 %vm518_vm2, %v1963_v22 }
  0x54   : > { %1718 = vmatmul.msk.bf16.gmra.mxu0 %vm518_vm2, %v1916_v23  ;;  %1734 = vmatmul.msk.bf16.gmra.mxu2 %vm518_vm2, %v1932_v24 }
  0x55   : > { %1878 = vmatmul.msk.bf16.gmra.mxu1 %vm518_vm2, %v1948_v25  ;;  %1894 = vmatmul.msk.bf16.gmra.mxu3 %vm518_vm2, %v1964_v26 }
  0x64   : > { %1719 = vmatmul.msk.bf16.gmra.mxu0 %vm518_vm2, %v1917_v27  ;;  %1735 = vmatmul.msk.bf16.gmra.mxu2 %vm518_vm2, %v1933_v28 }
  0x65   : > { %1879 = vmatmul.msk.bf16.gmra.mxu1 %vm518_vm2, %v1949_v29  ;;  %1895 = vmatmul.msk.bf16.gmra.mxu3 %vm518_vm2, %v1965_v30 }
  0x74   : > { %1720 = vmatmul.msk.bf16.gmra.mxu0 %vm518_vm2, %v1918_v31  ;;  %1736 = vmatmul.msk.bf16.gmra.mxu2 %vm518_vm2, %v1934_v32  ;;  %v1922_v32 = vld [vmem:[%s2138_s24 + $0x50] sm:$0xff] }
  0x75   : > { %1880 = vmatmul.msk.bf16.gmra.mxu1 %vm518_vm2, %v1950_v33  ;;  %1896 = vmatmul.msk.bf16.gmra.mxu3 %vm518_vm2, %v1966_v34  ;;  %v1938_v33 = vld [vmem:[%s2138_s24 + $0xd0] sm:$0xff] }
  0x84   : > { %1721 = vmatmul.msk.bf16.gmra.mxu0 %vm518_vm2, %v1919_v35  ;;  %1737 = vmatmul.msk.bf16.gmra.mxu2 %vm518_vm2, %v1935_v36 }
  0x85   : > { %1881 = vmatmul.msk.bf16.gmra.mxu1 %vm518_vm2, %v1951_v37  ;;  %1897 = vmatmul.msk.bf16.gmra.mxu3 %vm518_vm2, %v1967_v38 }
  0x91   : > { %v631_v41 = vpop.f32.mrf.mxu0 }
  0x92   : > { %v1120_v44 = vpop.f32.mrf.mxu1  ;;  %v632_v60 = vadd.f32 %v2224_v56, %v631_v41 }
  0x93   : > { %v1121_v61 = vadd.f32 %v2224_v56, %v1120_v44 }
  0x94   : > { %1722 = vmatmul.msk.bf16.gmra.mxu0 %vm518_vm2, %v1920_v39  ;;  %1738 = vmatmul.msk.bf16.gmra.mxu2 %vm518_vm2, %v1936_v40  ;;  %v791_v5 = vmax.f32 %v632_v60, 0.0  ;;  %v1954_v39 = vld [vmem:[%s2143_s27 + $0x50] sm:$0xff]  ;;  %v1939_v60 = vld [vmem:[%s2138_s24 + $0xd8] sm:$0xff] }
  0x95   : > { %1882 = vmatmul.msk.bf16.gmra.mxu1 %vm518_vm2, %v1952_v42  ;;  %1898 = vmatmul.msk.bf16.gmra.mxu3 %vm518_vm2, %v1968_v43  ;;  %v1280_v6 = vmax.f32 %v1121_v61, 0.0  ;;  %v1970_v40 = vld [vmem:[%s2143_s27 + $0xd0] sm:$0xff] }
  0x97   : > { %v711_v45 = vpop.f32.mrf.mxu2  ;;  %v1344_v21 = vmax.f32 %v791_v5, %v1280_v6 }
  0x98   : > { %v1200_v46 = vpop.f32.mrf.mxu3  ;;  %v712_v14 = vadd.f32 %v2224_v56, %v711_v45 }
  0x99   : > { %v633_v47 = vpop.f32.mrf.mxu0  ;;  %v1201_v15 = vadd.f32 %v2224_v56, %v1200_v46 }
  0x9a   : > { %v1122_v48 = vpop.f32.mrf.mxu1  ;;  %v634_v62 = vadd.f32 %v2224_v56, %v633_v47  ;;  %v823_v27 = vmax.f32 %v712_v14, 0.0 }
  0x9b   : > { %v1123_v63 = vadd.f32 %v2224_v56, %v1122_v48  ;;  %v1312_v28 = vmax.f32 %v1201_v15, 0.0 }
  0x9c   : > { %v792_v7 = vmax.f32 %v634_v62, 0.0  ;;  %v1955_v62 = vld [vmem:[%s2143_s27 + $0x58] sm:$0xff] }
  0x9d   : > { %v1281_v10 = vmax.f32 %v1123_v63, 0.0  ;;  %v1376_v46 = vmax.f32 %v823_v27, %v1312_v28  ;;  %v1971_v63 = vld [vmem:[%s2143_s27 + $0xd8] sm:$0xff] }
  0x9f   : > { %v713_v49 = vpop.f32.mrf.mxu2  ;;  %v1345_v22 = vmax.f32 %v792_v7, %v1281_v10 }
  0xa0   : > { %v1202_v50 = vpop.f32.mrf.mxu3  ;;  %v714_v16 = vadd.f32 %v2224_v56, %v713_v49 }
  0xa1   : > { %v636_v53 = vpop.f32.mrf.mxu0  ;;  %v1203_v18 = vadd.f32 %v2224_v56, %v1202_v50 }
  0xa2   : > { %v1125_v57 = vpop.f32.mrf.mxu1  ;;  %v637_v58 = vadd.f32 %v2224_v56, %v636_v53  ;;  %v824_v29 = vmax.f32 %v714_v16, 0.0 }
  0xa3   : > { %v1126_v59 = vadd.f32 %v2224_v56, %v1125_v57  ;;  %v1313_v34 = vmax.f32 %v1203_v18, 0.0 }
  0xa4   : > { %1723 = vmatmul.msk.bf16.gmra.mxu0 %vm518_vm2, %v1921_v51  ;;  %1739 = vmatmul.msk.bf16.gmra.mxu2 %vm518_vm2, %v1937_v52  ;;  %v793_v2 = vmax.f32 %v637_v58, 0.0 }
  0xa5   : > { %1883 = vmatmul.msk.bf16.gmra.mxu1 %vm518_vm2, %v1953_v54  ;;  %1899 = vmatmul.msk.bf16.gmra.mxu3 %vm518_vm2, %v1969_v55  ;;  %v1282_v3 = vmax.f32 %v1126_v59, 0.0  ;;  %v1377_v47 = vmax.f32 %v824_v29, %v1313_v34  ;;  %v1923_v59 = vld [vmem:[%s2138_s24 + $0x58] sm:$0xff] }
  0xa7   : > { %v716_v0 = vpop.f32.mrf.mxu2  ;;  %v1346_v19 = vmax.f32 %v793_v2, %v1282_v3 }
  0xa8   : > { %v1205_v1 = vpop.f32.mrf.mxu3  ;;  %v717_v11 = vadd.f32 %v2224_v56, %v716_v0 }
  0xa9   : > { %v638_v4 = vpop.f32.mrf.mxu0  ;;  %v1206_v12 = vadd.f32 %v2224_v56, %v1205_v1  ;;  %v1408_v35 = vmax.f32 %v1344_v21, %v1346_v19 }
  0xaa   : > { %v639_v8 = vadd.f32 %v2224_v56, %v638_v4  ;;  %v1127_v9 = vpop.f32.mrf.mxu1  ;;  %v825_v23 = vmax.f32 %v717_v11, 0.0 }
  0xab   : > { %v1128_v13 = vadd.f32 %v2224_v56, %v1127_v9  ;;  %v1314_v24 = vmax.f32 %v1206_v12, 0.0 }
  0xac   : > { %v794_v17 = vmax.f32 %v639_v8, 0.0 }
  0xad   : > { %v1283_v20 = vmax.f32 %v1128_v13, 0.0  ;;  %v1378_v43 = vmax.f32 %v825_v23, %v1314_v24 }
  0xaf   : > { %v1347_v25 = vmax.f32 %v794_v17, %v1283_v20  ;;  %v718_v26 = vpop.f32.mrf.mxu2  ;;  %v1424_v49 = vmax.f32 %v1376_v46, %v1378_v43  ;;  %v1956_v46 = vld [vmem:[%s2143_s27 + $0x60] sm:$0xff] }
  0xb0   : > { %v719_v30 = vadd.f32 %v2224_v56, %v718_v26  ;;  %v1207_v31 = vpop.f32.mrf.mxu3 }
  0xb1   : > { %v1409_v36 = vmax.f32 %v1345_v22, %v1347_v25  ;;  %v1208_v37 = vadd.f32 %v2224_v56, %v1207_v31  ;;  %v641_v38 = vpop.f32.mrf.mxu0 }
  0xb2   : > { %v826_v41 = vmax.f32 %v719_v30, 0.0  ;;  %v1130_v42 = vpop.f32.mrf.mxu1  ;;  %v642_v3 = vadd.f32 %v2224_v56, %v641_v38 }
  0xb3   : > { %v1979_v44 = vpack.c.bf16 %v1409_v36, %v1408_v35  ;;  %v1315_v45 = vmax.f32 %v1208_v37, 0.0  ;;  %v1131_v4 = vadd.f32 %v2224_v56, %v1130_v42 }
  0xb4   : > { %1724 = vmatmul.msk.bf16.gmra.mxu0 %vm518_vm2, %v1922_v32  ;;  %1740 = vmatmul.msk.bf16.gmra.mxu2 %vm518_vm2, %v1938_v33  ;;  %v795_v12 = vmax.f32 %v642_v3, 0.0  ;;  %v1941_v3 = vld [vmem:[%s2138_s24 + $0xe8] sm:$0xff] }
  0xb5   : > { %1980 = vst [vmem:[%s2254_s7] sm:$0xff] %v1979_v44   ;;  %v1379_v48 = vmax.f32 %v826_v41, %v1315_v45  ;;  %1884 = vmatmul.msk.bf16.gmra.mxu1 %vm518_vm2, %v1954_v39  ;;  %1900 = vmatmul.msk.bf16.gmra.mxu3 %vm518_vm2, %v1970_v40  ;;  %v1284_v13 = vmax.f32 %v1131_v4, 0.0  ;;  %v1924_v39 = vld [vmem:[%s2138_s24 + $0x60] sm:$0xff] }
  0xb6   : > { %v1940_v40 = vld [vmem:[%s2138_s24 + $0xe0] sm:$0xff] }
  0xb7   : > { %v1425_v50 = vmax.f32 %v1377_v47, %v1379_v48  ;;  %v721_v51 = vpop.f32.mrf.mxu2  ;;  %v1348_v28 = vmax.f32 %v795_v12, %v1284_v13  ;;  %v1972_v47 = vld [vmem:[%s2143_s27 + $0xe0] sm:$0xff] }
  0xb8   : > { %v1210_v52 = vpop.f32.mrf.mxu3  ;;  %v722_v21 = vadd.f32 %v2224_v56, %v721_v51 }
  0xb9   : > { %v2019_v53 = vpack.c.bf16 %v1425_v50, %v1424_v49  ;;  %v643_v54 = vpop.f32.mrf.mxu0  ;;  %v1211_v22 = vadd.f32 %v2224_v56, %v1210_v52 }
  0xba   : > { %v1132_v55 = vpop.f32.mrf.mxu1  ;;  %v644_v5 = vadd.f32 %v2224_v56, %v643_v54  ;;  %v827_v34 = vmax.f32 %v722_v21, 0.0 }
  0xbb   : > { %2063 = vst [vmem:[%s2254_s7 + $0x40] sm:$0xff] %v2019_v53   ;;  %v1133_v6 = vadd.f32 %v2224_v56, %v1132_v55  ;;  %v1316_v35 = vmax.f32 %v1211_v22, 0.0 }
  0xbc   : > { %v796_v14 = vmax.f32 %v644_v5, 0.0  ;;  %v1957_v5 = vld [vmem:[%s2143_s27 + $0x68] sm:$0xff] }
  0xbd   : > { %v1285_v17 = vmax.f32 %v1133_v6, 0.0  ;;  %v1380_v53 = vmax.f32 %v827_v34, %v1316_v35  ;;  %v1973_v6 = vld [vmem:[%s2143_s27 + $0xe8] sm:$0xff] }
  0xbf   : > { %v723_v57 = vpop.f32.mrf.mxu2  ;;  %v1349_v29 = vmax.f32 %v796_v14, %v1285_v17 }
  0xc0   : > { %v1212_v58 = vpop.f32.mrf.mxu3  ;;  %v724_v23 = vadd.f32 %v2224_v56, %v723_v57 }
  0xc1   : > { %v646_v61 = vpop.f32.mrf.mxu0  ;;  %v1213_v25 = vadd.f32 %v2224_v56, %v1212_v58 }
  0xc2   : > { %v1135_v0 = vpop.f32.mrf.mxu1  ;;  %v647_v1 = vadd.f32 %v2224_v56, %v646_v61  ;;  %v828_v36 = vmax.f32 %v724_v23, 0.0 }
  0xc3   : > { %v1136_v2 = vadd.f32 %v2224_v56, %v1135_v0  ;;  %v1317_v41 = vmax.f32 %v1213_v25, 0.0 }
  0xc4   : > { %1725 = vmatmul.msk.bf16.gmra.mxu0 %vm518_vm2, %v1923_v59  ;;  %1741 = vmatmul.msk.bf16.gmra.mxu2 %vm518_vm2, %v1939_v60  ;;  %v797_v9 = vmax.f32 %v647_v1, 0.0 }
  0xc5   : > { %1885 = vmatmul.msk.bf16.gmra.mxu1 %vm518_vm2, %v1955_v62  ;;  %1901 = vmatmul.msk.bf16.gmra.mxu3 %vm518_vm2, %v1971_v63  ;;  %v1286_v10 = vmax.f32 %v1136_v2, 0.0  ;;  %v1381_v54 = vmax.f32 %v828_v36, %v1317_v41  ;;  %v1925_v2 = vld [vmem:[%s2138_s24 + $0x68] sm:$0xff] }
  0xc7   : > { %v726_v7 = vpop.f32.mrf.mxu2  ;;  %v1350_v26 = vmax.f32 %v797_v9, %v1286_v10 }
  0xc8   : > { %v1215_v8 = vpop.f32.mrf.mxu3  ;;  %v727_v18 = vadd.f32 %v2224_v56, %v726_v7 }
  0xc9   : > { %v648_v11 = vpop.f32.mrf.mxu0  ;;  %v1216_v19 = vadd.f32 %v2224_v56, %v1215_v8  ;;  %v1410_v42 = vmax.f32 %v1348_v28, %v1350_v26 }
  0xca   : > { %v649_v15 = vadd.f32 %v2224_v56, %v648_v11  ;;  %v1137_v16 = vpop.f32.mrf.mxu1  ;;  %v829_v30 = vmax.f32 %v727_v18, 0.0 }
  0xcb   : > { %v1138_v20 = vadd.f32 %v2224_v56, %v1137_v16  ;;  %v1318_v31 = vmax.f32 %v1216_v19, 0.0 }
  0xcc   : > { %v798_v24 = vmax.f32 %v649_v15, 0.0 }
  0xcd   : > { %v1287_v27 = vmax.f32 %v1138_v20, 0.0  ;;  %v1382_v50 = vmax.f32 %v829_v30, %v1318_v31 }
  0xcf   : > { %v1351_v32 = vmax.f32 %v798_v24, %v1287_v27  ;;  %v728_v33 = vpop.f32.mrf.mxu2  ;;  %v1426_v57 = vmax.f32 %v1380_v53, %v1382_v50  ;;  %v1958_v53 = vld [vmem:[%s2143_s27 + $0x70] sm:$0xff] }
  0xd0   : > { %v729_v37 = vadd.f32 %v2224_v56, %v728_v33  ;;  %v1217_v38 = vpop.f32.mrf.mxu3 }
  0xd1   : > { %v1411_v43 = vmax.f32 %v1349_v29, %v1351_v32  ;;  %v1218_v44 = vadd.f32 %v2224_v56, %v1217_v38  ;;  %v651_v45 = vpop.f32.mrf.mxu0 }
  0xd2   : > { %v830_v48 = vmax.f32 %v729_v37, 0.0  ;;  %v1140_v49 = vpop.f32.mrf.mxu1  ;;  %v652_v10 = vadd.f32 %v2224_v56, %v651_v45 }
  0xd3   : > { %v1984_v51 = vpack.c.bf16 %v1411_v43, %v1410_v42  ;;  %v1319_v52 = vmax.f32 %v1218_v44, 0.0  ;;  %v1141_v11 = vadd.f32 %v2224_v56, %v1140_v49 }
  0xd4   : > { %1726 = vmatmul.msk.bf16.gmra.mxu0 %vm518_vm2, %v1924_v39  ;;  %1742 = vmatmul.msk.bf16.gmra.mxu2 %vm518_vm2, %v1940_v40  ;;  %v799_v19 = vmax.f32 %v652_v10, 0.0  ;;  %v1943_v10 = vld [vmem:[%s2138_s24 + $0xf8] sm:$0xff] }
  0xd5   : > { %2056 = vst [vmem:[%s2254_s7 + $0x8] sm:$0xff] %v1984_v51   ;;  %v1383_v55 = vmax.f32 %v830_v48, %v1319_v52  ;;  %1886 = vmatmul.msk.bf16.gmra.mxu1 %vm518_vm2, %v1956_v46  ;;  %1902 = vmatmul.msk.bf16.gmra.mxu3 %vm518_vm2, %v1972_v47  ;;  %v1288_v20 = vmax.f32 %v1141_v11, 0.0  ;;  %v1926_v46 = vld [vmem:[%s2138_s24 + $0x70] sm:$0xff] }
  0xd6   : > { %v1942_v47 = vld [vmem:[%s2138_s24 + $0xf0] sm:$0xff] }
  0xd7   : > { %v1427_v58 = vmax.f32 %v1381_v54, %v1383_v55  ;;  %v731_v59 = vpop.f32.mrf.mxu2  ;;  %v1352_v35 = vmax.f32 %v799_v19, %v1288_v20  ;;  %v1974_v54 = vld [vmem:[%s2143_s27 + $0xf0] sm:$0xff] }
  0xd8   : > { %v1220_v60 = vpop.f32.mrf.mxu3  ;;  %v732_v28 = vadd.f32 %v2224_v56, %v731_v59 }
  0xd9   : > { %v2024_v61 = vpack.c.bf16 %v1427_v58, %v1426_v57  ;;  %v653_v62 = vpop.f32.mrf.mxu0  ;;  %v1221_v29 = vadd.f32 %v2224_v56, %v1220_v60 }
  0xda   : > { %v1142_v63 = vpop.f32.mrf.mxu1  ;;  %v654_v12 = vadd.f32 %v2224_v56, %v653_v62  ;;  %v831_v41 = vmax.f32 %v732_v28, 0.0 }
  0xdb   : > { %2064 = vst [vmem:[%s2254_s7 + $0x48] sm:$0xff] %v2024_v61   ;;  %v1143_v13 = vadd.f32 %v2224_v56, %v1142_v63  ;;  %v1320_v42 = vmax.f32 %v1221_v29, 0.0 }
  0xdc   : > { %v800_v21 = vmax.f32 %v654_v12, 0.0  ;;  %v1959_v12 = vld [vmem:[%s2143_s27 + $0x78] sm:$0xff] }
  0xdd   : > { %v1289_v24 = vmax.f32 %v1143_v13, 0.0  ;;  %v1384_v61 = vmax.f32 %v831_v41, %v1320_v42  ;;  %v1975_v13 = vld [vmem:[%s2143_s27 + $0xf8] sm:$0xff] }
  0xdf   : > { %v733_v0 = vpop.f32.mrf.mxu2  ;;  %v1353_v36 = vmax.f32 %v800_v21, %v1289_v24 }
  0xe0   : > { %v1222_v1 = vpop.f32.mrf.mxu3  ;;  %v734_v30 = vadd.f32 %v2224_v56, %v733_v0 }
  0xe1   : > { %v656_v4 = vpop.f32.mrf.mxu0  ;;  %v1223_v32 = vadd.f32 %v2224_v56, %v1222_v1 }
  0xe2   : > { %v1145_v7 = vpop.f32.mrf.mxu1  ;;  %v657_v8 = vadd.f32 %v2224_v56, %v656_v4  ;;  %v832_v43 = vmax.f32 %v734_v30, 0.0 }
  0xe3   : > { %v1146_v9 = vadd.f32 %v2224_v56, %v1145_v7  ;;  %v1321_v48 = vmax.f32 %v1223_v32, 0.0 }
  0xe4   : > { %1727 = vmatmul.msk.bf16.gmra.mxu0 %vm518_vm2, %v1925_v2  ;;  %1743 = vmatmul.msk.bf16.gmra.mxu2 %vm518_vm2, %v1941_v3  ;;  %v801_v16 = vmax.f32 %v657_v8, 0.0 }
  0xe5   : > { %1887 = vmatmul.msk.bf16.gmra.mxu1 %vm518_vm2, %v1957_v5  ;;  %1903 = vmatmul.msk.bf16.gmra.mxu3 %vm518_vm2, %v1973_v6  ;;  %v1290_v17 = vmax.f32 %v1146_v9, 0.0  ;;  %v1385_v62 = vmax.f32 %v832_v43, %v1321_v48  ;;  %v1927_v9 = vld [vmem:[%s2138_s24 + $0x78] sm:$0xff] }
  0xe7   : > { %v736_v14 = vpop.f32.mrf.mxu2  ;;  %v1354_v33 = vmax.f32 %v801_v16, %v1290_v17 }
  0xe8   : > { %v1225_v15 = vpop.f32.mrf.mxu3  ;;  %v737_v25 = vadd.f32 %v2224_v56, %v736_v14 }
  0xe9   : > { %v658_v18 = vpop.f32.mrf.mxu0  ;;  %v1226_v26 = vadd.f32 %v2224_v56, %v1225_v15  ;;  %v1412_v49 = vmax.f32 %v1352_v35, %v1354_v33 }
  0xea   : > { %v659_v22 = vadd.f32 %v2224_v56, %v658_v18  ;;  %v1147_v23 = vpop.f32.mrf.mxu1  ;;  %v833_v37 = vmax.f32 %v737_v25, 0.0 }
  0xeb   : > { %v1148_v27 = vadd.f32 %v2224_v56, %v1147_v23  ;;  %v1322_v38 = vmax.f32 %v1226_v26, 0.0 }
  0xec   : > { %v802_v31 = vmax.f32 %v659_v22, 0.0 }
  0xed   : > { %v1291_v34 = vmax.f32 %v1148_v27, 0.0  ;;  %v1386_v58 = vmax.f32 %v833_v37, %v1322_v38 }
  0xef   : > { %v1355_v39 = vmax.f32 %v802_v31, %v1291_v34  ;;  %v738_v40 = vpop.f32.mrf.mxu2  ;;  %v1428_v0 = vmax.f32 %v1384_v61, %v1386_v58 }
  0xf0   : > { %v739_v44 = vadd.f32 %v2224_v56, %v738_v40  ;;  %v1227_v45 = vpop.f32.mrf.mxu3 }
  0xf1   : > { %v1413_v50 = vmax.f32 %v1353_v36, %v1355_v39  ;;  %v1228_v51 = vadd.f32 %v2224_v56, %v1227_v45  ;;  %v661_v52 = vpop.f32.mrf.mxu0 }
  0xf2   : > { %v834_v55 = vmax.f32 %v739_v44, 0.0  ;;  %v1150_v57 = vpop.f32.mrf.mxu1  ;;  %v662_v17 = vadd.f32 %v2224_v56, %v661_v52 }
  0xf3   : > { %v1989_v59 = vpack.c.bf16 %v1413_v50, %v1412_v49  ;;  %v1323_v60 = vmax.f32 %v1228_v51, 0.0  ;;  %v1151_v18 = vadd.f32 %v2224_v56, %v1150_v57 }
  0xf4   : > { %1728 = vmatmul.msk.bf16.gmra.mxu0 %vm518_vm2, %v1926_v46  ;;  %1744 = vmatmul.msk.bf16.gmra.mxu2 %vm518_vm2, %v1942_v47  ;;  %v803_v26 = vmax.f32 %v662_v17, 0.0 }
  0xf5   : > { %2057 = vst [vmem:[%s2254_s7 + $0x10] sm:$0xff] %v1989_v59   ;;  %v1387_v63 = vmax.f32 %v834_v55, %v1323_v60  ;;  %1888 = vmatmul.msk.bf16.gmra.mxu1 %vm518_vm2, %v1958_v53  ;;  %1904 = vmatmul.msk.bf16.gmra.mxu3 %vm518_vm2, %v1974_v54  ;;  %v1292_v27 = vmax.f32 %v1151_v18, 0.0 }
  0xf7   : > { %v1429_v1 = vmax.f32 %v1385_v62, %v1387_v63  ;;  %v741_v2 = vpop.f32.mrf.mxu2  ;;  %v1356_v42 = vmax.f32 %v803_v26, %v1292_v27 }
  0xf8   : > { %v1230_v3 = vpop.f32.mrf.mxu3  ;;  %v742_v35 = vadd.f32 %v2224_v56, %v741_v2 }
  0xf9   : > { %v2029_v4 = vpack.c.bf16 %v1429_v1, %v1428_v0  ;;  %v663_v5 = vpop.f32.mrf.mxu0  ;;  %v1231_v36 = vadd.f32 %v2224_v56, %v1230_v3 }
  0xfa   : > { %v1152_v6 = vpop.f32.mrf.mxu1  ;;  %v664_v19 = vadd.f32 %v2224_v56, %v663_v5  ;;  %v835_v48 = vmax.f32 %v742_v35, 0.0 }
  0xfb   : > { %2065 = vst [vmem:[%s2254_s7 + $0x50] sm:$0xff] %v2029_v4   ;;  %v1153_v20 = vadd.f32 %v2224_v56, %v1152_v6  ;;  %v1324_v49 = vmax.f32 %v1231_v36, 0.0 }
  0xfc   : > { %v804_v28 = vmax.f32 %v664_v19, 0.0 }
  0xfd   : > { %v1293_v31 = vmax.f32 %v1153_v20, 0.0  ;;  %v1388_v0 = vmax.f32 %v835_v48, %v1324_v49 }
  0xff   : > { %v743_v7 = vpop.f32.mrf.mxu2  ;;  %v1357_v43 = vmax.f32 %v804_v28, %v1293_v31 }
 0x100   : > { %v1232_v8 = vpop.f32.mrf.mxu3  ;;  %v744_v37 = vadd.f32 %v2224_v56, %v743_v7 }
 0x101   : > { %v666_v11 = vpop.f32.mrf.mxu0  ;;  %v1233_v39 = vadd.f32 %v2224_v56, %v1232_v8 }
 0x102   : > { %v1155_v14 = vpop.f32.mrf.mxu1  ;;  %v667_v15 = vadd.f32 %v2224_v56, %v666_v11  ;;  %v836_v50 = vmax.f32 %v744_v37, 0.0 }
 0x103   : > { %v1156_v16 = vadd.f32 %v2224_v56, %v1155_v14  ;;  %v1325_v53 = vmax.f32 %v1233_v39, 0.0 }
 0x104   : > { %1729 = vmatmul.msk.bf16.gmra.mxu0 %vm518_vm2, %v1927_v9  ;;  %1745 = vmatmul.msk.bf16.gmra.mxu2 %vm518_vm2, %v1943_v10  ;;  %v805_v23 = vmax.f32 %v667_v15, 0.0 }
 0x105   : > { %1889 = vmatmul.msk.bf16.gmra.mxu1 %vm518_vm2, %v1959_v12  ;;  %1905 = vmatmul.msk.bf16.gmra.mxu3 %vm518_vm2, %v1975_v13  ;;  %v1294_v24 = vmax.f32 %v1156_v16, 0.0  ;;  %v1389_v1 = vmax.f32 %v836_v50, %v1325_v53 }
 0x107   : > { %v746_v21 = vpop.f32.mrf.mxu2  ;;  %v1358_v40 = vmax.f32 %v805_v23, %v1294_v24 }
 0x108   : > { %v1235_v22 = vpop.f32.mrf.mxu3  ;;  %v747_v32 = vadd.f32 %v2224_v56, %v746_v21 }
 0x109   : > { %v668_v25 = vpop.f32.mrf.mxu0  ;;  %v1236_v33 = vadd.f32 %v2224_v56, %v1235_v22  ;;  %v1414_v54 = vmax.f32 %v1356_v42, %v1358_v40 }
 0x10a   : > { %v669_v29 = vadd.f32 %v2224_v56, %v668_v25  ;;  %v1157_v30 = vpop.f32.mrf.mxu1  ;;  %v837_v44 = vmax.f32 %v747_v32, 0.0 }
 0x10b   : > { %v1158_v34 = vadd.f32 %v2224_v56, %v1157_v30  ;;  %v1326_v45 = vmax.f32 %v1236_v33, 0.0 }
 0x10c   : > { %v806_v38 = vmax.f32 %v669_v29, 0.0 }
 0x10d   : > { %v1295_v41 = vmax.f32 %v1158_v34, 0.0  ;;  %v1390_v61 = vmax.f32 %v837_v44, %v1326_v45 }
 0x10f   : > { %v1359_v46 = vmax.f32 %v806_v38, %v1295_v41  ;;  %v748_v47 = vpop.f32.mrf.mxu2  ;;  %v1430_v3 = vmax.f32 %v1388_v0, %v1390_v61 }
 0x110   : > { %v749_v51 = vadd.f32 %v2224_v56, %v748_v47  ;;  %v1237_v52 = vpop.f32.mrf.mxu3 }
 0x111   : > { %v1415_v55 = vmax.f32 %v1357_v43, %v1359_v46  ;;  %v1238_v57 = vadd.f32 %v2224_v56, %v1237_v52  ;;  %v671_v58 = vpop.f32.mrf.mxu0 }
 0x112   : > { %v838_v59 = vmax.f32 %v749_v51, 0.0  ;;  %v1160_v60 = vpop.f32.mrf.mxu1  ;;  %v672_v16 = vadd.f32 %v2224_v56, %v671_v58 }
 0x113   : > { %v1994_v62 = vpack.c.bf16 %v1415_v55, %v1414_v54  ;;  %v1327_v63 = vmax.f32 %v1238_v57, 0.0  ;;  %v1161_v17 = vadd.f32 %v2224_v56, %v1160_v60 }
 0x114   : > { %v807_v25 = vmax.f32 %v672_v16, 0.0 }
 0x115   : > { %2058 = vst [vmem:[%s2254_s7 + $0x18] sm:$0xff] %v1994_v62   ;;  %v1391_v2 = vmax.f32 %v838_v59, %v1327_v63  ;;  %v1296_v26 = vmax.f32 %v1161_v17, 0.0 }
 0x117   : > { %v1431_v4 = vmax.f32 %v1389_v1, %v1391_v2  ;;  %v751_v5 = vpop.f32.mrf.mxu2  ;;  %v1360_v41 = vmax.f32 %v807_v25, %v1296_v26 }
 0x118   : > { %v1240_v6 = vpop.f32.mrf.mxu3  ;;  %v752_v34 = vadd.f32 %v2224_v56, %v751_v5 }
 0x119   : > { %v2034_v7 = vpack.c.bf16 %v1431_v4, %v1430_v3  ;;  %v673_v8 = vpop.f32.mrf.mxu0  ;;  %v1241_v35 = vadd.f32 %v2224_v56, %v1240_v6 }
 0x11a   : > { %v1162_v9 = vpop.f32.mrf.mxu1  ;;  %v674_v18 = vadd.f32 %v2224_v56, %v673_v8  ;;  %v839_v47 = vmax.f32 %v752_v34, 0.0 }
 0x11b   : > { %2066 = vst [vmem:[%s2254_s7 + $0x58] sm:$0xff] %v2034_v7   ;;  %v1163_v19 = vadd.f32 %v2224_v56, %v1162_v9  ;;  %v1328_v48 = vmax.f32 %v1241_v35, 0.0 }
 0x11c   : > { %v808_v27 = vmax.f32 %v674_v18, 0.0 }
 0x11d   : > { %v1297_v30 = vmax.f32 %v1163_v19, 0.0  ;;  %v1392_v63 = vmax.f32 %v839_v47, %v1328_v48 }
 0x11f   : > { %v753_v10 = vpop.f32.mrf.mxu2  ;;  %v1361_v42 = vmax.f32 %v808_v27, %v1297_v30 }
 0x120   : > { %v1242_v11 = vpop.f32.mrf.mxu3  ;;  %v754_v36 = vadd.f32 %v2224_v56, %v753_v10 }
 0x121   : > { %v676_v12 = vpop.f32.mrf.mxu0  ;;  %v1243_v38 = vadd.f32 %v2224_v56, %v1242_v11 }
 0x122   : > { %v1165_v13 = vpop.f32.mrf.mxu1  ;;  %v677_v14 = vadd.f32 %v2224_v56, %v676_v12  ;;  %v840_v49 = vmax.f32 %v754_v36, 0.0 }
 0x123   : > { %v1166_v15 = vadd.f32 %v2224_v56, %v1165_v13  ;;  %v1329_v52 = vmax.f32 %v1243_v38, 0.0 }
 0x124   : > { %v809_v22 = vmax.f32 %v677_v14, 0.0 }
 0x125   : > { %v1298_v23 = vmax.f32 %v1166_v15, 0.0  ;;  %v1393_v0 = vmax.f32 %v840_v49, %v1329_v52 }
 0x127   : > { %v756_v20 = vpop.f32.mrf.mxu2  ;;  %v1362_v39 = vmax.f32 %v809_v22, %v1298_v23 }
 0x128   : > { %v1245_v21 = vpop.f32.mrf.mxu3  ;;  %v757_v31 = vadd.f32 %v2224_v56, %v756_v20 }
 0x129   : > { %v678_v24 = vpop.f32.mrf.mxu0  ;;  %v1246_v32 = vadd.f32 %v2224_v56, %v1245_v21  ;;  %v1416_v53 = vmax.f32 %v1360_v41, %v1362_v39 }
 0x12a   : > { %v679_v28 = vadd.f32 %v2224_v56, %v678_v24  ;;  %v1167_v29 = vpop.f32.mrf.mxu1  ;;  %v841_v43 = vmax.f32 %v757_v31, 0.0 }
 0x12b   : > { %v1168_v33 = vadd.f32 %v2224_v56, %v1167_v29  ;;  %v1330_v44 = vmax.f32 %v1246_v32, 0.0 }
 0x12c   : > { %v810_v37 = vmax.f32 %v679_v28, 0.0 }
 0x12d   : > { %v1299_v40 = vmax.f32 %v1168_v33, 0.0  ;;  %v1394_v60 = vmax.f32 %v841_v43, %v1330_v44 }
 0x12f   : > { %v1363_v45 = vmax.f32 %v810_v37, %v1299_v40  ;;  %v758_v46 = vpop.f32.mrf.mxu2  ;;  %v1432_v2 = vmax.f32 %v1392_v63, %v1394_v60 }
 0x130   : > { %v759_v50 = vadd.f32 %v2224_v56, %v758_v46  ;;  %v1247_v51 = vpop.f32.mrf.mxu3 }
 0x131   : > { %v1417_v54 = vmax.f32 %v1361_v42, %v1363_v45  ;;  %v1248_v55 = vadd.f32 %v2224_v56, %v1247_v51  ;;  %v681_v57 = vpop.f32.mrf.mxu0 }
 0x132   : > { %v842_v58 = vmax.f32 %v759_v50, 0.0  ;;  %v1170_v59 = vpop.f32.mrf.mxu1  ;;  %v682_v15 = vadd.f32 %v2224_v56, %v681_v57 }
 0x133   : > { %v1999_v61 = vpack.c.bf16 %v1417_v54, %v1416_v53  ;;  %v1331_v62 = vmax.f32 %v1248_v55, 0.0  ;;  %v1171_v16 = vadd.f32 %v2224_v56, %v1170_v59 }
 0x134   : > { %v811_v24 = vmax.f32 %v682_v15, 0.0 }
 0x135   : > { %2059 = vst [vmem:[%s2254_s7 + $0x20] sm:$0xff] %v1999_v61   ;;  %v1395_v1 = vmax.f32 %v842_v58, %v1331_v62  ;;  %v1300_v25 = vmax.f32 %v1171_v16, 0.0 }
 0x137   : > { %v1433_v3 = vmax.f32 %v1393_v0, %v1395_v1  ;;  %v761_v4 = vpop.f32.mrf.mxu2  ;;  %v1364_v40 = vmax.f32 %v811_v24, %v1300_v25 }
 0x138   : > { %v1250_v5 = vpop.f32.mrf.mxu3  ;;  %v762_v33 = vadd.f32 %v2224_v56, %v761_v4 }
 0x139   : > { %v2039_v6 = vpack.c.bf16 %v1433_v3, %v1432_v2  ;;  %v683_v7 = vpop.f32.mrf.mxu0  ;;  %v1251_v34 = vadd.f32 %v2224_v56, %v1250_v5 }
 0x13a   : > { %v1172_v8 = vpop.f32.mrf.mxu1  ;;  %v684_v17 = vadd.f32 %v2224_v56, %v683_v7  ;;  %v843_v46 = vmax.f32 %v762_v33, 0.0 }
 0x13b   : > { %2067 = vst [vmem:[%s2254_s7 + $0x60] sm:$0xff] %v2039_v6   ;;  %v1173_v18 = vadd.f32 %v2224_v56, %v1172_v8  ;;  %v1332_v47 = vmax.f32 %v1251_v34, 0.0 }
 0x13c   : > { %v812_v26 = vmax.f32 %v684_v17, 0.0 }
 0x13d   : > { %v1301_v29 = vmax.f32 %v1173_v18, 0.0  ;;  %v1396_v62 = vmax.f32 %v843_v46, %v1332_v47 }
 0x13f   : > { %v763_v9 = vpop.f32.mrf.mxu2  ;;  %v1365_v41 = vmax.f32 %v812_v26, %v1301_v29 }
 0x140   : > { %v1252_v10 = vpop.f32.mrf.mxu3  ;;  %v764_v35 = vadd.f32 %v2224_v56, %v763_v9 }
 0x141   : > { %v686_v11 = vpop.f32.mrf.mxu0  ;;  %v1253_v37 = vadd.f32 %v2224_v56, %v1252_v10 }
 0x142   : > { %v1175_v12 = vpop.f32.mrf.mxu1  ;;  %v687_v13 = vadd.f32 %v2224_v56, %v686_v11  ;;  %v844_v48 = vmax.f32 %v764_v35, 0.0 }
 0x143   : > { %v1176_v14 = vadd.f32 %v2224_v56, %v1175_v12  ;;  %v1333_v51 = vmax.f32 %v1253_v37, 0.0 }
 0x144   : > { %v813_v21 = vmax.f32 %v687_v13, 0.0 }
 0x145   : > { %v1302_v22 = vmax.f32 %v1176_v14, 0.0  ;;  %v1397_v63 = vmax.f32 %v844_v48, %v1333_v51 }
 0x147   : > { %v766_v19 = vpop.f32.mrf.mxu2  ;;  %v1366_v38 = vmax.f32 %v813_v21, %v1302_v22 }
 0x148   : > { %v1255_v20 = vpop.f32.mrf.mxu3  ;;  %v767_v30 = vadd.f32 %v2224_v56, %v766_v19 }
 0x149   : > { %v688_v23 = vpop.f32.mrf.mxu0  ;;  %v1256_v31 = vadd.f32 %v2224_v56, %v1255_v20  ;;  %v1418_v52 = vmax.f32 %v1364_v40, %v1366_v38 }
 0x14a   : > { %v689_v27 = vadd.f32 %v2224_v56, %v688_v23  ;;  %v1177_v28 = vpop.f32.mrf.mxu1  ;;  %v845_v42 = vmax.f32 %v767_v30, 0.0 }
 0x14b   : > { %v1178_v32 = vadd.f32 %v2224_v56, %v1177_v28  ;;  %v1334_v43 = vmax.f32 %v1256_v31, 0.0 }
 0x14c   : > { %v814_v36 = vmax.f32 %v689_v27, 0.0 }
 0x14d   : > { %v1303_v39 = vmax.f32 %v1178_v32, 0.0  ;;  %v1398_v59 = vmax.f32 %v845_v42, %v1334_v43 }
 0x14f   : > { %v1367_v44 = vmax.f32 %v814_v36, %v1303_v39  ;;  %v768_v45 = vpop.f32.mrf.mxu2  ;;  %v1434_v1 = vmax.f32 %v1396_v62, %v1398_v59 }
 0x150   : > { %v769_v49 = vadd.f32 %v2224_v56, %v768_v45  ;;  %v1257_v50 = vpop.f32.mrf.mxu3 }
 0x151   : > { %v1419_v53 = vmax.f32 %v1365_v41, %v1367_v44  ;;  %v1258_v54 = vadd.f32 %v2224_v56, %v1257_v50  ;;  %v691_v55 = vpop.f32.mrf.mxu0 }
 0x152   : > { %v846_v57 = vmax.f32 %v769_v49, 0.0  ;;  %v1180_v58 = vpop.f32.mrf.mxu1  ;;  %v692_v14 = vadd.f32 %v2224_v56, %v691_v55 }
 0x153   : > { %v2004_v60 = vpack.c.bf16 %v1419_v53, %v1418_v52  ;;  %v1335_v61 = vmax.f32 %v1258_v54, 0.0  ;;  %v1181_v15 = vadd.f32 %v2224_v56, %v1180_v58 }
 0x154   : > { %v815_v23 = vmax.f32 %v692_v14, 0.0 }
 0x155   : > { %2060 = vst [vmem:[%s2254_s7 + $0x28] sm:$0xff] %v2004_v60   ;;  %v1399_v0 = vmax.f32 %v846_v57, %v1335_v61  ;;  %v1304_v24 = vmax.f32 %v1181_v15, 0.0 }
 0x157   : > { %v1435_v2 = vmax.f32 %v1397_v63, %v1399_v0  ;;  %v771_v3 = vpop.f32.mrf.mxu2  ;;  %v1368_v39 = vmax.f32 %v815_v23, %v1304_v24 }
 0x158   : > { %v1260_v4 = vpop.f32.mrf.mxu3  ;;  %v772_v32 = vadd.f32 %v2224_v56, %v771_v3 }
 0x159   : > { %v2044_v5 = vpack.c.bf16 %v1435_v2, %v1434_v1  ;;  %v693_v6 = vpop.f32.mrf.mxu0  ;;  %v1261_v33 = vadd.f32 %v2224_v56, %v1260_v4 }
 0x15a   : > { %v1182_v7 = vpop.f32.mrf.mxu1  ;;  %v694_v16 = vadd.f32 %v2224_v56, %v693_v6  ;;  %v847_v45 = vmax.f32 %v772_v32, 0.0 }
 0x15b   : > { %2068 = vst [vmem:[%s2254_s7 + $0x68] sm:$0xff] %v2044_v5   ;;  %v1183_v17 = vadd.f32 %v2224_v56, %v1182_v7  ;;  %v1336_v46 = vmax.f32 %v1261_v33, 0.0 }
 0x15c   : > { %v816_v25 = vmax.f32 %v694_v16, 0.0 }
 0x15d   : > { %v1305_v28 = vmax.f32 %v1183_v17, 0.0  ;;  %v1400_v61 = vmax.f32 %v847_v45, %v1336_v46 }
 0x15f   : > { %v773_v8 = vpop.f32.mrf.mxu2  ;;  %v1369_v40 = vmax.f32 %v816_v25, %v1305_v28  ;;  %v2083_v25 = vld [vmem:[%s2427_s3] ss:$0 sm:$0xff] }
 0x160   : > { %v1262_v9 = vpop.f32.mrf.mxu3  ;;  %v774_v34 = vadd.f32 %v2224_v56, %v773_v8 }
 0x161   : > { %v696_v10 = vpop.f32.mrf.mxu0  ;;  %v1263_v36 = vadd.f32 %v2224_v56, %v1262_v9 }
 0x162   : > { %v1185_v11 = vpop.f32.mrf.mxu1  ;;  %v697_v12 = vadd.f32 %v2224_v56, %v696_v10  ;;  %v848_v47 = vmax.f32 %v774_v34, 0.0 }
 0x163   : > { %v1186_v13 = vadd.f32 %v2224_v56, %v1185_v11  ;;  %v1337_v50 = vmax.f32 %v1263_v36, 0.0 }
 0x164   : > { %v817_v20 = vmax.f32 %v697_v12, 0.0 }
 0x165   : > { %v1306_v21 = vmax.f32 %v1186_v13, 0.0  ;;  %v1401_v62 = vmax.f32 %v848_v47, %v1337_v50 }
 0x167   : > { %v776_v18 = vpop.f32.mrf.mxu2  ;;  %v1370_v37 = vmax.f32 %v817_v20, %v1306_v21 }
 0x168   : > { %v1265_v19 = vpop.f32.mrf.mxu3  ;;  %v777_v29 = vadd.f32 %v2224_v56, %v776_v18 }
 0x169   : > { %v698_v22 = vpop.f32.mrf.mxu0  ;;  %v1266_v30 = vadd.f32 %v2224_v56, %v1265_v19  ;;  %v1420_v51 = vmax.f32 %v1368_v39, %v1370_v37 }
 0x16a   : > { %v699_v26 = vadd.f32 %v2224_v56, %v698_v22  ;;  %v1187_v27 = vpop.f32.mrf.mxu1  ;;  %v849_v41 = vmax.f32 %v777_v29, 0.0 }
 0x16b   : > { %v1188_v31 = vadd.f32 %v2224_v56, %v1187_v27  ;;  %v1338_v42 = vmax.f32 %v1266_v30, 0.0 }
 0x16c   : > { %v818_v35 = vmax.f32 %v699_v26, 0.0 }
 0x16d   : > { %v1307_v38 = vmax.f32 %v1188_v31, 0.0  ;;  %v1402_v58 = vmax.f32 %v849_v41, %v1338_v42 }
 0x16f   : > { %v1371_v43 = vmax.f32 %v818_v35, %v1307_v38  ;;  %v778_v44 = vpop.f32.mrf.mxu2  ;;  %v1436_v0 = vmax.f32 %v1400_v61, %v1402_v58 }
 0x170   : > { %v779_v48 = vadd.f32 %v2224_v56, %v778_v44  ;;  %v1267_v49 = vpop.f32.mrf.mxu3 }
 0x171   : > { %v1421_v52 = vmax.f32 %v1369_v40, %v1371_v43  ;;  %v1268_v53 = vadd.f32 %v2224_v56, %v1267_v49  ;;  %v701_v54 = vpop.f32.mrf.mxu0 }
 0x172   : > { %v850_v55 = vmax.f32 %v779_v48, 0.0  ;;  %v1190_v57 = vpop.f32.mrf.mxu1  ;;  %v702_v13 = vadd.f32 %v2224_v56, %v701_v54 }
 0x173   : > { %v2009_v59 = vpack.c.bf16 %v1421_v52, %v1420_v51  ;;  %v1339_v60 = vmax.f32 %v1268_v53, 0.0  ;;  %v1191_v14 = vadd.f32 %v2224_v56, %v1190_v57 }
 0x174   : > { %v819_v22 = vmax.f32 %v702_v13, 0.0 }
 0x175   : > { %2061 = vst [vmem:[%s2254_s7 + $0x30] sm:$0xff] %v2009_v59   ;;  %v1403_v63 = vmax.f32 %v850_v55, %v1339_v60  ;;  %v1308_v23 = vmax.f32 %v1191_v14, 0.0 }
 0x177   : > { %v1437_v1 = vmax.f32 %v1401_v62, %v1403_v63  ;;  %v781_v2 = vpop.f32.mrf.mxu2  ;;  %v1372_v38 = vmax.f32 %v819_v22, %v1308_v23 }
 0x178   : > { %v1270_v3 = vpop.f32.mrf.mxu3  ;;  %v782_v32 = vadd.f32 %v2083_v25, %v781_v2 }
 0x179   : > { %v2049_v4 = vpack.c.bf16 %v1437_v1, %v1436_v0  ;;  %v703_v5 = vpop.f32.mrf.mxu0 }
 0x17a   : > { %v1192_v6 = vpop.f32.mrf.mxu1  ;;  %v704_v15 = vadd.f32 %v2224_v56, %v703_v5  ;;  %v851_v44 = vmax.f32 %v782_v32, 0.0 }
 0x17b   : > { %2069 = vst [vmem:[%s2254_s7 + $0x70] sm:$0xff] %v2049_v4   ;;  %v1193_v16 = vadd.f32 %v2224_v56, %v1192_v6 }
 0x17c   : > { %v820_v24 = vmax.f32 %v704_v15, 0.0 }
 0x17d   : > { %v1309_v28 = vmax.f32 %v1193_v16, 0.0 }
 0x17f   : > { %v783_v7 = vpop.f32.mrf.mxu2  ;;  %v1373_v39 = vmax.f32 %v820_v24, %v1309_v28 }
 0x180   : > { %v1272_v8 = vpop.f32.mrf.mxu3  ;;  %v784_v33 = vadd.f32 %v2083_v25, %v783_v7 }
 0x181   : > { %v706_v9 = vpop.f32.mrf.mxu0  ;;  %v1273_v35 = vadd.f32 %v2083_v25, %v1272_v8 }
 0x182   : > { %v1195_v10 = vpop.f32.mrf.mxu1  ;;  %v707_v11 = vadd.f32 %v2224_v56, %v706_v9  ;;  %v852_v46 = vmax.f32 %v784_v33, 0.0 }
 0x183   : > { %v1196_v12 = vadd.f32 %v2224_v56, %v1195_v10  ;;  %v1271_v56 = vadd.f32 %v2083_v25, %v1270_v3  ;;  %v1341_v49 = vmax.f32 %v1273_v35, 0.0 }
 0x184   : > { %v821_v19 = vmax.f32 %v707_v11, 0.0 }
 0x185   : > { %v1310_v20 = vmax.f32 %v1196_v12, 0.0  ;;  %v1340_v45 = vmax.f32 %v1271_v56, 0.0  ;;  %v1405_v59 = vmax.f32 %v852_v46, %v1341_v49 }
 0x187   : > { %v786_v17 = vpop.f32.mrf.mxu2  ;;  %v1374_v36 = vmax.f32 %v821_v19, %v1310_v20  ;;  %v1404_v58 = vmax.f32 %v851_v44, %v1340_v45 }
 0x188   : > { %v1275_v18 = vpop.f32.mrf.mxu3  ;;  %v787_v29 = vadd.f32 %v2083_v25, %v786_v17 }
 0x189   : > { %v708_v21 = vpop.f32.mrf.mxu0  ;;  %v1276_v30 = vadd.f32 %v2083_v25, %v1275_v18  ;;  %v1422_v50 = vmax.f32 %v1372_v38, %v1374_v36 }
 0x18a   : > { %v709_v26 = vadd.f32 %v2083_v25, %v708_v21  ;;  %v1197_v27 = vpop.f32.mrf.mxu1  ;;  %v853_v40 = vmax.f32 %v787_v29, 0.0 }
 0x18b   : > { %v1198_v31 = vadd.f32 %v2083_v25, %v1197_v27  ;;  %v1342_v41 = vmax.f32 %v1276_v30, 0.0 }
 0x18c   : > { %v822_v34 = vmax.f32 %v709_v26, 0.0 }
 0x18d   : > { %v1311_v37 = vmax.f32 %v1198_v31, 0.0  ;;  %v1406_v54 = vmax.f32 %v853_v40, %v1342_v41 }
 0x18f   : > { %v1375_v42 = vmax.f32 %v822_v34, %v1311_v37  ;;  %v788_v43 = vpop.f32.mrf.mxu2  ;;  %v1438_v61 = vmax.f32 %v1404_v58, %v1406_v54 }
 0x190   : > { %v789_v47 = vadd.f32 %v2083_v25, %v788_v43  ;;  %v1277_v48 = vpop.f32.mrf.mxu3 }
 0x191   : > { %v1423_v51 = vmax.f32 %v1373_v39, %v1375_v42  ;;  %v1278_v52 = vadd.f32 %v2083_v25, %v1277_v48 }
 0x192   : > { %v854_v53 = vmax.f32 %v789_v47, 0.0 }
 0x193   : > { %v2014_v55 = vpack.c.bf16 %v1423_v51, %v1422_v50  ;;  %v1343_v57 = vmax.f32 %v1278_v52, 0.0 }
 0x195   : > { %2062 = vst [vmem:[%s2254_s7 + $0x38] sm:$0xff] %v2014_v55   ;;  %v1407_v60 = vmax.f32 %v854_v53, %v1343_v57 }
 0x197   : > { %v1439_v62 = vmax.f32 %v1405_v59, %v1407_v60 }
 0x199   : > { %v2054_v63 = vpack.c.bf16 %v1439_v62, %v1438_v61 }
 0x19b   : > { %2070 = vst [vmem:[%s2254_s7 + $0x78] sm:$0xff] %v2054_v63  }
 0x19c PF: > { %s14_s15 = sadd.s32 1, %s2090_s15  }
 0x19d   : > { %p11_p4 = scmp.ge.s32.totalorder %s14_s15, 4  }
 0x19f   :  { %13 = sbr.rel (!%p11_p4) target bundleno = 1 (0x1), region = 69 }

// kernel: simple_cnn_forward.4
= control target key start
LH: loop header
LB: loop body
LE: loop exit
PB: predicated region body
PF: predicated region fallthrough
CT: control target
= control target key end

     0   :  { %s3890_s15 = smov 0   ;;  %s5022_s0 = inlined_call_operand.vmem [shape: bf16[2,128,1152], index: 0, kind: input, shape index: {}]   ;;  %s5023_s1 = inlined_call_operand.vmem [shape: bf16[2,128,1152], index: 1, kind: input, shape index: {}]   ;;  %s5024_s2 = inlined_call_operand.vmem [shape: bf16[1152,128], index: 2, kind: input, shape index: {}]   ;;  %s5025_s3 = inlined_call_operand.vmem [shape: f32[1,128], index: 3, kind: input, shape index: {}]   ;;  %s5026_s4 = inlined_call_operand.vmem [shape: bf16[2,64,128], index: 4, kind: output, shape index: {}]  }
   0x1 LB: > { %s2715_s16 = sadd.s32 4294967295, %s3863_s15   ;;  %p2719_p0 = scmp.ge.s32.totalorder %s3863_s15, 1  ;;  %s3863_s15 = sphi %s3890_s15, %s14_s15  }
   0x2   : > { %p172_p1 = scmp.lt.s32.totalorder %s3863_s15, 3 }
   0x4   : > { %p173_p2 = pnand %p2719_p0, %p172_p1 }
   0x6   : > { %176 = sbr.rel (%p173_p2) target bundleno = 760 (0x2f8), region = 36 }
   0xb   : > { %v3901_v0 = vld [vmem:[%s5024_s2 + $0x38] sm:$0xff]  ;;  %v3913_v2 = vld [vmem:[%s5024_s2 + $0x30] sm:$0xff]  ;;  %v3927_v4 = vld [vmem:[%s5024_s2 + $0x28] sm:$0xff]  ;;  %p203_p3 = scmp.lt.s32.totalorder %s2715_s16, 1 }
   0xc   : > { %v3906_v1 = vld [vmem:[%s5024_s2 + $0x78] sm:$0xff]  ;;  %3830 = vmatpush.bf16.msra.mxu2 %v3901_v0  ;;  %v3918_v3 = vld [vmem:[%s5024_s2 + $0x70] sm:$0xff]  ;;  %1326 = vmatpush.bf16.msra.mxu0 %v3901_v0  ;;  %v3932_v5 = vld [vmem:[%s5024_s2 + $0x68] sm:$0xff] }
   0xd   : > { %3838 = vmatpush.bf16.msra.mxu3 %v3906_v1  ;;  %1375 = vmatpush.bf16.msra.mxu1 %v3906_v1  ;;  %v3941_v6 = vld [vmem:[%s5024_s2 + $0x20] sm:$0xff]  ;;  %v3957_v8 = vld [vmem:[%s5024_s2 + $0x18] sm:$0xff]  ;;  %s5071_s16 = smov (!%p203_p3, %s2715_s16), 1  ;;  %v3975_v10 = vld [vmem:[%s5024_s2 + $0x10] sm:$0xff] }
   0xe   : > { %v3946_v7 = vld [vmem:[%s5024_s2 + $0x60] sm:$0xff]  ;;  %v3962_v9 = vld [vmem:[%s5024_s2 + $0x58] sm:$0xff]  ;;  %v3980_v11 = vld [vmem:[%s5024_s2 + $0x50] sm:$0xff]  ;;  %s3846_s17 = smul.u32 576, %s5071_s16  ;;  %s3590_s10 = sshll.u32 %s5071_s16, 5 }
   0xf   : > { %v3990_v12 = vld [vmem:[%s5024_s2 + $0x8] sm:$0xff]  ;;  %v4009_v14 = vld [vmem:[%s5024_s2] sm:$0xff]  ;;  %v4027_v20 = vld [vmem:[%s5024_s2 + $0xb8] sm:$0xff]  ;;  %s4990_s13 = scalar_lea.vmem %s5026_s4, %s3590_s10 }
  0x10   : > { %3831 = vmatpush.bf16.msra.mxu2 %v3913_v2  ;;  %1327 = vmatpush.bf16.msra.mxu0 %v3913_v2  ;;  %v3995_v13 = vld [vmem:[%s5024_s2 + $0x48] sm:$0xff]  ;;  %s4002_s24 = scalar_lea.vmem %s5022_s0, %s3846_s17  ;;  %v4014_v15 = vld [vmem:[%s5024_s2 + $0x40] sm:$0xff]  ;;  %v4034_v23 = vld [vmem:[%s5024_s2 + $0xf8] sm:$0xff]  ;;  %s4548_s9 = scalar_lea.vmem %s5023_s1, %s3846_s17 }
  0x11   : > { %3839 = vmatpush.bf16.msra.mxu3 %v3918_v3  ;;  %1376 = vmatpush.bf16.msra.mxu1 %v3918_v3  ;;  %v2870_v16 = vld [vmem:[%s4002_s24 + $0x120] sm:$0xf]  ;;  %v3703_v17 = vld [vmem:[%s4002_s24 + $0x140] sm:$0xf0]  ;;  %v2872_v19 = vld [vmem:[%s4002_s24 + $0x144] sm:$0xf0] }
  0x12   : > { %v3699_v18 = vld [vmem:[%s4002_s24 + $0x124] sm:$0xf]  ;;  %v2726_v21 = vld [vmem:[%s4002_s24] sm:$0xf]  ;;  %v2728_v25 = vld [vmem:[%s4002_s24 + $0x24] sm:$0xf0]  ;;  %v2871_v26 = vor.u32 %v3703_v17, %v2870_v16 }
  0x13   : > { %v3667_v22 = vld [vmem:[%s4002_s24 + $0x20] sm:$0xf0]  ;;  %v2875_v27 = vor.u32 %v3699_v18, %v2872_v19  ;;  %v4043_v29 = vld [vmem:[%s5024_s2 + $0x178] sm:$0xff]  ;;  %v4050_v31 = vld [vmem:[%s5024_s2 + $0xb0] sm:$0xff] }
  0x14   : > { %3832 = vmatpush.bf16.msra.mxu2 %v3927_v4  ;;  %1328 = vmatpush.bf16.msra.mxu0 %v3927_v4  ;;  %v3663_v24 = vld [vmem:[%s4002_s24 + $0x4] sm:$0xf]  ;;  %v2727_v28 = vor.u32 %v3667_v22, %v2726_v21  ;;  %v4057_v32 = vld [vmem:[%s5024_s2 + $0xf0] sm:$0xff]  ;;  %v4062_v33 = vld [vmem:[%s5024_s2 + $0x138] sm:$0xff] }
  0x15   : > { %3840 = vmatpush.bf16.msra.mxu3 %v3932_v5  ;;  %1377 = vmatpush.bf16.msra.mxu1 %v3932_v5  ;;  %v2731_v30 = vor.u32 %v3663_v24, %v2728_v25  ;;  %v4068_v34 = vld [vmem:[%s5024_s2 + $0x170] sm:$0xff]  ;;  %v4074_v35 = vld [vmem:[%s5024_s2 + $0xa8] sm:$0xff]  ;;  %v4098_v39 = vld [vmem:[%s5024_s2 + $0xa0] sm:$0xff] }
  0x16   : > { %v4081_v36 = vld [vmem:[%s5024_s2 + $0xe8] sm:$0xff]  ;;  %v4086_v37 = vld [vmem:[%s5024_s2 + $0x130] sm:$0xff]  ;;  %v4105_v40 = vld [vmem:[%s5024_s2 + $0xe0] sm:$0xff] }
  0x17   : > { %v4092_v38 = vld [vmem:[%s5024_s2 + $0x168] sm:$0xff]  ;;  %v2908_v45 = vld [vmem:[%s4002_s24 + $0x18c] sm:$0xf0]  ;;  %v4121_v47 = vld [vmem:[%s5024_s2 + $0x160] sm:$0xff] }
  0x18   : > { %3833 = vmatpush.bf16.msra.mxu2 %v3941_v6  ;;  %1329 = vmatpush.bf16.msra.mxu0 %v3941_v6  ;;  %v4110_v41 = vld [vmem:[%s5024_s2 + $0x128] sm:$0xff]  ;;  %v4129_v50 = vld [vmem:[%s5024_s2 + $0x98] sm:$0xff]  ;;  %v2764_v51 = vld [vmem:[%s4002_s24 + $0x6c] sm:$0xf0] }
  0x19   : > { %3841 = vmatpush.bf16.msra.mxu3 %v3946_v7  ;;  %1378 = vmatpush.bf16.msra.mxu1 %v3946_v7  ;;  %v2906_v42 = vld [vmem:[%s4002_s24 + $0x168] sm:$0xf]  ;;  %v3712_v43 = vld [vmem:[%s4002_s24 + $0x188] sm:$0xf0]  ;;  %v4137_v52 = vld [vmem:[%s5024_s2 + $0xd8] sm:$0xff] }
  0x1a   : > { %v3708_v44 = vld [vmem:[%s4002_s24 + $0x16c] sm:$0xf]  ;;  %v2762_v46 = vld [vmem:[%s4002_s24 + $0x48] sm:$0xf]  ;;  %v4142_v53 = vld [vmem:[%s5024_s2 + $0x120] sm:$0xff]  ;;  %v2907_v54 = vor.u32 %v3712_v43, %v2906_v42 }
  0x1b   : > { %v3676_v48 = vld [vmem:[%s4002_s24 + $0x68] sm:$0xf0]  ;;  %v2911_v55 = vor.u32 %v3708_v44, %v2908_v45  ;;  %v4148_v57 = vld [vmem:[%s5024_s2 + $0x158] sm:$0xff]  ;;  %v4154_v59 = vld [vmem:[%s5024_s2 + $0x90] sm:$0xff] }
  0x1c   : > { %3834 = vmatpush.bf16.msra.mxu2 %v3957_v8  ;;  %1330 = vmatpush.bf16.msra.mxu0 %v3957_v8  ;;  %v3672_v49 = vld [vmem:[%s4002_s24 + $0x4c] sm:$0xf]  ;;  %v2763_v56 = vor.u32 %v3676_v48, %v2762_v46  ;;  %5040 = vst [vmem:[#allocation2_spill] sm:$0xff] %v4148_v57  ;;  %v4161_v60 = vld [vmem:[%s5024_s2 + $0xd0] sm:$0xff]  ;;  %v4166_v61 = vld [vmem:[%s5024_s2 + $0x118] sm:$0xff] }
  0x1d   : > { %3842 = vmatpush.bf16.msra.mxu3 %v3962_v9  ;;  %1379 = vmatpush.bf16.msra.mxu1 %v3962_v9  ;;  %v2767_v58 = vor.u32 %v3672_v49, %v2764_v51  ;;  %v4173_v62 = vld [vmem:[%s5024_s2 + $0x88] sm:$0xff]  ;;  %v4178_v63 = vld [vmem:[%s5024_s2 + $0x150] sm:$0xff]  ;;  %v4202_v19 = vld [vmem:[%s5024_s2 + $0x80] sm:$0xff] }
  0x1e   : > { %5041 = vst [vmem:[#allocation3_spill] sm:$0xff] %v4178_v63  ;;  %v4185_v16 = vld [vmem:[%s5024_s2 + $0xc8] sm:$0xff]  ;;  %v4190_v17 = vld [vmem:[%s5024_s2 + $0x110] sm:$0xff]  ;;  %v4209_v21 = vld [vmem:[%s5024_s2 + $0xc0] sm:$0xff] }
  0x1f   : > { %v4196_v18 = vld [vmem:[%s5024_s2 + $0x148] sm:$0xff]  ;;  %v2942_v24 = vld [vmem:[%s4002_s24 + $0x1b0] sm:$0xf]  ;;  %v3721_v25 = vld [vmem:[%s4002_s24 + $0x1d0] sm:$0xf0] }
  0x20   : > { %3835 = vmatpush.bf16.msra.mxu2 %v3975_v10  ;;  %1331 = vmatpush.bf16.msra.mxu0 %v3975_v10  ;;  %5042 = vst [vmem:[#allocation4_spill] sm:$0xff] %v4196_v18  ;;  %v4214_v22 = vld [vmem:[%s5024_s2 + $0x108] sm:$0xff]  ;;  %v3681_v42 = vld [vmem:[%s4002_s24 + $0x94] sm:$0xf]  ;;  %v2800_v43 = vld [vmem:[%s4002_s24 + $0xb4] sm:$0xf0]  ;;  %v2943_v45 = vor.u32 %v3721_v25, %v2942_v24 }
  0x21   : > { %3843 = vmatpush.bf16.msra.mxu3 %v3980_v11  ;;  %1380 = vmatpush.bf16.msra.mxu1 %v3980_v11  ;;  %v4231_v44 = vld [vmem:[%s5024_s2 + $0x100] sm:$0xff]  ;;  %v2803_v49 = vor.u32 %v3681_v42, %v2800_v43  ;;  %v3730_v24 = vld [vmem:[%s4002_s24 + $0x218] sm:$0xf0] }
  0x22   : > { %v4237_v51 = vld [vmem:[%s5024_s2 + $0x140] sm:$0xff]  ;;  %v3726_v25 = vld [vmem:[%s4002_s24 + $0x1fc] sm:$0xf] }
  0x23   : > { %5043 = vst [vmem:[#allocation5_spill] sm:$0xff] %v4237_v51  ;;  %v2836_v42 = vld [vmem:[%s4002_s24 + $0xfc] sm:$0xf0] }
  0x24   : > { %3836 = vmatpush.bf16.msra.mxu2 %v3990_v12  ;;  %1332 = vmatpush.bf16.msra.mxu0 %v3990_v12 }
  0x25   : > { %3844 = vmatpush.bf16.msra.mxu3 %v3995_v13  ;;  %1381 = vmatpush.bf16.msra.mxu1 %v3995_v13 }
  0x28   : > { %3837 = vmatpush.bf16.msra.mxu2 %v4009_v14  ;;  %1333 = vmatpush.bf16.msra.mxu0 %v4009_v14 }
  0x29   : > { %3845 = vmatpush.bf16.msra.mxu3 %v4014_v15  ;;  %1382 = vmatpush.bf16.msra.mxu1 %v4014_v15 }
  0x2b   : > { %1354 = vmatmul.bf16.vlgmr.msra.gmra.mxu2 %v2871_v26  ;;  %1334 = vmatmul.bf16.vlgmr.msra.gmra.mxu0 %v2727_v28  ;;  %v3717_v26 = vld [vmem:[%s4002_s24 + $0x1b4] sm:$0xf]  ;;  %v2798_v28 = vld [vmem:[%s4002_s24 + $0x90] sm:$0xf] }
  0x2c   : > { %1424 = vmatpush.bf16.msrb.mxu2 %v4027_v20  ;;  %1403 = vmatmul.bf16.vlgmr.msra.gmra.mxu3 %v2875_v27  ;;  %v2944_v27 = vld [vmem:[%s4002_s24 + $0x1d4] sm:$0xf0] }
  0x2d   : > { %1473 = vmatpush.bf16.msrb.mxu3 %v4034_v23  ;;  %1571 = vmatpush.bf16.msrb.mxu1 %v4043_v29  ;;  %v2947_v46 = vor.u32 %v3717_v26, %v2944_v27  ;;  %v2980_v26 = vld [vmem:[%s4002_s24 + $0x21c] sm:$0xf0]  ;;  %v2834_v27 = vld [vmem:[%s4002_s24 + $0xd8] sm:$0xf] }
  0x2e   : > { %1383 = vmatmul.bf16.vlgmr.msra.gmra.mxu1 %v2731_v30  ;;  %1522 = vmatpush.bf16.msrb.mxu0 %v4062_v33  ;;  %v3685_v30 = vld [vmem:[%s4002_s24 + $0xb0] sm:$0xf0] }
  0x2f   : > { %v2799_v48 = vor.u32 %v3685_v30, %v2798_v28  ;;  %v3694_v28 = vld [vmem:[%s4002_s24 + $0xf8] sm:$0xf0] }
  0x30   : > { %1425 = vmatpush.bf16.msrb.mxu2 %v4050_v31  ;;  %v3690_v30 = vld [vmem:[%s4002_s24 + $0xdc] sm:$0xf] }
  0x31   : > { %1474 = vmatpush.bf16.msrb.mxu3 %v4057_v32  ;;  %1572 = vmatpush.bf16.msrb.mxu1 %v4068_v34 }
  0x32   : > { %1523 = vmatpush.bf16.msrb.mxu0 %v4086_v37 }
  0x34   : > { %1426 = vmatpush.bf16.msrb.mxu2 %v4074_v35 }
  0x35   : > { %1475 = vmatpush.bf16.msrb.mxu3 %v4081_v36  ;;  %1573 = vmatpush.bf16.msrb.mxu1 %v4092_v38 }
  0x36   : > { %1524 = vmatpush.bf16.msrb.mxu0 %v4110_v41 }
  0x38   : > { %1427 = vmatpush.bf16.msrb.mxu2 %v4098_v39 }
  0x39   : > { %1476 = vmatpush.bf16.msrb.mxu3 %v4105_v40  ;;  %1574 = vmatpush.bf16.msrb.mxu1 %v4121_v47 }
  0x3a   : > { %1525 = vmatpush.bf16.msrb.mxu0 %v4142_v53 }
  0x3b   : > { %1359 = vmatmul.bf16.gmra.mxu2 %v2907_v54  ;;  %1339 = vmatmul.bf16.gmra.mxu0 %v2763_v56  ;;  %v4242_v54 = vld [vmem:[%s5024_s2 + $0x1b8] sm:$0xff] }
  0x3c   : > { %1428 = vmatpush.bf16.msrb.mxu2 %v4129_v50  ;;  %1408 = vmatmul.bf16.gmra.mxu3 %v2911_v55  ;;  %v4248_v55 = vld [vmem:[%s5024_s2 + $0x1f8] sm:$0xff] }
  0x3d   : > { %1477 = vmatpush.bf16.msrb.mxu3 %v4137_v52  ;;  %1575 = vmatpush.bf16.msrb.mxu1 %v4148_v57  ;;  %v4254_v56 = vld [vmem:[%s5024_s2 + $0x238] sm:$0xff]  ;;  %v4459_v57 = vld [vmem:[%s5024_s2 + $0x180] sm:$0xff] }
  0x3e   : > { %1388 = vmatmul.bf16.gmra.mxu1 %v2767_v58  ;;  %1526 = vmatpush.bf16.msrb.mxu0 %v4166_v61  ;;  %v2978_v58 = vld [vmem:[%s4002_s24 + $0x1f8] sm:$0xf] }
  0x3f   : > { %v2979_v43 = vor.u32 %v3730_v24, %v2978_v58  ;;  %v3664_v58 = vld [vmem:[%s4002_s24 + $0xc] sm:$0xf]  ;;  %v2736_v24 = vld [vmem:[%s4002_s24 + $0x2c] sm:$0xf0] }
  0x40   : > { %1429 = vmatpush.bf16.msrb.mxu2 %v4154_v59 }
  0x41   : > { %1478 = vmatpush.bf16.msrb.mxu3 %v4161_v60  ;;  %1576 = vmatpush.bf16.msrb.mxu1 %v4178_v63 }
  0x42   : > { %1527 = vmatpush.bf16.msrb.mxu0 %v4190_v17 }
  0x44   : > { %1430 = vmatpush.bf16.msrb.mxu2 %v4173_v62 }
  0x45   : > { %1479 = vmatpush.bf16.msrb.mxu3 %v4185_v16  ;;  %1577 = vmatpush.bf16.msrb.mxu1 %v4196_v18 }
  0x46   : > { %1528 = vmatpush.bf16.msrb.mxu0 %v4214_v22 }
  0x48   : > { %1431 = vmatpush.bf16.msrb.mxu2 %v4202_v19 }
  0x49   : > { %1480 = vmatpush.bf16.msrb.mxu3 %v4209_v21  ;;  %1578 = vmatpush.bf16.msrb.mxu1 %v4237_v51 }
  0x4a   : > { %1529 = vmatpush.bf16.msrb.mxu0 %v4231_v44 }
  0x4b   : > { %1364 = vmatmul.bf16.gmra.mxu2 %v2943_v45  ;;  %1344 = vmatmul.bf16.gmra.mxu0 %v2799_v48  ;;  %v2983_v45 = vor.u32 %v3726_v25, %v2980_v26  ;;  %v2734_v48 = vld [vmem:[%s4002_s24 + $0x8] sm:$0xf]  ;;  %v2742_v25 = vld [vmem:[%s4002_s24 + $0x10] sm:$0xf]  ;;  %v3669_v26 = vld [vmem:[%s4002_s24 + $0x30] sm:$0xf0] }
  0x4c   : > { %1413 = vmatmul.bf16.gmra.mxu3 %v2947_v46  ;;  %1620 = vmatpush.bf16.msra.mxu2 %v4242_v54  ;;  %v2835_v46 = vor.u32 %v3694_v28, %v2834_v27  ;;  %v3665_v27 = vld [vmem:[%s4002_s24 + $0x14] sm:$0xf]  ;;  %v2744_v28 = vld [vmem:[%s4002_s24 + $0x34] sm:$0xf0] }
  0x4d   : > { %1669 = vmatpush.bf16.msra.mxu3 %v4248_v55  ;;  %2151 = vmatpush.bf16.msra.mxu1 %v3901_v0  ;;  %v2839_v0 = vor.u32 %v3690_v30, %v2836_v42  ;;  %v2739_v42 = vor.u32 %v3664_v58, %v2736_v24  ;;  %v3678_v58 = vld [vmem:[%s4002_s24 + $0x78] sm:$0xf0] }
  0x4e   : > { %1393 = vmatmul.bf16.gmra.mxu1 %v2803_v49  ;;  %1718 = vmatpush.bf16.msra.mxu0 %v4254_v56  ;;  %v3668_v49 = vld [vmem:[%s4002_s24 + $0x28] sm:$0xf0]  ;;  %v3674_v24 = vld [vmem:[%s4002_s24 + $0x5c] sm:$0xf] }
  0x4f   : > { %v2735_v30 = vor.u32 %v3668_v49, %v2734_v48  ;;  %v2772_v48 = vld [vmem:[%s4002_s24 + $0x74] sm:$0xf0] }
  0x50   : > { %v2778_v49 = vld [vmem:[%s4002_s24 + $0x58] sm:$0xf] }
  0x51   : > { %2152 = vmatpush.bf16.msra.mxu1 %v3913_v2  ;;  %v4273_v2 = vld [vmem:[%s5024_s2 + $0x1b0] sm:$0xff] }
  0x52   : > { %1621 = vmatpush.bf16.msra.mxu2 %v4273_v2 }
  0x55   : > { %2153 = vmatpush.bf16.msra.mxu1 %v3927_v4  ;;  %v4278_v4 = vld [vmem:[%s5024_s2 + $0x1f0] sm:$0xff] }
  0x56   : > { %1670 = vmatpush.bf16.msra.mxu3 %v4278_v4 }
  0x59   : > { %2154 = vmatpush.bf16.msra.mxu1 %v3941_v6  ;;  %v4284_v6 = vld [vmem:[%s5024_s2 + $0x230] sm:$0xff] }
  0x5a   : > { %1719 = vmatpush.bf16.msra.mxu0 %v4284_v6 }
  0x5b   : > { %1369 = vmatmul.bf16.gmra.mxu2 %v2979_v43  ;;  %1349 = vmatmul.bf16.gmra.mxu0 %v2835_v46  ;;  %v2743_v43 = vor.u32 %v3669_v26, %v2742_v25  ;;  %v3677_v46 = vld [vmem:[%s4002_s24 + $0x70] sm:$0xf0]  ;;  %v2780_v25 = vld [vmem:[%s4002_s24 + $0x7c] sm:$0xf0] }
  0x5c   : > { %1418 = vmatmul.bf16.gmra.mxu3 %v2983_v45  ;;  %v2770_v45 = vld [vmem:[%s4002_s24 + $0x50] sm:$0xf] }
  0x5d   : > { %2155 = vmatpush.bf16.msra.mxu1 %v3957_v8  ;;  %v2747_v8 = vor.u32 %v3665_v27, %v2744_v28  ;;  %v2771_v26 = vor.u32 %v3677_v46, %v2770_v45  ;;  %v2779_v28 = vor.u32 %v3678_v58, %v2778_v49  ;;  %v2814_v45 = vld [vmem:[%s4002_s24 + $0xa0] sm:$0xf]  ;;  %v3687_v46 = vld [vmem:[%s4002_s24 + $0xc0] sm:$0xf0] }
  0x5e   : > { %1398 = vmatmul.bf16.gmra.mxu1 %v2839_v0  ;;  %v3673_v0 = vld [vmem:[%s4002_s24 + $0x54] sm:$0xf]  ;;  %v2815_v58 = vor.u32 %v3687_v46, %v2814_v45 }
  0x5f   : > { %v2775_v27 = vor.u32 %v3673_v0, %v2772_v48  ;;  %v3683_v0 = vld [vmem:[%s4002_s24 + $0xa4] sm:$0xf]  ;;  %v2816_v48 = vld [vmem:[%s4002_s24 + $0xc4] sm:$0xf0] }
  0x61   : > { %2156 = vmatpush.bf16.msra.mxu1 %v3975_v10  ;;  %v4303_v10 = vld [vmem:[%s5024_s2 + $0x1a8] sm:$0xff] }
  0x62   : > { %1622 = vmatpush.bf16.msra.mxu2 %v4303_v10 }
  0x65   : > { %2157 = vmatpush.bf16.msra.mxu1 %v3990_v12  ;;  %v4308_v12 = vld [vmem:[%s5024_s2 + $0x1e8] sm:$0xff] }
  0x66   : > { %1671 = vmatpush.bf16.msra.mxu3 %v4308_v12 }
  0x69   : > { %2158 = vmatpush.bf16.msra.mxu1 %v4009_v14  ;;  %v4314_v14 = vld [vmem:[%s5024_s2 + $0x228] sm:$0xff] }
  0x6a   : > { %1720 = vmatpush.bf16.msra.mxu0 %v4314_v14 }
  0x6b   : > { %1432 = vmatmul.bf16.vlgmr.msrb.gmra.mxu2 %v2735_v30  ;;  %1530 = vmatmul.bf16.vlgmr.msrb.gmra.mxu0 %v2743_v43  ;;  %v2806_v30 = vld [vmem:[%s4002_s24 + $0x98] sm:$0xf]  ;;  %v3682_v43 = vld [vmem:[%s4002_s24 + $0x9c] sm:$0xf] }
  0x6c   : > { %1481 = vmatmul.bf16.vlgmr.msrb.gmra.mxu3 %v2739_v42  ;;  %v3686_v42 = vld [vmem:[%s4002_s24 + $0xb8] sm:$0xf0] }
  0x6d   : > { %v2807_v49 = vor.u32 %v3686_v42, %v2806_v30  ;;  %v3696_v30 = vld [vmem:[%s4002_s24 + $0x108] sm:$0xf0] }
  0x6e   : > { %1579 = vmatmul.bf16.vlgmr.msrb.gmra.mxu1 %v2747_v8  ;;  %v2808_v8 = vld [vmem:[%s4002_s24 + $0xbc] sm:$0xf0]  ;;  %v3692_v42 = vld [vmem:[%s4002_s24 + $0xec] sm:$0xf] }
  0x6f   : > { %2347 = vmatpush.bf16.msrb.mxu1 %v4062_v33  ;;  %v2783_v33 = vor.u32 %v3674_v24, %v2780_v25  ;;  %v2819_v24 = vor.u32 %v3683_v0, %v2816_v48  ;;  %v3695_v25 = vld [vmem:[%s4002_s24 + $0x100] sm:$0xf0]  ;;  %v4389_v48 = vld [vmem:[%s5024_s2 + $0x190] sm:$0xff] }
  0x70   : > { %5047 = vst [vmem:[#allocation9_spill] sm:$0xff] %v4389_v48 }
  0x73   : > { %2348 = vmatpush.bf16.msrb.mxu1 %v4086_v37  ;;  %v4333_v37 = vld [vmem:[%s5024_s2 + $0x1a0] sm:$0xff] }
  0x74   : > { %1623 = vmatpush.bf16.msra.mxu2 %v4333_v37 }
  0x77   : > { %2349 = vmatpush.bf16.msrb.mxu1 %v4110_v41  ;;  %v4338_v41 = vld [vmem:[%s5024_s2 + $0x1e0] sm:$0xff] }
  0x78   : > { %1672 = vmatpush.bf16.msra.mxu3 %v4338_v41 }
  0x7b   : > { %2350 = vmatpush.bf16.msrb.mxu1 %v4142_v53  ;;  %1437 = vmatmul.bf16.gmra.mxu2 %v2771_v26  ;;  %v4344_v53 = vld [vmem:[%s5024_s2 + $0x220] sm:$0xff] }
  0x7c   : > { %1486 = vmatmul.bf16.gmra.mxu3 %v2775_v27  ;;  %1535 = vmatmul.bf16.gmra.mxu0 %v2779_v28  ;;  %v3691_v26 = vld [vmem:[%s4002_s24 + $0xe4] sm:$0xf]  ;;  %v2844_v27 = vld [vmem:[%s4002_s24 + $0x104] sm:$0xf0]  ;;  %v4379_v28 = vld [vmem:[%s5024_s2 + $0x218] sm:$0xff] }
  0x7d   : > { %1721 = vmatpush.bf16.msra.mxu0 %v4344_v53  ;;  %5046 = vst [vmem:[#allocation8_spill] sm:$0xff] %v4379_v28  ;;  %v2847_v45 = vor.u32 %v3691_v26, %v2844_v27  ;;  %v2886_v26 = vld [vmem:[%s4002_s24 + $0x130] sm:$0xf]  ;;  %v3705_v27 = vld [vmem:[%s4002_s24 + $0x150] sm:$0xf0] }
  0x7e   : > { %1584 = vmatmul.bf16.gmra.mxu1 %v2783_v33  ;;  %v2850_v33 = vld [vmem:[%s4002_s24 + $0xe8] sm:$0xf] }
  0x7f   : > { %2351 = vmatpush.bf16.msrb.mxu1 %v4166_v61  ;;  %v2811_v61 = vor.u32 %v3682_v43, %v2808_v8  ;;  %v2852_v43 = vld [vmem:[%s4002_s24 + $0x10c] sm:$0xf0]  ;;  %v2851_v46 = vor.u32 %v3696_v30, %v2850_v33  ;;  %v3701_v33 = vld [vmem:[%s4002_s24 + $0x134] sm:$0xf]  ;;  %v2888_v30 = vld [vmem:[%s4002_s24 + $0x154] sm:$0xf0] }
  0x80   : > { %v2855_v0 = vor.u32 %v3692_v42, %v2852_v43 }
  0x81   : > { %1722 = vmatpush.bf16.msra.mxu0 %v4379_v28 }
  0x83   : > { %2352 = vmatpush.bf16.msrb.mxu1 %v4190_v17  ;;  %v4363_v17 = vld [vmem:[%s5024_s2 + $0x198] sm:$0xff] }
  0x84   : > { %5044 = vst [vmem:[#allocation6_spill] sm:$0xff] %v4363_v17  ;;  %1624 = vmatpush.bf16.msra.mxu2 %v4363_v17 }
  0x87   : > { %2353 = vmatpush.bf16.msrb.mxu1 %v4214_v22  ;;  %v4368_v22 = vld [vmem:[%s5024_s2 + $0x1d8] sm:$0xff] }
  0x88   : > { %5045 = vst [vmem:[#allocation7_spill] sm:$0xff] %v4368_v22  ;;  %1673 = vmatpush.bf16.msra.mxu3 %v4368_v22  ;;  %1625 = vmatpush.bf16.msra.mxu2 %v4389_v48 }
  0x8b   : > { %2354 = vmatpush.bf16.msrb.mxu1 %v4231_v44  ;;  %1442 = vmatmul.bf16.gmra.mxu2 %v2807_v49  ;;  %v2842_v44 = vld [vmem:[%s4002_s24 + $0xe0] sm:$0xf]  ;;  %v4394_v49 = vld [vmem:[%s5024_s2 + $0x1d0] sm:$0xff] }
  0x8c   : > { %1491 = vmatmul.bf16.gmra.mxu3 %v2811_v61  ;;  %1540 = vmatmul.bf16.gmra.mxu0 %v2815_v58  ;;  %v2843_v8 = vor.u32 %v3695_v25, %v2842_v44  ;;  %5048 = vst [vmem:[#allocation10_spill] sm:$0xff] %v4394_v49  ;;  %v2878_v61 = vld [vmem:[%s4002_s24 + $0x128] sm:$0xf]  ;;  %v3704_v58 = vld [vmem:[%s4002_s24 + $0x148] sm:$0xf0]  ;;  %v4405_v25 = vld [vmem:[%s5024_s2 + $0x210] sm:$0xff] }
  0x8d   : > { %1674 = vmatpush.bf16.msra.mxu3 %v4394_v49  ;;  %v2880_v44 = vld [vmem:[%s4002_s24 + $0x14c] sm:$0xf0]  ;;  %5049 = vst [vmem:[#allocation11_spill] sm:$0xff] %v4405_v25  ;;  %1723 = vmatpush.bf16.msra.mxu0 %v4405_v25  ;;  %v2879_v42 = vor.u32 %v3704_v58, %v2878_v61  ;;  %v4421_v61 = vld [vmem:[%s5024_s2 + $0x188] sm:$0xff] }
  0x8e   : > { %1589 = vmatmul.bf16.gmra.mxu1 %v2819_v24  ;;  %v3700_v24 = vld [vmem:[%s4002_s24 + $0x12c] sm:$0xf]  ;;  %5050 = vst [vmem:[#allocation12_spill] sm:$0xff] %v4421_v61  ;;  %1626 = vmatpush.bf16.msra.mxu2 %v4421_v61  ;;  %v2922_v61 = vld [vmem:[%s4002_s24 + $0x178] sm:$0xf] }
  0x8f   : > { %v2883_v43 = vor.u32 %v3700_v24, %v2880_v44  ;;  %v4428_v24 = vld [vmem:[%s5024_s2 + $0x1c8] sm:$0xff] }
  0x90   : > { %5051 = vst [vmem:[#allocation13_spill] sm:$0xff] %v4428_v24 }
  0x91   : > { %1675 = vmatpush.bf16.msra.mxu3 %v4428_v24  ;;  %v4445_v24 = vld [vmem:[%s5024_s2 + $0x208] sm:$0xff] }
  0x92   : > { %5053 = vst [vmem:[#allocation15_spill] sm:$0xff] %v4445_v24  ;;  %1724 = vmatpush.bf16.msra.mxu0 %v4445_v24  ;;  %1627 = vmatpush.bf16.msra.mxu2 %v4459_v57 }
  0x96   : > { %2200 = vmatpush.bf16.msrb.mxu2 %v3906_v1 }
  0x9a   : > { %2201 = vmatpush.bf16.msrb.mxu2 %v3918_v3 }
  0x9b   : > { %1447 = vmatmul.bf16.gmra.mxu2 %v2843_v8  ;;  %v4415_v8 = vld [vmem:[%s5025_s3] ss:$0 sm:$0xff] }
  0x9c   : > { %1496 = vmatmul.bf16.gmra.mxu3 %v2847_v45  ;;  %1545 = vmatmul.bf16.gmra.mxu0 %v2851_v46  ;;  %v2887_v45 = vor.u32 %v3705_v27, %v2886_v26 }
  0x9e   : > { %1594 = vmatmul.bf16.gmra.mxu1 %v2855_v0  ;;  %v2891_v0 = vor.u32 %v3701_v33, %v2888_v30  ;;  %2202 = vmatpush.bf16.msrb.mxu2 %v3932_v5 }
  0xa2   : > { %2203 = vmatpush.bf16.msrb.mxu2 %v3946_v7 }
  0xa6   : > { %2204 = vmatpush.bf16.msrb.mxu2 %v3962_v9  ;;  %v3731_v9 = vld [vmem:[%s4002_s24 + $0x220] sm:$0xf0] }
  0xa8   : > { %v1335_v46 = vpop.f32.mrf.mxu0 }
  0xa9   : > { %v1336_v51 = vadd.f32 %v4415_v8, %v1335_v46  ;;  %v3709_v46 = vld [vmem:[%s4002_s24 + $0x174] sm:$0xf] }
  0xaa   : > { %2205 = vmatpush.bf16.msrb.mxu2 %v3980_v11 }
  0xab   : > { %v1384_v18 = vpop.f32.mrf.mxu1  ;;  %1452 = vmatmul.bf16.gmra.mxu2 %v2879_v42  ;;  %v2914_v42 = vld [vmem:[%s4002_s24 + $0x170] sm:$0xf] }
  0xac   : > { %1501 = vmatmul.bf16.gmra.mxu3 %v2883_v43  ;;  %v4423_v58 = vadd.f32 %v1384_v18, %v1336_v51  ;;  %1550 = vmatmul.bf16.gmra.mxu0 %v2887_v45  ;;  %v3713_v43 = vld [vmem:[%s4002_s24 + $0x190] sm:$0xf0] }
  0xad   : > { %v2915_v49 = vor.u32 %v3713_v43, %v2914_v42  ;;  %v2950_v42 = vld [vmem:[%s4002_s24 + $0x1b8] sm:$0xf]  ;;  %v3722_v43 = vld [vmem:[%s4002_s24 + $0x1d8] sm:$0xf0] }
  0xae   : > { %1599 = vmatmul.bf16.gmra.mxu1 %v2891_v0  ;;  %v1355_v44 = vpop.f32.mrf.mxu2  ;;  %v2916_v0 = vld [vmem:[%s4002_s24 + $0x194] sm:$0xf0]  ;;  %2206 = vmatpush.bf16.msrb.mxu2 %v3995_v13 }
  0xaf   : > { %v1404_v26 = vpop.f32.mrf.mxu3  ;;  %v1356_v18 = vadd.f32 %v4415_v8, %v1355_v44  ;;  %v3714_v44 = vld [vmem:[%s4002_s24 + $0x198] sm:$0xf0] }
  0xb0   : > { %v1337_v27 = vpop.f32.mrf.mxu0 }
  0xb1   : > { %v4433_v51 = vadd.f32 %v1404_v26, %v1356_v18  ;;  %v1338_v33 = vadd.f32 %v4415_v8, %v1337_v27  ;;  %v3710_v18 = vld [vmem:[%s4002_s24 + $0x17c] sm:$0xf] }
  0xb2   : > { %2207 = vmatpush.bf16.msrb.mxu2 %v4014_v15 }
  0xb3   : > { %5052 = vst [vmem:[#allocation14_spill] sm:$0xff] %v4433_v51  ;;  %v1386_v30 = vpop.f32.mrf.mxu1  ;;  %v2924_v51 = vld [vmem:[%s4002_s24 + $0x19c] sm:$0xf0] }
  0xb4   : > { %v4438_v45 = vadd.f32 %v1386_v30, %v1338_v33  ;;  %v2919_v33 = vor.u32 %v3709_v46, %v2916_v0  ;;  %v2923_v30 = vor.u32 %v3714_v44, %v2922_v61  ;;  %v2927_v28 = vor.u32 %v3710_v18, %v2924_v51  ;;  %v3718_v46 = vld [vmem:[%s4002_s24 + $0x1bc] sm:$0xf]  ;;  %v2952_v0 = vld [vmem:[%s4002_s24 + $0x1dc] sm:$0xf0] }
  0xb5   : > { %v2958_v44 = vld [vmem:[%s4002_s24 + $0x1c0] sm:$0xf] }
  0xb6   : > { %v1357_v25 = vpop.f32.mrf.mxu2 }
  0xb7   : > { %v1406_v26 = vpop.f32.mrf.mxu3  ;;  %v1358_v27 = vadd.f32 %v4415_v8, %v1357_v25  ;;  %v4466_v25 = vld [vmem:[%s5024_s2 + $0x1c0] sm:$0xff] }
  0xb8   : > { %v1340_v63 = vpop.f32.mrf.mxu0  ;;  %1676 = vmatpush.bf16.msra.mxu3 %v4466_v25 }
  0xb9   : > { %v4453_v48 = vadd.f32 %v1406_v26, %v1358_v27  ;;  %v1341_v22 = vadd.f32 %v4415_v8, %v1340_v63  ;;  %v3723_v26 = vld [vmem:[%s4002_s24 + $0x1e0] sm:$0xf0] }
  0xbb   : > { %v1389_v17 = vpop.f32.mrf.mxu1  ;;  %1457 = vmatmul.bf16.gmra.mxu2 %v2915_v49 }
  0xbc   : > { %1506 = vmatmul.bf16.gmra.mxu3 %v2919_v33  ;;  %v4461_v24 = vadd.f32 %v1389_v17, %v1341_v22  ;;  %1555 = vmatmul.bf16.gmra.mxu0 %v2923_v30  ;;  %v3719_v33 = vld [vmem:[%s4002_s24 + $0x1c4] sm:$0xf]  ;;  %v2960_v30 = vld [vmem:[%s4002_s24 + $0x1e4] sm:$0xf0] }
  0xbd   : > { %2249 = vmatpush.bf16.msrb.mxu3 %v4027_v20  ;;  %v4487_v20 = vld [vmem:[%s5024_s2 + $0x200] sm:$0xff] }
  0xbe   : > { %1604 = vmatmul.bf16.gmra.mxu1 %v2927_v28  ;;  %v1360_v63 = vpop.f32.mrf.mxu2  ;;  %1725 = vmatpush.bf16.msra.mxu0 %v4487_v20 }
  0xbf   : > { %v1409_v49 = vpop.f32.mrf.mxu3  ;;  %v1361_v17 = vadd.f32 %v4415_v8, %v1360_v63  ;;  %v2955_v63 = vor.u32 %v3718_v46, %v2952_v0  ;;  %v3727_v0 = vld [vmem:[%s4002_s24 + $0x204] sm:$0xf] }
  0xc0   : > { %v1342_v28 = vpop.f32.mrf.mxu0 }
  0xc1   : > { %v4473_v22 = vadd.f32 %v1409_v49, %v1361_v17  ;;  %v1343_v61 = vadd.f32 %v4415_v8, %v1342_v28  ;;  %2250 = vmatpush.bf16.msrb.mxu3 %v4050_v31  ;;  %v2951_v31 = vor.u32 %v3722_v43, %v2950_v42  ;;  %v2959_v49 = vor.u32 %v3723_v26, %v2958_v44  ;;  %v2986_v43 = vld [vmem:[%s4002_s24 + $0x200] sm:$0xf]  ;;  %v2988_v44 = vld [vmem:[%s4002_s24 + $0x224] sm:$0xf0]  ;;  %v3732_v26 = vld [vmem:[%s4002_s24 + $0x228] sm:$0xf0] }
  0xc2   : > { %2298 = vmatpush.bf16.msrb.mxu0 %v4034_v23 }
  0xc3   : > { %5054 = vst [vmem:[#allocation16_spill] sm:$0xff] %v4473_v22  ;;  %v1391_v51 = vpop.f32.mrf.mxu1 }
  0xc4   : > { %v4480_v1 = vadd.f32 %v1391_v51, %v1343_v61  ;;  %v2963_v61 = vor.u32 %v3719_v33, %v2960_v30  ;;  %v2996_v33 = vld [vmem:[%s4002_s24 + $0x22c] sm:$0xf0]  ;;  %v2987_v30 = vor.u32 %v3731_v9, %v2986_v43  ;;  %v3671_v43 = vld [vmem:[%s4002_s24 + $0x40] sm:$0xf0] }
  0xc5   : > { %2251 = vmatpush.bf16.msrb.mxu3 %v4074_v35 }
  0xc6   : > { %v1362_v18 = vpop.f32.mrf.mxu2  ;;  %2299 = vmatpush.bf16.msrb.mxu0 %v4057_v32 }
  0xc7   : > { %v1411_v27 = vpop.f32.mrf.mxu3  ;;  %v1363_v3 = vadd.f32 %v4415_v8, %v1362_v18 }
  0xc8   : > { %v1345_v28 = vpop.f32.mrf.mxu0 }
  0xc9   : > { %v4498_v17 = vadd.f32 %v1411_v27, %v1363_v3  ;;  %v1346_v51 = vadd.f32 %v4415_v8, %v1345_v28  ;;  %2252 = vmatpush.bf16.msrb.mxu3 %v4098_v39  ;;  %v3728_v27 = vld [vmem:[%s4002_s24 + $0x20c] sm:$0xf]  ;;  %v2991_v3 = vor.u32 %v3727_v0, %v2988_v44  ;;  %v3302_v0 = vld [vmem:[%s4548_s9] sm:$0xf]  ;;  %v3739_v44 = vld [vmem:[%s4548_s9 + $0x20] sm:$0xf0] }
  0xca   : > { %2300 = vmatpush.bf16.msrb.mxu0 %v4081_v36 }
  0xcb   : > { %v1394_v22 = vpop.f32.mrf.mxu1  ;;  %1462 = vmatmul.bf16.gmra.mxu2 %v2951_v31 }
  0xcc   : > { %1511 = vmatmul.bf16.gmra.mxu3 %v2955_v63  ;;  %v4502_v5 = vadd.f32 %v1394_v22, %v1346_v51  ;;  %1560 = vmatmul.bf16.gmra.mxu0 %v2959_v49  ;;  %v2999_v49 = vor.u32 %v3728_v27, %v2996_v33 }
  0xcd   : > { %2253 = vmatpush.bf16.msrb.mxu3 %v4129_v50  ;;  %v2994_v50 = vld [vmem:[%s4002_s24 + $0x208] sm:$0xf] }
  0xce   : > { %1609 = vmatmul.bf16.gmra.mxu1 %v2963_v61  ;;  %v1365_v23 = vpop.f32.mrf.mxu2  ;;  %2301 = vmatpush.bf16.msrb.mxu0 %v4105_v40  ;;  %v2995_v31 = vor.u32 %v3732_v26, %v2994_v50 }
  0xcf   : > { %v1414_v35 = vpop.f32.mrf.mxu3  ;;  %v1366_v7 = vadd.f32 %v4415_v8, %v1365_v23 }
  0xd0   : > { %v1347_v42 = vpop.f32.mrf.mxu0 }
  0xd1   : > { %v4509_v22 = vadd.f32 %v1414_v35, %v1366_v7  ;;  %v1348_v32 = vadd.f32 %v4415_v8, %v1347_v42  ;;  %2254 = vmatpush.bf16.msrb.mxu3 %v4154_v59  ;;  %v3670_v7 = vld [vmem:[%s4002_s24 + $0x38] sm:$0xf0] }
  0xd2   : > { %2302 = vmatpush.bf16.msrb.mxu0 %v4137_v52  ;;  %v3666_v42 = vld [vmem:[%s4002_s24 + $0x1c] sm:$0xf] }
  0xd3   : > { %v1396_v39 = vpop.f32.mrf.mxu1 }
  0xd4   : > { %v4515_v46 = vadd.f32 %v1396_v39, %v1348_v32  ;;  %v2752_v32 = vld [vmem:[%s4002_s24 + $0x3c] sm:$0xf0] }
  0xd5   : > { %2255 = vmatpush.bf16.msrb.mxu3 %v4173_v62  ;;  %v2758_v39 = vld [vmem:[%s4002_s24 + $0x20] sm:$0xf] }
  0xd6   : > { %v1367_v18 = vpop.f32.mrf.mxu2  ;;  %2303 = vmatpush.bf16.msrb.mxu0 %v4161_v60  ;;  %v2750_v60 = vld [vmem:[%s4002_s24 + $0x18] sm:$0xf] }
  0xd7   : > { %v1416_v36 = vpop.f32.mrf.mxu3  ;;  %v1368_v11 = vadd.f32 %v4415_v8, %v1367_v18  ;;  %v2751_v26 = vor.u32 %v3670_v7, %v2750_v60  ;;  %v2755_v18 = vor.u32 %v3666_v42, %v2752_v32  ;;  %v5059_v32 = vld [vmem:[#allocation3_spill] sm:$0xff] }
  0xd8   : > { %v1350_v59 = vpop.f32.mrf.mxu0 }
  0xd9   : > { %v4529_v63 = vadd.f32 %v1416_v36, %v1368_v11  ;;  %v1351_v40 = vadd.f32 %v4415_v8, %v1350_v59  ;;  %2256 = vmatpush.bf16.msrb.mxu3 %v4202_v19  ;;  %v2759_v36 = vor.u32 %v3671_v43, %v2758_v39  ;;  %v3303_v11 = vor.u32 %v3739_v44, %v3302_v0  ;;  %v2786_v59 = vld [vmem:[%s4002_s24 + $0x60] sm:$0xf]  ;;  %v5062_v44 = vld [vmem:[#allocation11_spill] sm:$0xff] }
  0xda   : > { %2304 = vmatpush.bf16.msrb.mxu0 %v4185_v16  ;;  %v5061_v0 = vld [vmem:[#allocation10_spill] sm:$0xff] }
  0xdb   : > { %v1399_v28 = vpop.f32.mrf.mxu1  ;;  %1467 = vmatmul.bf16.gmra.mxu2 %v2987_v30 }
  0xdc   : > { %1516 = vmatmul.bf16.gmra.mxu3 %v2991_v3  ;;  %v4534_v13 = vadd.f32 %v1399_v28, %v1351_v40  ;;  %1565 = vmatmul.bf16.gmra.mxu0 %v2995_v31  ;;  %v2788_v40 = vld [vmem:[%s4002_s24 + $0x84] sm:$0xf0] }
  0xde   : > { %1614 = vmatmul.bf16.gmra.mxu1 %v2999_v49  ;;  %v1370_v52 = vpop.f32.mrf.mxu2  ;;  %2305 = vmatpush.bf16.msrb.mxu0 %v4209_v21  ;;  %v3679_v49 = vld [vmem:[%s4002_s24 + $0x80] sm:$0xf0] }
  0xdf   : > { %v1419_v62 = vpop.f32.mrf.mxu3  ;;  %v1371_v15 = vadd.f32 %v4415_v8, %v1370_v52 }
  0xe0   : > { %v1352_v51 = vpop.f32.mrf.mxu0 }
  0xe1   : > { %v4539_v61 = vadd.f32 %v1419_v62, %v1371_v15  ;;  %v1353_v23 = vadd.f32 %v4415_v8, %v1352_v51  ;;  %v3338_v62 = vld [vmem:[%s4548_s9 + $0x48] sm:$0xf]  ;;  %v3748_v15 = vld [vmem:[%s4548_s9 + $0x68] sm:$0xf0] }
  0xe2   : > { %v3339_v60 = vor.u32 %v3748_v15, %v3338_v62 }
  0xe3   : > { %v1401_v35 = vpop.f32.mrf.mxu1 }
  0xe4   : > { %v4551_v19 = vadd.f32 %v1401_v35, %v1353_v23 }
  0xe6   : > { %v1372_v16 = vpop.f32.mrf.mxu2 }
  0xe7   : > { %v1421_v9 = vpop.f32.mrf.mxu3  ;;  %v1373_v50 = vadd.f32 %v4415_v8, %v1372_v16  ;;  %v5060_v16 = vld [vmem:[#allocation9_spill] sm:$0xff] }
  0xe8   : > { %v1531_v33 = vpop.f32.mrf.mxu0 }
  0xe9   : > { %v4562_v27 = vadd.f32 %v1421_v9, %v1373_v50 }
  0xeb   : > { %v1580_v30 = vpop.f32.mrf.mxu1  ;;  %1628 = vmatmul.bf16.vlgmr.msra.gmra.mxu2 %v2751_v26  ;;  %v2822_v26 = vld [vmem:[%s4002_s24 + $0xa8] sm:$0xf] }
  0xec   : > { %1677 = vmatmul.bf16.vlgmr.msra.gmra.mxu3 %v2755_v18  ;;  %1726 = vmatmul.bf16.vlgmr.msra.gmra.mxu0 %v2759_v36  ;;  %v3688_v18 = vld [vmem:[%s4002_s24 + $0xc8] sm:$0xf0] }
  0xed   : > { %2396 = vmatpush.bf16.msra.mxu2 %v4043_v29  ;;  %2445 = vmatpush.bf16.msra.mxu3 %v4242_v54  ;;  %v3684_v36 = vld [vmem:[%s4002_s24 + $0xac] sm:$0xf] }
  0xee   : > { %2159 = vmatmul.bf16.vlgmr.msra.gmra.mxu1 %v3303_v11  ;;  %v1433_v21 = vpop.f32.mrf.mxu2  ;;  %2494 = vmatpush.bf16.msra.mxu0 %v4248_v55  ;;  %v5063_v11 = vld [vmem:[#allocation4_spill] sm:$0xff] }
  0xef   : > { %v1482_v8 = vpop.f32.mrf.mxu3  ;;  %2543 = vmatpush.bf16.msra.mxu1 %v4254_v56  ;;  %v1434_v3 = vadd.f32 %v1433_v21, %v4423_v58  ;;  %v3675_v56 = vld [vmem:[%s4002_s24 + $0x64] sm:$0xf]  ;;  %v2794_v58 = vld [vmem:[%s4002_s24 + $0x68] sm:$0xf] }
  0xf0   : > { %v1533_v31 = vpop.f32.mrf.mxu0  ;;  %v2791_v51 = vor.u32 %v3675_v56, %v2788_v40  ;;  %v2823_v56 = vor.u32 %v3688_v18, %v2822_v26 }
  0xf1   : > { %2397 = vmatpush.bf16.msra.mxu2 %v4068_v34  ;;  %v1483_v29 = vadd.f32 %v1482_v8, %v1434_v3  ;;  %2446 = vmatpush.bf16.msra.mxu3 %v4273_v2  ;;  %v3680_v34 = vld [vmem:[%s4002_s24 + $0x88] sm:$0xf0]  ;;  %v5064_v8 = vld [vmem:[#allocation12_spill] sm:$0xff] }
  0xf2   : > { %2495 = vmatpush.bf16.msra.mxu0 %v4278_v4  ;;  %v2795_v23 = vor.u32 %v3680_v34, %v2794_v58  ;;  %v5067_v34 = vld [vmem:[#allocation5_spill] sm:$0xff] }
  0xf3   : > { %v1582_v54 = vpop.f32.mrf.mxu1  ;;  %2544 = vmatpush.bf16.msra.mxu1 %v4284_v6  ;;  %v1532_v55 = vadd.f32 %v1531_v33, %v1483_v29  ;;  %v2787_v6 = vor.u32 %v3679_v49, %v2786_v59  ;;  %v2824_v33 = vld [vmem:[%s4002_s24 + $0xcc] sm:$0xf0]  ;;  %v5066_v59 = vld [vmem:[#allocation15_spill] sm:$0xff] }
  0xf4   : > { %v2827_v40 = vor.u32 %v3684_v36, %v2824_v33 }
  0xf5   : > { %2398 = vmatpush.bf16.msra.mxu2 %v4092_v38  ;;  %v4580_v28 = vadd.f32 %v1580_v30, %v1532_v55  ;;  %2447 = vmatpush.bf16.msra.mxu3 %v4303_v10  ;;  %v3689_v30 = vld [vmem:[%s4002_s24 + $0xd0] sm:$0xf0]  ;;  %v5065_v55 = vld [vmem:[#allocation13_spill] sm:$0xff] }
  0xf6   : > { %v1435_v2 = vpop.f32.mrf.mxu2  ;;  %2496 = vmatpush.bf16.msra.mxu0 %v4308_v12 }
  0xf7   : > { %v1484_v52 = vpop.f32.mrf.mxu3  ;;  %2545 = vmatpush.bf16.msra.mxu1 %v4314_v14  ;;  %v1436_v4 = vadd.f32 %v1435_v2, %v4438_v45  ;;  %v5055_v14 = vld [vmem:[#allocation2_spill] sm:$0xff] }
  0xf9   : > { %2399 = vmatpush.bf16.msra.mxu2 %v4121_v47  ;;  %v1485_v38 = vadd.f32 %v1484_v52, %v1436_v4  ;;  %v1536_v35 = vpop.f32.mrf.mxu0  ;;  %2448 = vmatpush.bf16.msra.mxu3 %v4333_v37  ;;  %v5056_v47 = vld [vmem:[#allocation6_spill] sm:$0xff] }
  0xfa   : > { %2497 = vmatpush.bf16.msra.mxu0 %v4338_v41  ;;  %v5057_v41 = vld [vmem:[#allocation7_spill] sm:$0xff] }
  0xfb   : > { %v1585_v10 = vpop.f32.mrf.mxu1  ;;  %2546 = vmatpush.bf16.msra.mxu1 %v4344_v53  ;;  %v1534_v12 = vadd.f32 %v1533_v31, %v1485_v38  ;;  %1633 = vmatmul.bf16.gmra.mxu2 %v2787_v6  ;;  %v5058_v53 = vld [vmem:[#allocation8_spill] sm:$0xff] }
  0xfc   : > { %1682 = vmatmul.bf16.gmra.mxu3 %v2791_v51  ;;  %1731 = vmatmul.bf16.gmra.mxu0 %v2795_v23  ;;  %v3374_v31 = vld [vmem:[%s4548_s9 + $0x90] sm:$0xf] }
  0xfd   : > { %2400 = vmatpush.bf16.msra.mxu2 %v5055_v14  ;;  %v4593_v45 = vadd.f32 %v1582_v54, %v1534_v12  ;;  %2449 = vmatpush.bf16.msra.mxu3 %v5056_v47  ;;  %v3757_v54 = vld [vmem:[%s4548_s9 + $0xb0] sm:$0xf0]  ;;  %v2860_v12 = vld [vmem:[%s4002_s24 + $0x114] sm:$0xf0]  ;;  %v3698_v47 = vld [vmem:[%s4002_s24 + $0x118] sm:$0xf0] }
  0xfe   : > { %2164 = vmatmul.bf16.gmra.mxu1 %v3339_v60  ;;  %v1438_v37 = vpop.f32.mrf.mxu2  ;;  %2498 = vmatpush.bf16.msra.mxu0 %v5057_v41  ;;  %v3375_v62 = vor.u32 %v3757_v54, %v3374_v31  ;;  %v3697_v60 = vld [vmem:[%s4002_s24 + $0x110] sm:$0xf0]  ;;  %v2866_v14 = vld [vmem:[%s4002_s24 + $0xf8] sm:$0xf]  ;;  %v2896_v31 = vld [vmem:[%s4002_s24 + $0x15c] sm:$0xf0] }
  0xff   : > { %v1487_v7 = vpop.f32.mrf.mxu3  ;;  %2547 = vmatpush.bf16.msra.mxu1 %v5058_v53  ;;  %v1439_v42 = vadd.f32 %v1438_v37, %v4461_v24  ;;  %v2830_v24 = vld [vmem:[%s4002_s24 + $0xb0] sm:$0xf]  ;;  %v3410_v53 = vld [vmem:[%s4548_s9 + $0xd8] sm:$0xf]  ;;  %v2902_v54 = vld [vmem:[%s4002_s24 + $0x140] sm:$0xf] }
 0x100   : > { %v2831_v58 = vor.u32 %v3689_v30, %v2830_v24 }
 0x101   : > { %2401 = vmatpush.bf16.msra.mxu2 %v5059_v32  ;;  %v1488_v39 = vadd.f32 %v1487_v7, %v1439_v42  ;;  %v1538_v43 = vpop.f32.mrf.mxu0  ;;  %2450 = vmatpush.bf16.msra.mxu3 %v5060_v16  ;;  %v3766_v42 = vld [vmem:[%s4548_s9 + $0xf8] sm:$0xf0] }
 0x102   : > { %2499 = vmatpush.bf16.msra.mxu0 %v5061_v0  ;;  %v3411_v0 = vor.u32 %v3766_v42, %v3410_v53  ;;  %v3716_v53 = vld [vmem:[%s4002_s24 + $0x1a8] sm:$0xf0] }
 0x103   : > { %v1587_v9 = vpop.f32.mrf.mxu1  ;;  %2548 = vmatpush.bf16.msra.mxu1 %v5062_v44  ;;  %v1537_v50 = vadd.f32 %v1536_v35, %v1488_v39  ;;  %v2858_v35 = vld [vmem:[%s4002_s24 + $0xf0] sm:$0xf] }
 0x104   : > { %v2859_v39 = vor.u32 %v3697_v60, %v2858_v35 }
 0x105   : > { %2402 = vmatpush.bf16.msra.mxu2 %v5063_v11  ;;  %v4610_v21 = vadd.f32 %v1585_v10, %v1537_v50  ;;  %2451 = vmatpush.bf16.msra.mxu3 %v5064_v8  ;;  %v3693_v10 = vld [vmem:[%s4002_s24 + $0xf4] sm:$0xf]  ;;  %v2894_v8 = vld [vmem:[%s4002_s24 + $0x138] sm:$0xf] }
 0x106   : > { %v1440_v3 = vpop.f32.mrf.mxu2  ;;  %2500 = vmatpush.bf16.msra.mxu0 %v5065_v55  ;;  %v3707_v55 = vld [vmem:[%s4002_s24 + $0x160] sm:$0xf0] }
 0x107   : > { %v1489_v29 = vpop.f32.mrf.mxu3  ;;  %2549 = vmatpush.bf16.msra.mxu1 %v5066_v59  ;;  %v1441_v49 = vadd.f32 %v1440_v3, %v4480_v1  ;;  %v3706_v3 = vld [vmem:[%s4002_s24 + $0x158] sm:$0xf0] }
 0x109   : > { %2403 = vmatpush.bf16.msra.mxu2 %v5067_v34  ;;  %v1490_v2 = vadd.f32 %v1489_v29, %v1441_v49  ;;  %v1541_v52 = vpop.f32.mrf.mxu0  ;;  %2452 = vmatpush.bf16.msra.mxu3 %v4459_v57  ;;  %v3702_v29 = vld [vmem:[%s4002_s24 + $0x13c] sm:$0xf] }
 0x10a   : > { %2501 = vmatpush.bf16.msra.mxu0 %v4466_v25 }
 0x10b   : > { %v1590_v15 = vpop.f32.mrf.mxu1  ;;  %2550 = vmatpush.bf16.msra.mxu1 %v4487_v20  ;;  %v1539_v4 = vadd.f32 %v1538_v43, %v1490_v2  ;;  %1638 = vmatmul.bf16.gmra.mxu2 %v2823_v56  ;;  %v2867_v43 = vor.u32 %v3698_v47, %v2866_v14  ;;  %v2895_v2 = vor.u32 %v3706_v3, %v2894_v8  ;;  %v3715_v14 = vld [vmem:[%s4002_s24 + $0x1a0] sm:$0xf0] }
 0x10c   : > { %1687 = vmatmul.bf16.gmra.mxu3 %v2827_v40  ;;  %1736 = vmatmul.bf16.gmra.mxu0 %v2831_v58  ;;  %v3446_v40 = vld [vmem:[%s4548_s9 + $0x120] sm:$0xf]  ;;  %v3775_v58 = vld [vmem:[%s4548_s9 + $0x140] sm:$0xf0] }
 0x10d   : > { %v4622_v1 = vadd.f32 %v1587_v9, %v1539_v4  ;;  %v3447_v4 = vor.u32 %v3775_v58, %v3446_v40  ;;  %v3711_v47 = vld [vmem:[%s4002_s24 + $0x184] sm:$0xf]  ;;  %v2968_v40 = vld [vmem:[%s4002_s24 + $0x1ec] sm:$0xf0] }
 0x10e   : > { %2169 = vmatmul.bf16.gmra.mxu1 %v3375_v62  ;;  %v1443_v6 = vpop.f32.mrf.mxu2  ;;  %v2974_v58 = vld [vmem:[%s4002_s24 + $0x1d0] sm:$0xf] }
 0x10f   : > { %v1492_v57 = vpop.f32.mrf.mxu3  ;;  %v1444_v25 = vadd.f32 %v1443_v6, %v4502_v5  ;;  %v2863_v5 = vor.u32 %v3693_v10, %v2860_v12  ;;  %v2930_v12 = vld [vmem:[%s4002_s24 + $0x180] sm:$0xf] }
 0x111   : > { %v1493_v51 = vadd.f32 %v1492_v57, %v1444_v25  ;;  %v1543_v23 = vpop.f32.mrf.mxu0 }
 0x113   : > { %v1592_v20 = vpop.f32.mrf.mxu1  ;;  %v1542_v38 = vadd.f32 %v1541_v52, %v1493_v51  ;;  %v2903_v52 = vor.u32 %v3707_v55, %v2902_v54  ;;  %v2966_v55 = vld [vmem:[%s4002_s24 + $0x1c8] sm:$0xf] }
 0x115   : > { %v4631_v37 = vadd.f32 %v1590_v15, %v1542_v38 }
 0x116   : > { %v1445_v7 = vpop.f32.mrf.mxu2 }
 0x117   : > { %v1494_v41 = vpop.f32.mrf.mxu3  ;;  %v1446_v32 = vadd.f32 %v1445_v7, %v4515_v46  ;;  %v2932_v7 = vld [vmem:[%s4002_s24 + $0x1a4] sm:$0xf0] }
 0x119   : > { %v1495_v16 = vadd.f32 %v1494_v41, %v1446_v32  ;;  %v1546_v9 = vpop.f32.mrf.mxu0  ;;  %v2938_v41 = vld [vmem:[%s4002_s24 + $0x188] sm:$0xf] }
 0x11b   : > { %v1595_v44 = vpop.f32.mrf.mxu1  ;;  %v1544_v50 = vadd.f32 %v1543_v23, %v1495_v16  ;;  %1643 = vmatmul.bf16.gmra.mxu2 %v2859_v39  ;;  %v5068_v23 = vld [vmem:[#allocation14_spill] sm:$0xff] }
 0x11c   : > { %1692 = vmatmul.bf16.gmra.mxu3 %v2863_v5  ;;  %1741 = vmatmul.bf16.gmra.mxu0 %v2867_v43  ;;  %v3482_v5 = vld [vmem:[%s4548_s9 + $0x168] sm:$0xf]  ;;  %v3784_v43 = vld [vmem:[%s4548_s9 + $0x188] sm:$0xf0] }
 0x11d   : > { %v4636_v26 = vadd.f32 %v1592_v20, %v1544_v50 }
 0x11e   : > { %2174 = vmatmul.bf16.gmra.mxu1 %v3411_v0  ;;  %v1448_v46 = vpop.f32.mrf.mxu2  ;;  %v2935_v0 = vor.u32 %v3711_v47, %v2932_v7 }
 0x11f   : > { %v1497_v18 = vpop.f32.mrf.mxu3  ;;  %v1449_v36 = vadd.f32 %v1448_v46, %v4534_v13  ;;  %v2899_v13 = vor.u32 %v3702_v29, %v2896_v31 }
 0x121   : > { %v1498_v33 = vadd.f32 %v1497_v18, %v1449_v36  ;;  %v1548_v11 = vpop.f32.mrf.mxu0  ;;  %v3483_v18 = vor.u32 %v3784_v43, %v3482_v5  ;;  %v3004_v5 = vld [vmem:[%s4002_s24 + $0x234] sm:$0xf0] }
 0x122   : > { %v3010_v43 = vld [vmem:[%s4002_s24 + $0x218] sm:$0xf] }
 0x123   : > { %v1597_v24 = vpop.f32.mrf.mxu1  ;;  %v1547_v30 = vadd.f32 %v1546_v9, %v1498_v33  ;;  %v2931_v9 = vor.u32 %v3715_v14, %v2930_v12 }
 0x125   : > { %v4645_v59 = vadd.f32 %v1595_v44, %v1547_v30  ;;  %v2939_v44 = vor.u32 %v3716_v53, %v2938_v41  ;;  %v5069_v30 = vld [vmem:[#allocation16_spill] sm:$0xff] }
 0x126   : > { %v1450_v49 = vpop.f32.mrf.mxu2  ;;  %v3002_v53 = vld [vmem:[%s4002_s24 + $0x210] sm:$0xf] }
 0x127   : > { %v1499_v56 = vpop.f32.mrf.mxu3  ;;  %v1451_v34 = vadd.f32 %v1450_v49, %v4551_v19  ;;  %v3724_v49 = vld [vmem:[%s4002_s24 + $0x1e8] sm:$0xf0] }
 0x129   : > { %v1500_v62 = vadd.f32 %v1499_v56, %v1451_v34  ;;  %v1551_v15 = vpop.f32.mrf.mxu0  ;;  %v3720_v56 = vld [vmem:[%s4002_s24 + $0x1cc] sm:$0xf]  ;;  %v3725_v34 = vld [vmem:[%s4002_s24 + $0x1f0] sm:$0xf0] }
 0x12b   : > { %v1600_v6 = vpop.f32.mrf.mxu1  ;;  %v1549_v57 = vadd.f32 %v1548_v11, %v1500_v62  ;;  %1648 = vmatmul.bf16.gmra.mxu2 %v2895_v2  ;;  %v3518_v62 = vld [vmem:[%s4548_s9 + $0x1b0] sm:$0xf] }
 0x12c   : > { %1697 = vmatmul.bf16.gmra.mxu3 %v2899_v13  ;;  %1746 = vmatmul.bf16.gmra.mxu0 %v2903_v52 }
 0x12d   : > { %v4650_v25 = vadd.f32 %v1597_v24, %v1549_v57  ;;  %v2971_v57 = vor.u32 %v3720_v56, %v2968_v40 }
 0x12e   : > { %2179 = vmatmul.bf16.gmra.mxu1 %v3447_v4  ;;  %v1453_v19 = vpop.f32.mrf.mxu2 }
 0x12f   : > { %v1502_v51 = vpop.f32.mrf.mxu3  ;;  %v1454_v20 = vadd.f32 %v1453_v19, %v5068_v23  ;;  %v2975_v19 = vor.u32 %v3725_v34, %v2974_v58  ;;  %v3735_v58 = vld [vmem:[%s4548_s9 + $0x4] sm:$0xf]  ;;  %v3304_v34 = vld [vmem:[%s4548_s9 + $0x24] sm:$0xf0] }
 0x131   : > { %v1503_v38 = vadd.f32 %v1502_v51, %v1454_v20  ;;  %v1553_v35 = vpop.f32.mrf.mxu0 }
 0x133   : > { %v1602_v60 = vpop.f32.mrf.mxu1  ;;  %v1552_v10 = vadd.f32 %v1551_v15, %v1503_v38  ;;  %v3793_v15 = vld [vmem:[%s4548_s9 + $0x1d0] sm:$0xf0] }
 0x134   : > { %v3519_v20 = vor.u32 %v3793_v15, %v3518_v62  ;;  %v3736_v62 = vld [vmem:[%s4548_s9 + $0xc] sm:$0xf]  ;;  %v3312_v15 = vld [vmem:[%s4548_s9 + $0x2c] sm:$0xf0] }
 0x135   : > { %v4659_v42 = vadd.f32 %v1600_v6, %v1552_v10  ;;  %v2967_v6 = vor.u32 %v3724_v49, %v2966_v55 }
 0x136   : > { %v1455_v32 = vpop.f32.mrf.mxu2 }
 0x137   : > { %v1504_v39 = vpop.f32.mrf.mxu3  ;;  %v1456_v16 = vadd.f32 %v1455_v32, %v4453_v48  ;;  %v3733_v32 = vld [vmem:[%s4002_s24 + $0x230] sm:$0xf0] }
 0x139   : > { %v1505_v50 = vadd.f32 %v1504_v39, %v1456_v16  ;;  %v1556_v46 = vpop.f32.mrf.mxu0  ;;  %v3729_v39 = vld [vmem:[%s4002_s24 + $0x214] sm:$0xf]  ;;  %v3734_v16 = vld [vmem:[%s4002_s24 + $0x238] sm:$0xf0] }
 0x13b   : > { %v1605_v36 = vpop.f32.mrf.mxu1  ;;  %v1554_v33 = vadd.f32 %v1553_v35, %v1505_v50  ;;  %1653 = vmatmul.bf16.gmra.mxu2 %v2931_v9  ;;  %v3554_v50 = vld [vmem:[%s4548_s9 + $0x1f8] sm:$0xf] }
 0x13c   : > { %1702 = vmatmul.bf16.gmra.mxu3 %v2935_v0  ;;  %1751 = vmatmul.bf16.gmra.mxu0 %v2939_v44 }
 0x13d   : > { %v4664_v11 = vadd.f32 %v1602_v60, %v1554_v33  ;;  %v3011_v33 = vor.u32 %v3734_v16, %v3010_v43  ;;  %v3744_v43 = vld [vmem:[%s4548_s9 + $0x4c] sm:$0xf]  ;;  %v3340_v16 = vld [vmem:[%s4548_s9 + $0x6c] sm:$0xf0] }
 0x13e   : > { %2184 = vmatmul.bf16.gmra.mxu1 %v3483_v18  ;;  %v1458_v48 = vpop.f32.mrf.mxu2 }
 0x13f   : > { %v1507_v24 = vpop.f32.mrf.mxu3  ;;  %v1459_v8 = vadd.f32 %v1458_v48, %v5069_v30 }
 0x141   : > { %v1508_v3 = vadd.f32 %v1507_v24, %v1459_v8  ;;  %v1558_v29 = vpop.f32.mrf.mxu0 }
 0x143   : > { %v1607_v31 = vpop.f32.mrf.mxu1  ;;  %v1557_v54 = vadd.f32 %v1556_v46, %v1508_v3  ;;  %v3802_v46 = vld [vmem:[%s4548_s9 + $0x218] sm:$0xf0] }
 0x144   : > { %v3555_v30 = vor.u32 %v3802_v46, %v3554_v50  ;;  %v3745_v50 = vld [vmem:[%s4548_s9 + $0x54] sm:$0xf]  ;;  %v3348_v46 = vld [vmem:[%s4548_s9 + $0x74] sm:$0xf0] }
 0x145   : > { %v4673_v2 = vadd.f32 %v1605_v36, %v1557_v54  ;;  %v3003_v36 = vor.u32 %v3733_v32, %v3002_v53 }
 0x146   : > { %v1460_v13 = vpop.f32.mrf.mxu2 }
 0x147   : > { %v1509_v52 = vpop.f32.mrf.mxu3  ;;  %v1461_v4 = vadd.f32 %v1460_v13, %v4498_v17  ;;  %v3310_v13 = vld [vmem:[%s4548_s9 + $0x8] sm:$0xf] }
 0x149   : > { %v1510_v51 = vadd.f32 %v1509_v52, %v1461_v4  ;;  %v1561_v23 = vpop.f32.mrf.mxu0  ;;  %v3740_v52 = vld [vmem:[%s4548_s9 + $0x28] sm:$0xf0] }
 0x14b   : > { %v1610_v38 = vpop.f32.mrf.mxu1  ;;  %v1559_v35 = vadd.f32 %v1558_v29, %v1510_v51  ;;  %1658 = vmatmul.bf16.gmra.mxu2 %v2967_v6  ;;  %v3741_v51 = vld [vmem:[%s4548_s9 + $0x30] sm:$0xf0] }
 0x14c   : > { %1707 = vmatmul.bf16.gmra.mxu3 %v2971_v57  ;;  %1756 = vmatmul.bf16.gmra.mxu0 %v2975_v19  ;;  %v3318_v19 = vld [vmem:[%s4548_s9 + $0x10] sm:$0xf] }
 0x14d   : > { %v4678_v60 = vadd.f32 %v1607_v31, %v1559_v35 }
 0x14e   : > { %2189 = vmatmul.bf16.gmra.mxu1 %v3519_v20  ;;  %v1463_v17 = vpop.f32.mrf.mxu2  ;;  %v3307_v20 = vor.u32 %v3735_v58, %v3304_v34 }
 0x14f   : > { %v1512_v10 = vpop.f32.mrf.mxu3  ;;  %v1464_v12 = vadd.f32 %v1463_v17, %v4509_v22  ;;  %v3007_v22 = vor.u32 %v3729_v39, %v3004_v5 }
 0x151   : > { %v1513_v14 = vadd.f32 %v1512_v10, %v1464_v12  ;;  %v1563_v47 = vpop.f32.mrf.mxu0  ;;  %v3319_v10 = vor.u32 %v3741_v51, %v3318_v19 }
 0x153   : > { %v1612_v7 = vpop.f32.mrf.mxu1  ;;  %v1562_v41 = vadd.f32 %v1561_v23, %v1513_v14 }
 0x155   : > { %v4687_v9 = vadd.f32 %v1610_v38, %v1562_v41  ;;  %v3315_v38 = vor.u32 %v3736_v62, %v3312_v15  ;;  %v3382_v62 = vld [vmem:[%s4548_s9 + $0x98] sm:$0xf]  ;;  %v3758_v15 = vld [vmem:[%s4548_s9 + $0xb8] sm:$0xf0] }
 0x156   : > { %v1465_v0 = vpop.f32.mrf.mxu2 }
 0x157   : > { %v1514_v44 = vpop.f32.mrf.mxu3  ;;  %v1466_v18 = vadd.f32 %v1465_v0, %v4529_v63  ;;  %v3346_v0 = vld [vmem:[%s4548_s9 + $0x50] sm:$0xf] }
 0x159   : > { %v1515_v48 = vadd.f32 %v1514_v44, %v1466_v18  ;;  %v1566_v24 = vpop.f32.mrf.mxu0  ;;  %v3749_v44 = vld [vmem:[%s4548_s9 + $0x70] sm:$0xf0] }
 0x15b   : > { %v1615_v8 = vpop.f32.mrf.mxu1  ;;  %v1564_v3 = vadd.f32 %v1563_v47, %v1515_v48  ;;  %1663 = vmatmul.bf16.gmra.mxu2 %v3003_v36 }
 0x15c   : > { %1712 = vmatmul.bf16.gmra.mxu3 %v3007_v22  ;;  %1761 = vmatmul.bf16.gmra.mxu0 %v3011_v33  ;;  %v3354_v22 = vld [vmem:[%s4548_s9 + $0x58] sm:$0xf]  ;;  %v3750_v33 = vld [vmem:[%s4548_s9 + $0x78] sm:$0xf0] }
 0x15d   : > { %v4692_v29 = vadd.f32 %v1612_v7, %v1564_v3 }
 0x15e   : > { %2194 = vmatmul.bf16.gmra.mxu1 %v3555_v30  ;;  %v1468_v63 = vpop.f32.mrf.mxu2  ;;  %v3351_v30 = vor.u32 %v3745_v50, %v3348_v46  ;;  %v3412_v50 = vld [vmem:[%s4548_s9 + $0xfc] sm:$0xf0] }
 0x15f   : > { %v1517_v31 = vpop.f32.mrf.mxu3  ;;  %v1469_v54 = vadd.f32 %v1468_v63, %v4539_v61  ;;  %v3311_v61 = vor.u32 %v3740_v52, %v3310_v13  ;;  %v3355_v63 = vor.u32 %v3750_v33, %v3354_v22  ;;  %v3753_v13 = vld [vmem:[%s4548_s9 + $0x94] sm:$0xf]  ;;  %v3376_v52 = vld [vmem:[%s4548_s9 + $0xb4] sm:$0xf0]  ;;  %v3418_v46 = vld [vmem:[%s4548_s9 + $0xe0] sm:$0xf] }
 0x160   : > { %v3420_v22 = vld [vmem:[%s4548_s9 + $0x104] sm:$0xf0] }
 0x161   : > { %v1518_v55 = vadd.f32 %v1517_v31, %v1469_v54  ;;  %v1568_v49 = vpop.f32.mrf.mxu0 }
 0x163   : > { %v1617_v56 = vpop.f32.mrf.mxu1  ;;  %v1567_v40 = vadd.f32 %v1566_v24, %v1518_v55  ;;  %v3343_v24 = vor.u32 %v3744_v43, %v3340_v16 }
 0x165   : > { %v4701_v4 = vadd.f32 %v1615_v8, %v1567_v40 }
 0x166   : > { %v1470_v6 = vpop.f32.mrf.mxu2 }
 0x167   : > { %v1519_v57 = vpop.f32.mrf.mxu3  ;;  %v1471_v23 = vadd.f32 %v1470_v6, %v4562_v27  ;;  %v3754_v6 = vld [vmem:[%s4548_s9 + $0x9c] sm:$0xf] }
 0x169   : > { %v1520_v35 = vadd.f32 %v1519_v57, %v1471_v23  ;;  %v1727_v17 = vpop.f32.mrf.mxu0  ;;  %v3384_v57 = vld [vmem:[%s4548_s9 + $0xbc] sm:$0xf0] }
 0x16a   : > { %v3390_v23 = vld [vmem:[%s4548_s9 + $0xa0] sm:$0xf] }
 0x16b   : > { %v4706_v12 = vpop.f32.mrf.mxu1  ;;  %v1569_v14 = vadd.f32 %v1568_v49, %v1520_v35  ;;  %2208 = vmatmul.bf16.vlgmr.msrb.gmra.mxu2 %v3307_v20  ;;  %v3759_v20 = vld [vmem:[%s4548_s9 + $0xc0] sm:$0xf0]  ;;  %v3387_v35 = vor.u32 %v3754_v6, %v3384_v57 }
 0x16c   : > { %2257 = vmatmul.bf16.vlgmr.msrb.gmra.mxu3 %v3311_v61  ;;  %2306 = vmatmul.bf16.vlgmr.msrb.gmra.mxu0 %v3315_v38  ;;  %v3379_v38 = vor.u32 %v3753_v13, %v3376_v52  ;;  %v3771_v57 = vld [vmem:[%s4548_s9 + $0x124] sm:$0xf] }
 0x16d   : > { %v4708_v27 = vadd.f32 %v1617_v56, %v1569_v14  ;;  %v3391_v14 = vor.u32 %v3759_v20, %v3390_v23  ;;  %v3776_v23 = vld [vmem:[%s4548_s9 + $0x148] sm:$0xf0] }
 0x16e   : > { %2355 = vmatmul.bf16.vlgmr.msrb.gmra.mxu1 %v3319_v10  ;;  %v1629_v47 = vpop.f32.mrf.mxu2  ;;  %v3772_v20 = vld [vmem:[%s4548_s9 + $0x12c] sm:$0xf] }
 0x16f   : > { %v1678_v7 = vpop.f32.mrf.mxu3  ;;  %v1630_v41 = vadd.f32 %v1629_v47, %v4580_v28  ;;  %v3347_v28 = vor.u32 %v3749_v44, %v3346_v0  ;;  %v3762_v44 = vld [vmem:[%s4548_s9 + $0xdc] sm:$0xf] }
 0x171   : > { %v1679_v53 = vadd.f32 %v1678_v7, %v1630_v41  ;;  %v1729_v32 = vpop.f32.mrf.mxu0 }
 0x173   : > { %v4711_v39 = vpop.f32.mrf.mxu1  ;;  %v4713_v5 = vadd.f32 %v1727_v17, %v1679_v53 }
 0x176   : > { %v1631_v18 = vpop.f32.mrf.mxu2 }
 0x177   : > { %v1680_v36 = vpop.f32.mrf.mxu3  ;;  %v1632_v48 = vadd.f32 %v1631_v18, %v4593_v45  ;;  %v3767_v18 = vld [vmem:[%s4548_s9 + $0x100] sm:$0xf0] }
 0x179   : > { %v1681_v8 = vadd.f32 %v1680_v36, %v1632_v48  ;;  %v1732_v3 = vpop.f32.mrf.mxu0  ;;  %v3763_v36 = vld [vmem:[%s4548_s9 + $0xe4] sm:$0xf] }
 0x17b   : > { %v4724_v31 = vpop.f32.mrf.mxu1  ;;  %v4726_v54 = vadd.f32 %v1729_v32, %v1681_v8  ;;  %2213 = vmatmul.bf16.gmra.mxu2 %v3343_v24  ;;  %v3426_v24 = vld [vmem:[%s4548_s9 + $0xe8] sm:$0xf]  ;;  %v3415_v8 = vor.u32 %v3762_v44, %v3412_v50 }
 0x17c   : > { %2262 = vmatmul.bf16.gmra.mxu3 %v3347_v28  ;;  %2311 = vmatmul.bf16.gmra.mxu0 %v3351_v30  ;;  %v3768_v28 = vld [vmem:[%s4548_s9 + $0x108] sm:$0xf0] }
 0x17e   : > { %2360 = vmatmul.bf16.gmra.mxu1 %v3355_v63  ;;  %v1634_v45 = vpop.f32.mrf.mxu2 }
 0x17f   : > { %v1683_v55 = vpop.f32.mrf.mxu3  ;;  %v1635_v49 = vadd.f32 %v1634_v45, %v4610_v21  ;;  %v3383_v21 = vor.u32 %v3758_v15, %v3382_v62 }
 0x181   : > { %v1684_v56 = vadd.f32 %v1683_v55, %v1635_v49  ;;  %v1734_v40 = vpop.f32.mrf.mxu0  ;;  %v3427_v55 = vor.u32 %v3768_v28, %v3426_v24  ;;  %v3484_v24 = vld [vmem:[%s4548_s9 + $0x18c] sm:$0xf0] }
 0x182   : > { %v3490_v28 = vld [vmem:[%s4548_s9 + $0x170] sm:$0xf] }
 0x183   : > { %v4729_v58 = vpop.f32.mrf.mxu1  ;;  %v4731_v34 = vadd.f32 %v1732_v3, %v1684_v56  ;;  %v3423_v3 = vor.u32 %v3763_v36, %v3420_v22 }
 0x186   : > { %v1636_v19 = vpop.f32.mrf.mxu2 }
 0x187   : > { %v1685_v51 = vpop.f32.mrf.mxu3  ;;  %v1637_v61 = vadd.f32 %v1636_v19, %v4622_v1  ;;  %v3448_v19 = vld [vmem:[%s4548_s9 + $0x144] sm:$0xf0] }
 0x189   : > { %v1686_v17 = vadd.f32 %v1685_v51, %v1637_v61  ;;  %v1737_v10 = vpop.f32.mrf.mxu0  ;;  %v3454_v51 = vld [vmem:[%s4548_s9 + $0x128] sm:$0xf]  ;;  %v3456_v61 = vld [vmem:[%s4548_s9 + $0x14c] sm:$0xf0] }
 0x18b   : > { %v4742_v47 = vpop.f32.mrf.mxu1  ;;  %v4744_v7 = vadd.f32 %v1734_v40, %v1686_v17  ;;  %2218 = vmatmul.bf16.gmra.mxu2 %v3379_v38  ;;  %v3777_v17 = vld [vmem:[%s4548_s9 + $0x150] sm:$0xf0] }
 0x18c   : > { %2267 = vmatmul.bf16.gmra.mxu3 %v3383_v21  ;;  %2316 = vmatmul.bf16.gmra.mxu0 %v3387_v35  ;;  %v3462_v35 = vld [vmem:[%s4548_s9 + $0x130] sm:$0xf] }
 0x18e   : > { %2365 = vmatmul.bf16.gmra.mxu1 %v3391_v14  ;;  %v1639_v1 = vpop.f32.mrf.mxu2  ;;  %v3451_v14 = vor.u32 %v3771_v57, %v3448_v19 }
 0x18f   : > { %v1688_v41 = vpop.f32.mrf.mxu3  ;;  %v1640_v53 = vadd.f32 %v1639_v1, %v4631_v37  ;;  %v3419_v37 = vor.u32 %v3767_v18, %v3418_v46  ;;  %v3459_v1 = vor.u32 %v3772_v20, %v3456_v61 }
 0x191   : > { %v1689_v32 = vadd.f32 %v1688_v41, %v1640_v53  ;;  %v1739_v43 = vpop.f32.mrf.mxu0 }
 0x193   : > { %v4747_v16 = vpop.f32.mrf.mxu1  ;;  %v4749_v0 = vadd.f32 %v1737_v10, %v1689_v32  ;;  %v3463_v32 = vor.u32 %v3777_v17, %v3462_v35  ;;  %v3789_v17 = vld [vmem:[%s4548_s9 + $0x1b4] sm:$0xf] }
 0x196   : > { %v1641_v33 = vpop.f32.mrf.mxu2 }
 0x197   : > { %v1690_v48 = vpop.f32.mrf.mxu3  ;;  %v1642_v30 = vadd.f32 %v1641_v33, %v4636_v26 }
 0x199   : > { %v1691_v63 = vadd.f32 %v1690_v48, %v1642_v30  ;;  %v1742_v45 = vpop.f32.mrf.mxu0  ;;  %v3780_v48 = vld [vmem:[%s4548_s9 + $0x16c] sm:$0xf]  ;;  %v3785_v30 = vld [vmem:[%s4548_s9 + $0x190] sm:$0xf0] }
 0x19b   : > { %v4760_v49 = vpop.f32.mrf.mxu1  ;;  %v4762_v56 = vadd.f32 %v1739_v43, %v1691_v63  ;;  %2223 = vmatmul.bf16.gmra.mxu2 %v3415_v8  ;;  %v3781_v8 = vld [vmem:[%s4548_s9 + $0x174] sm:$0xf] }
 0x19c   : > { %2272 = vmatmul.bf16.gmra.mxu3 %v3419_v37  ;;  %2321 = vmatmul.bf16.gmra.mxu0 %v3423_v3  ;;  %v3492_v37 = vld [vmem:[%s4548_s9 + $0x194] sm:$0xf0] }
 0x19e   : > { %2370 = vmatmul.bf16.gmra.mxu1 %v3427_v55  ;;  %v1644_v26 = vpop.f32.mrf.mxu2  ;;  %v3786_v55 = vld [vmem:[%s4548_s9 + $0x198] sm:$0xf0] }
 0x19f   : > { %v1693_v40 = vpop.f32.mrf.mxu3  ;;  %v1645_v13 = vadd.f32 %v1644_v26, %v4645_v59  ;;  %v3455_v59 = vor.u32 %v3776_v23, %v3454_v51 }
 0x1a1   : > { %v1694_v52 = vadd.f32 %v1693_v40, %v1645_v13  ;;  %v1744_v62 = vpop.f32.mrf.mxu0  ;;  %v3487_v40 = vor.u32 %v3780_v48, %v3484_v24  ;;  %v3495_v13 = vor.u32 %v3781_v8, %v3492_v37 }
 0x1a3   : > { %v4765_v15 = vpop.f32.mrf.mxu1  ;;  %v4767_v6 = vadd.f32 %v1742_v45, %v1694_v52  ;;  %v3498_v45 = vld [vmem:[%s4548_s9 + $0x178] sm:$0xf] }
 0x1a4   : > { %v3499_v57 = vor.u32 %v3786_v55, %v3498_v45 }
 0x1a6   : > { %v1646_v38 = vpop.f32.mrf.mxu2 }
 0x1a7   : > { %v1695_v21 = vpop.f32.mrf.mxu3  ;;  %v1647_v10 = vadd.f32 %v1646_v38, %v4650_v25 }
 0x1a9   : > { %v1696_v41 = vadd.f32 %v1695_v21, %v1647_v10  ;;  %v1747_v53 = vpop.f32.mrf.mxu0  ;;  %v3520_v10 = vld [vmem:[%s4548_s9 + $0x1d4] sm:$0xf0] }
 0x1ab   : > { %v4778_v43 = vpop.f32.mrf.mxu1  ;;  %v4780_v44 = vadd.f32 %v1744_v62, %v1696_v41  ;;  %2228 = vmatmul.bf16.gmra.mxu2 %v3451_v14  ;;  %v3526_v14 = vld [vmem:[%s4548_s9 + $0x1b8] sm:$0xf]  ;;  %v3528_v41 = vld [vmem:[%s4548_s9 + $0x1dc] sm:$0xf0] }
 0x1ac   : > { %2277 = vmatmul.bf16.gmra.mxu3 %v3455_v59  ;;  %2326 = vmatmul.bf16.gmra.mxu0 %v3459_v1  ;;  %v3794_v59 = vld [vmem:[%s4548_s9 + $0x1d8] sm:$0xf0] }
 0x1ad   : > { %v3790_v1 = vld [vmem:[%s4548_s9 + $0x1bc] sm:$0xf] }
 0x1ae   : > { %2375 = vmatmul.bf16.gmra.mxu1 %v3463_v32  ;;  %v1649_v25 = vpop.f32.mrf.mxu2 }
 0x1af   : > { %v1698_v50 = vpop.f32.mrf.mxu3  ;;  %v1650_v46 = vadd.f32 %v1649_v25, %v4659_v42  ;;  %v3491_v42 = vor.u32 %v3785_v30, %v3490_v28  ;;  %v3534_v25 = vld [vmem:[%s4548_s9 + $0x1c0] sm:$0xf] }
 0x1b1   : > { %v1699_v18 = vadd.f32 %v1698_v50, %v1650_v46  ;;  %v1749_v36 = vpop.f32.mrf.mxu0  ;;  %v3795_v50 = vld [vmem:[%s4548_s9 + $0x1e0] sm:$0xf0] }
 0x1b2   : > { %v3535_v28 = vor.u32 %v3795_v50, %v3534_v25 }
 0x1b3   : > { %v4783_v22 = vpop.f32.mrf.mxu1  ;;  %v4785_v33 = vadd.f32 %v1747_v53, %v1699_v18  ;;  %v3523_v18 = vor.u32 %v3789_v17, %v3520_v10 }
 0x1b6   : > { %v1651_v3 = vpop.f32.mrf.mxu2 }
 0x1b7   : > { %v1700_v63 = vpop.f32.mrf.mxu3  ;;  %v1652_v26 = vadd.f32 %v1651_v3, %v4664_v11 }
 0x1b9   : > { %v1701_v52 = vadd.f32 %v1700_v63, %v1652_v26  ;;  %v1752_v62 = vpop.f32.mrf.mxu0 }
 0x1bb   : > { %v4796_v19 = vpop.f32.mrf.mxu1  ;;  %v4798_v51 = vadd.f32 %v1749_v36, %v1701_v52  ;;  %2233 = vmatmul.bf16.gmra.mxu2 %v3487_v40  ;;  %v3531_v36 = vor.u32 %v3790_v1, %v3528_v41  ;;  %v3798_v40 = vld [vmem:[%s4548_s9 + $0x1fc] sm:$0xf]  ;;  %v3803_v52 = vld [vmem:[%s4548_s9 + $0x220] sm:$0xf0] }
 0x1bc   : > { %2282 = vmatmul.bf16.gmra.mxu3 %v3491_v42  ;;  %2331 = vmatmul.bf16.gmra.mxu0 %v3495_v13  ;;  %v3556_v42 = vld [vmem:[%s4548_s9 + $0x21c] sm:$0xf0] }
 0x1bd   : > { %v3562_v13 = vld [vmem:[%s4548_s9 + $0x200] sm:$0xf]  ;;  %v3559_v17 = vor.u32 %v3798_v40, %v3556_v42  ;;  %v3743_v40 = vld [vmem:[%s4548_s9 + $0x40] sm:$0xf0] }
 0x1be   : > { %2380 = vmatmul.bf16.gmra.mxu1 %v3499_v57  ;;  %v1654_v11 = vpop.f32.mrf.mxu2  ;;  %v3564_v57 = vld [vmem:[%s4548_s9 + $0x224] sm:$0xf0] }
 0x1bf   : > { %v1703_v23 = vpop.f32.mrf.mxu3  ;;  %v1655_v20 = vadd.f32 %v1654_v11, %v4673_v2  ;;  %v3527_v2 = vor.u32 %v3794_v59, %v3526_v14 }
 0x1c1   : > { %v1704_v61 = vadd.f32 %v1703_v23, %v1655_v20  ;;  %v1754_v38 = vpop.f32.mrf.mxu0  ;;  %v3570_v20 = vld [vmem:[%s4548_s9 + $0x208] sm:$0xf] }
 0x1c3   : > { %v4801_v21 = vpop.f32.mrf.mxu1  ;;  %v4803_v35 = vadd.f32 %v1752_v62, %v1704_v61  ;;  %v3799_v62 = vld [vmem:[%s4548_s9 + $0x204] sm:$0xf]  ;;  %v3804_v61 = vld [vmem:[%s4548_s9 + $0x228] sm:$0xf0] }
 0x1c4   : > { %v3567_v10 = vor.u32 %v3799_v62, %v3564_v57  ;;  %v3571_v1 = vor.u32 %v3804_v61, %v3570_v20 }
 0x1c6   : > { %v1656_v53 = vpop.f32.mrf.mxu2 }
 0x1c7   : > { %v1705_v32 = vpop.f32.mrf.mxu3  ;;  %v1657_v46 = vadd.f32 %v1656_v53, %v4678_v60 }
 0x1c9   : > { %v1706_v48 = vadd.f32 %v1705_v32, %v1657_v46  ;;  %v1757_v24 = vpop.f32.mrf.mxu0 }
 0x1cb   : > { %v4814_v30 = vpop.f32.mrf.mxu1  ;;  %v4816_v8 = vadd.f32 %v1754_v38, %v1706_v48  ;;  %2238 = vmatmul.bf16.gmra.mxu2 %v3523_v18  ;;  %v3320_v48 = vld [vmem:[%s4548_s9 + $0x34] sm:$0xf0] }
 0x1cc   : > { %2287 = vmatmul.bf16.gmra.mxu3 %v3527_v2  ;;  %2336 = vmatmul.bf16.gmra.mxu0 %v3531_v36  ;;  %v3737_v36 = vld [vmem:[%s4548_s9 + $0x14] sm:$0xf] }
 0x1ce   : > { %2385 = vmatmul.bf16.gmra.mxu1 %v3535_v28  ;;  %v1659_v60 = vpop.f32.mrf.mxu2  ;;  %v3742_v28 = vld [vmem:[%s4548_s9 + $0x38] sm:$0xf0] }
 0x1cf   : > { %v1708_v37 = vpop.f32.mrf.mxu3  ;;  %v1660_v3 = vadd.f32 %v1659_v60, %v4687_v9  ;;  %v3563_v9 = vor.u32 %v3803_v52, %v3562_v13  ;;  %v3738_v60 = vld [vmem:[%s4548_s9 + $0x1c] sm:$0xf]  ;;  %v3323_v13 = vor.u32 %v3737_v36, %v3320_v48  ;;  %v3747_v36 = vld [vmem:[%s4548_s9 + $0x64] sm:$0xf]  ;;  %v3364_v48 = vld [vmem:[%s4548_s9 + $0x84] sm:$0xf0] }
 0x1d1   : > { %v1709_v63 = vadd.f32 %v1708_v37, %v1660_v3  ;;  %v1759_v45 = vpop.f32.mrf.mxu0  ;;  %v3328_v37 = vld [vmem:[%s4548_s9 + $0x3c] sm:$0xf0] }
 0x1d2   : > { %v3331_v52 = vor.u32 %v3738_v60, %v3328_v37  ;;  %v3370_v60 = vld [vmem:[%s4548_s9 + $0x68] sm:$0xf]  ;;  %v3752_v37 = vld [vmem:[%s4548_s9 + $0x88] sm:$0xf0] }
 0x1d3   : > { %v4819_v55 = vpop.f32.mrf.mxu1  ;;  %v4821_v26 = vadd.f32 %v1757_v24, %v1709_v63  ;;  %v3326_v24 = vld [vmem:[%s4548_s9 + $0x18] sm:$0xf] }
 0x1d6   : > { %v1661_v11 = vpop.f32.mrf.mxu2 }
 0x1d7   : > { %v1710_v23 = vpop.f32.mrf.mxu3  ;;  %v1662_v38 = vadd.f32 %v1661_v11, %v4692_v29 }
 0x1d9   : > { %v1711_v14 = vadd.f32 %v1710_v23, %v1662_v38  ;;  %v1762_v59 = vpop.f32.mrf.mxu0 }
 0x1db   : > { %v4832_v41 = vpop.f32.mrf.mxu1  ;;  %v4834_v53 = vadd.f32 %v1759_v45, %v1711_v14  ;;  %2243 = vmatmul.bf16.gmra.mxu2 %v3559_v17  ;;  %v3334_v45 = vld [vmem:[%s4548_s9 + $0x20] sm:$0xf] }
 0x1dc   : > { %2292 = vmatmul.bf16.gmra.mxu3 %v3563_v9  ;;  %2341 = vmatmul.bf16.gmra.mxu0 %v3567_v10  ;;  %v3335_v11 = vor.u32 %v3743_v40, %v3334_v45  ;;  %v3367_v40 = vor.u32 %v3747_v36, %v3364_v48  ;;  %v3406_v48 = vld [vmem:[%s4548_s9 + $0xb0] sm:$0xf] }
 0x1de   : > { %2390 = vmatmul.bf16.gmra.mxu1 %v3571_v1  ;;  %v1664_v29 = vpop.f32.mrf.mxu2 }
 0x1df   : > { %v1713_v32 = vpop.f32.mrf.mxu3  ;;  %v1665_v25 = vadd.f32 %v1664_v29, %v4701_v4  ;;  %v3327_v4 = vor.u32 %v3742_v28, %v3326_v24  ;;  %v3746_v29 = vld [vmem:[%s4548_s9 + $0x5c] sm:$0xf] }
 0x1e1   : > { %v1714_v50 = vadd.f32 %v1713_v32, %v1665_v25  ;;  %v1764_v46 = vpop.f32.mrf.mxu0  ;;  %v3356_v32 = vld [vmem:[%s4548_s9 + $0x7c] sm:$0xf0] }
 0x1e2   : > { %v3362_v25 = vld [vmem:[%s4548_s9 + $0x60] sm:$0xf] }
 0x1e3   : > { %v4837_v18 = vpop.f32.mrf.mxu1  ;;  %v4839_v2 = vadd.f32 %v1762_v59, %v1714_v50  ;;  %v3751_v50 = vld [vmem:[%s4548_s9 + $0x80] sm:$0xf0] }
 0x1e4   : > { %v3363_v45 = vor.u32 %v3751_v50, %v3362_v25  ;;  %v3756_v25 = vld [vmem:[%s4548_s9 + $0xac] sm:$0xf]  ;;  %v3400_v50 = vld [vmem:[%s4548_s9 + $0xcc] sm:$0xf0] }
 0x1e6   : > { %v1666_v3 = vpop.f32.mrf.mxu2 }
 0x1e7   : > { %v1715_v63 = vpop.f32.mrf.mxu3  ;;  %v1667_v42 = vadd.f32 %v1666_v3, %v4708_v27  ;;  %v4855_v27 = vld [vmem:[%s5025_s3] ss:$0 sm:$0xff] }
 0x1e8   : > { %v2161_v61 = vadd.f32 %v4855_v27, %v4706_v12 }
 0x1e9   : > { %v1716_v62 = vadd.f32 %v1715_v63, %v1667_v42  ;;  %v2307_v57 = vpop.f32.mrf.mxu0  ;;  %v3359_v63 = vor.u32 %v3746_v29, %v3356_v32  ;;  %v3398_v29 = vld [vmem:[%s4548_s9 + $0xa8] sm:$0xf]  ;;  %v3760_v32 = vld [vmem:[%s4548_s9 + $0xc8] sm:$0xf0] }
 0x1eb   : > { %v2356_v23 = vpop.f32.mrf.mxu1  ;;  %v4850_v20 = vadd.f32 %v1764_v46, %v1716_v62  ;;  %2404 = vmatmul.bf16.vlgmr.msra.gmra.mxu2 %v3323_v13  ;;  %v2163_v46 = vadd.f32 %v4855_v27, %v4711_v39  ;;  %v2166_v39 = vadd.f32 %v4855_v27, %v4724_v31  ;;  %v2168_v31 = vadd.f32 %v4855_v27, %v4729_v58 }
 0x1ec   : > { %2453 = vmatmul.bf16.vlgmr.msra.gmra.mxu3 %v3327_v4  ;;  %2502 = vmatmul.bf16.vlgmr.msra.gmra.mxu0 %v3331_v52  ;;  %v3371_v4 = vor.u32 %v3752_v37, %v3370_v60  ;;  %v3399_v37 = vor.u32 %v3760_v32, %v3398_v29  ;;  %v2171_v58 = vadd.f32 %v4855_v27, %v4742_v47  ;;  %v3765_v29 = vld [vmem:[%s4548_s9 + $0xf4] sm:$0xf]  ;;  %v3436_v32 = vld [vmem:[%s4548_s9 + $0x114] sm:$0xf0] }
 0x1ed   : > { %v2173_v47 = vadd.f32 %v4855_v27, %v4747_v16  ;;  %v2176_v16 = vadd.f32 %v4855_v27, %v4760_v49  ;;  %v2178_v49 = vadd.f32 %v4855_v27, %v4765_v15  ;;  %v2181_v15 = vadd.f32 %v4855_v27, %v4778_v43 }
 0x1ee   : > { %2551 = vmatmul.bf16.vlgmr.msra.gmra.mxu1 %v3335_v11  ;;  %v2209_v38 = vpop.f32.mrf.mxu2  ;;  %v2183_v43 = vadd.f32 %v4855_v27, %v4783_v22  ;;  %v2186_v22 = vadd.f32 %v4855_v27, %v4796_v19  ;;  %v2188_v19 = vadd.f32 %v4855_v27, %v4801_v21  ;;  %v2191_v21 = vadd.f32 %v4855_v27, %v4814_v30 }
 0x1ef   : > { %v2258_v17 = vpop.f32.mrf.mxu3  ;;  %v2210_v9 = vadd.f32 %v2209_v38, %v2161_v61  ;;  %v2193_v30 = vadd.f32 %v4855_v27, %v4819_v55  ;;  %v2196_v55 = vadd.f32 %v4855_v27, %v4832_v41 }
 0x1f1   : > { %v2259_v10 = vadd.f32 %v2258_v17, %v2210_v9  ;;  %v2309_v14 = vpop.f32.mrf.mxu0 }
 0x1f3   : > { %v2358_v59 = vpop.f32.mrf.mxu1  ;;  %v2308_v1 = vadd.f32 %v2307_v57, %v2259_v10 }
 0x1f5   : > { %v4867_v12 = vadd.f32 %v2356_v23, %v2308_v1  ;;  %v3392_v1 = vld [vmem:[%s4548_s9 + $0xc4] sm:$0xf0] }
 0x1f6   : > { %v2211_v24 = vpop.f32.mrf.mxu2 }
 0x1f7   : > { %v2260_v28 = vpop.f32.mrf.mxu3  ;;  %v2212_v3 = vadd.f32 %v2211_v24, %v2163_v46  ;;  %v3761_v24 = vld [vmem:[%s4548_s9 + $0xd0] sm:$0xf0] }
 0x1f9   : > { %v2261_v42 = vadd.f32 %v2260_v28, %v2212_v3  ;;  %v2312_v13 = vpop.f32.mrf.mxu0  ;;  %v3403_v3 = vor.u32 %v3756_v25, %v3400_v50  ;;  %v3442_v50 = vld [vmem:[%s4548_s9 + $0xf8] sm:$0xf] }
 0x1fb   : > { %v2361_v52 = vpop.f32.mrf.mxu1  ;;  %v2310_v62 = vadd.f32 %v2309_v14, %v2261_v42  ;;  %2409 = vmatmul.bf16.gmra.mxu2 %v3359_v63  ;;  %v3755_v14 = vld [vmem:[%s4548_s9 + $0xa4] sm:$0xf] }
 0x1fc   : > { %2458 = vmatmul.bf16.gmra.mxu3 %v3363_v45  ;;  %2507 = vmatmul.bf16.gmra.mxu0 %v3367_v40  ;;  %v3395_v60 = vor.u32 %v3755_v14, %v3392_v1  ;;  %v3407_v40 = vor.u32 %v3761_v24, %v3406_v48  ;;  %v3434_v14 = vld [vmem:[%s4548_s9 + $0xf0] sm:$0xf]  ;;  %v3769_v1 = vld [vmem:[%s4548_s9 + $0x110] sm:$0xf0] }
 0x1fd   : > { %v4873_v57 = vadd.f32 %v2358_v59, %v2310_v62  ;;  %v3435_v24 = vor.u32 %v3769_v1, %v3434_v14  ;;  %v3774_v14 = vld [vmem:[%s4548_s9 + $0x13c] sm:$0xf]  ;;  %v3472_v1 = vld [vmem:[%s4548_s9 + $0x15c] sm:$0xf0] }
 0x1fe   : > { %2556 = vmatmul.bf16.gmra.mxu1 %v3371_v4  ;;  %v2214_v11 = vpop.f32.mrf.mxu2 }
 0x1ff   : > { %v2263_v23 = vpop.f32.mrf.mxu3  ;;  %v2215_v61 = vadd.f32 %v2214_v11, %v2166_v39 }
 0x201   : > { %v2264_v38 = vadd.f32 %v2263_v23, %v2215_v61  ;;  %v2314_v17 = vpop.f32.mrf.mxu0 }
 0x203   : > { %v2363_v9 = vpop.f32.mrf.mxu1  ;;  %v2313_v10 = vadd.f32 %v2312_v13, %v2264_v38 }
 0x205   : > { %v4883_v59 = vadd.f32 %v2361_v52, %v2313_v10  ;;  %v3428_v10 = vld [vmem:[%s4548_s9 + $0x10c] sm:$0xf0] }
 0x206   : > { %v2216_v46 = vpop.f32.mrf.mxu2 }
 0x207   : > { %v2265_v36 = vpop.f32.mrf.mxu3  ;;  %v2217_v28 = vadd.f32 %v2216_v46, %v2168_v31  ;;  %v3770_v46 = vld [vmem:[%s4548_s9 + $0x118] sm:$0xf0] }
 0x209   : > { %v2266_v63 = vadd.f32 %v2265_v36, %v2217_v28  ;;  %v2317_v45 = vpop.f32.mrf.mxu0  ;;  %v3439_v28 = vor.u32 %v3765_v29, %v3436_v32  ;;  %v3478_v32 = vld [vmem:[%s4548_s9 + $0x140] sm:$0xf] }
 0x20b   : > { %v2366_v42 = vpop.f32.mrf.mxu1  ;;  %v2315_v13 = vadd.f32 %v2314_v17, %v2266_v63  ;;  %2414 = vmatmul.bf16.gmra.mxu2 %v3395_v60  ;;  %v3764_v17 = vld [vmem:[%s4548_s9 + $0xec] sm:$0xf] }
 0x20c   : > { %2463 = vmatmul.bf16.gmra.mxu3 %v3399_v37  ;;  %2512 = vmatmul.bf16.gmra.mxu0 %v3403_v3  ;;  %v3431_v48 = vor.u32 %v3764_v17, %v3428_v10  ;;  %v3443_v3 = vor.u32 %v3770_v46, %v3442_v50  ;;  %v3470_v17 = vld [vmem:[%s4548_s9 + $0x138] sm:$0xf]  ;;  %v3778_v10 = vld [vmem:[%s4548_s9 + $0x158] sm:$0xf0] }
 0x20d   : > { %v4889_v4 = vadd.f32 %v2363_v9, %v2315_v13  ;;  %v3471_v46 = vor.u32 %v3778_v10, %v3470_v17  ;;  %v3783_v17 = vld [vmem:[%s4548_s9 + $0x184] sm:$0xf]  ;;  %v3508_v10 = vld [vmem:[%s4548_s9 + $0x1a4] sm:$0xf0] }
 0x20e   : > { %2561 = vmatmul.bf16.gmra.mxu1 %v3407_v40  ;;  %v2219_v52 = vpop.f32.mrf.mxu2 }
 0x20f   : > { %v2268_v62 = vpop.f32.mrf.mxu3  ;;  %v2220_v39 = vadd.f32 %v2219_v52, %v2171_v58 }
 0x211   : > { %v2269_v11 = vadd.f32 %v2268_v62, %v2220_v39  ;;  %v2319_v23 = vpop.f32.mrf.mxu0 }
 0x213   : > { %v2368_v61 = vpop.f32.mrf.mxu1  ;;  %v2318_v38 = vadd.f32 %v2317_v45, %v2269_v11 }
 0x215   : > { %v4899_v9 = vadd.f32 %v2366_v42, %v2318_v38  ;;  %v3464_v38 = vld [vmem:[%s4548_s9 + $0x154] sm:$0xf0] }
 0x216   : > { %v2221_v31 = vpop.f32.mrf.mxu2 }
 0x217   : > { %v2270_v25 = vpop.f32.mrf.mxu3  ;;  %v2222_v36 = vadd.f32 %v2221_v31, %v2173_v47  ;;  %v3779_v31 = vld [vmem:[%s4548_s9 + $0x160] sm:$0xf0] }
 0x219   : > { %v2271_v60 = vadd.f32 %v2270_v25, %v2222_v36  ;;  %v2322_v37 = vpop.f32.mrf.mxu0  ;;  %v3475_v36 = vor.u32 %v3774_v14, %v3472_v1  ;;  %v3514_v1 = vld [vmem:[%s4548_s9 + $0x188] sm:$0xf] }
 0x21b   : > { %v2371_v63 = vpop.f32.mrf.mxu1  ;;  %v2320_v45 = vadd.f32 %v2319_v23, %v2271_v60  ;;  %2419 = vmatmul.bf16.gmra.mxu2 %v3431_v48  ;;  %v3773_v23 = vld [vmem:[%s4548_s9 + $0x134] sm:$0xf] }
 0x21c   : > { %2468 = vmatmul.bf16.gmra.mxu3 %v3435_v24  ;;  %2517 = vmatmul.bf16.gmra.mxu0 %v3439_v28  ;;  %v3467_v50 = vor.u32 %v3773_v23, %v3464_v38  ;;  %v3479_v28 = vor.u32 %v3779_v31, %v3478_v32  ;;  %v3506_v23 = vld [vmem:[%s4548_s9 + $0x180] sm:$0xf]  ;;  %v3787_v38 = vld [vmem:[%s4548_s9 + $0x1a0] sm:$0xf0] }
 0x21d   : > { %v4905_v40 = vadd.f32 %v2368_v61, %v2320_v45  ;;  %v3507_v31 = vor.u32 %v3787_v38, %v3506_v23  ;;  %v3792_v23 = vld [vmem:[%s4548_s9 + $0x1cc] sm:$0xf]  ;;  %v3544_v38 = vld [vmem:[%s4548_s9 + $0x1ec] sm:$0xf0] }
 0x21e   : > { %2566 = vmatmul.bf16.gmra.mxu1 %v3443_v3  ;;  %v2224_v42 = vpop.f32.mrf.mxu2 }
 0x21f   : > { %v2273_v13 = vpop.f32.mrf.mxu3  ;;  %v2225_v58 = vadd.f32 %v2224_v42, %v2176_v16 }
 0x221   : > { %v2274_v52 = vadd.f32 %v2273_v13, %v2225_v58  ;;  %v2324_v62 = vpop.f32.mrf.mxu0 }
 0x223   : > { %v2373_v39 = vpop.f32.mrf.mxu1  ;;  %v2323_v11 = vadd.f32 %v2322_v37, %v2274_v52 }
 0x225   : > { %v4915_v61 = vadd.f32 %v2371_v63, %v2323_v11  ;;  %v3500_v11 = vld [vmem:[%s4548_s9 + $0x19c] sm:$0xf0] }
 0x226   : > { %v2226_v47 = vpop.f32.mrf.mxu2 }
 0x227   : > { %v2275_v29 = vpop.f32.mrf.mxu3  ;;  %v2227_v25 = vadd.f32 %v2226_v47, %v2178_v49  ;;  %v3788_v47 = vld [vmem:[%s4548_s9 + $0x1a8] sm:$0xf0] }
 0x229   : > { %v2276_v48 = vadd.f32 %v2275_v29, %v2227_v25  ;;  %v2327_v24 = vpop.f32.mrf.mxu0  ;;  %v3511_v25 = vor.u32 %v3783_v17, %v3508_v10  ;;  %v3550_v10 = vld [vmem:[%s4548_s9 + $0x1d0] sm:$0xf] }
 0x22b   : > { %v2376_v60 = vpop.f32.mrf.mxu1  ;;  %v2325_v37 = vadd.f32 %v2324_v62, %v2276_v48  ;;  %2424 = vmatmul.bf16.gmra.mxu2 %v3467_v50  ;;  %v3782_v62 = vld [vmem:[%s4548_s9 + $0x17c] sm:$0xf] }
 0x22c   : > { %2473 = vmatmul.bf16.gmra.mxu3 %v3471_v46  ;;  %2522 = vmatmul.bf16.gmra.mxu0 %v3475_v36  ;;  %v3503_v32 = vor.u32 %v3782_v62, %v3500_v11  ;;  %v3515_v36 = vor.u32 %v3788_v47, %v3514_v1  ;;  %v3542_v62 = vld [vmem:[%s4548_s9 + $0x1c8] sm:$0xf]  ;;  %v3796_v11 = vld [vmem:[%s4548_s9 + $0x1e8] sm:$0xf0] }
 0x22d   : > { %v4921_v3 = vadd.f32 %v2373_v39, %v2325_v37  ;;  %v3543_v47 = vor.u32 %v3796_v11, %v3542_v62  ;;  %v3801_v62 = vld [vmem:[%s4548_s9 + $0x214] sm:$0xf]  ;;  %v3580_v11 = vld [vmem:[%s4548_s9 + $0x234] sm:$0xf0] }
 0x22e   : > { %2571 = vmatmul.bf16.gmra.mxu1 %v3479_v28  ;;  %v2229_v63 = vpop.f32.mrf.mxu2 }
 0x22f   : > { %v2278_v45 = vpop.f32.mrf.mxu3  ;;  %v2230_v16 = vadd.f32 %v2229_v63, %v2181_v15 }
 0x231   : > { %v2279_v42 = vadd.f32 %v2278_v45, %v2230_v16  ;;  %v2329_v13 = vpop.f32.mrf.mxu0 }
 0x233   : > { %v2378_v58 = vpop.f32.mrf.mxu1  ;;  %v2328_v52 = vadd.f32 %v2327_v24, %v2279_v42 }
 0x235   : > { %v4931_v39 = vadd.f32 %v2376_v60, %v2328_v52  ;;  %v3536_v52 = vld [vmem:[%s4548_s9 + $0x1e4] sm:$0xf0] }
 0x236   : > { %v2231_v49 = vpop.f32.mrf.mxu2 }
 0x237   : > { %v2280_v14 = vpop.f32.mrf.mxu3  ;;  %v2232_v29 = vadd.f32 %v2231_v49, %v2183_v43  ;;  %v3797_v49 = vld [vmem:[%s4548_s9 + $0x1f0] sm:$0xf0] }
 0x239   : > { %v2281_v50 = vadd.f32 %v2280_v14, %v2232_v29  ;;  %v2332_v46 = vpop.f32.mrf.mxu0  ;;  %v3547_v29 = vor.u32 %v3792_v23, %v3544_v38  ;;  %v3586_v38 = vld [vmem:[%s4548_s9 + $0x218] sm:$0xf] }
 0x23b   : > { %v2381_v48 = vpop.f32.mrf.mxu1  ;;  %v2330_v24 = vadd.f32 %v2329_v13, %v2281_v50  ;;  %2429 = vmatmul.bf16.gmra.mxu2 %v3503_v32  ;;  %v3791_v13 = vld [vmem:[%s4548_s9 + $0x1c4] sm:$0xf] }
 0x23c   : > { %2478 = vmatmul.bf16.gmra.mxu3 %v3507_v31  ;;  %2527 = vmatmul.bf16.gmra.mxu0 %v3511_v25  ;;  %v3539_v1 = vor.u32 %v3791_v13, %v3536_v52  ;;  %v3551_v25 = vor.u32 %v3797_v49, %v3550_v10  ;;  %v3578_v13 = vld [vmem:[%s4548_s9 + $0x210] sm:$0xf]  ;;  %v3805_v52 = vld [vmem:[%s4548_s9 + $0x230] sm:$0xf0] }
 0x23d   : > { %v4937_v28 = vadd.f32 %v2378_v58, %v2330_v24  ;;  %v3579_v49 = vor.u32 %v3805_v52, %v3578_v13 }
 0x23e   : > { %2576 = vmatmul.bf16.gmra.mxu1 %v3515_v36  ;;  %v2234_v60 = vpop.f32.mrf.mxu2 }
 0x23f   : > { %v2283_v37 = vpop.f32.mrf.mxu3  ;;  %v2235_v15 = vadd.f32 %v2234_v60, %v2186_v22 }
 0x241   : > { %v2284_v63 = vadd.f32 %v2283_v37, %v2235_v15  ;;  %v2334_v45 = vpop.f32.mrf.mxu0 }
 0x243   : > { %v2383_v16 = vpop.f32.mrf.mxu1  ;;  %v2333_v42 = vadd.f32 %v2332_v46, %v2284_v63 }
 0x245   : > { %v4947_v58 = vadd.f32 %v2381_v48, %v2333_v42  ;;  %v3572_v42 = vld [vmem:[%s4548_s9 + $0x22c] sm:$0xf0] }
 0x246   : > { %v2236_v43 = vpop.f32.mrf.mxu2 }
 0x247   : > { %v2285_v17 = vpop.f32.mrf.mxu3  ;;  %v2237_v14 = vadd.f32 %v2236_v43, %v2188_v19  ;;  %v3806_v43 = vld [vmem:[%s4548_s9 + $0x238] sm:$0xf0] }
 0x249   : > { %v2286_v32 = vadd.f32 %v2285_v17, %v2237_v14  ;;  %v2337_v31 = vpop.f32.mrf.mxu0  ;;  %v3583_v14 = vor.u32 %v3801_v62, %v3580_v11 }
 0x24b   : > { %v2386_v50 = vpop.f32.mrf.mxu1  ;;  %v2335_v46 = vadd.f32 %v2334_v45, %v2286_v32  ;;  %2434 = vmatmul.bf16.gmra.mxu2 %v3539_v1  ;;  %v3800_v45 = vld [vmem:[%s4548_s9 + $0x20c] sm:$0xf] }
 0x24c   : > { %2483 = vmatmul.bf16.gmra.mxu3 %v3543_v47  ;;  %2532 = vmatmul.bf16.gmra.mxu0 %v3547_v29  ;;  %v3575_v10 = vor.u32 %v3800_v45, %v3572_v42  ;;  %v3587_v29 = vor.u32 %v3806_v43, %v3586_v38 }
 0x24d   : > { %v4953_v36 = vadd.f32 %v2383_v16, %v2335_v46 }
 0x24e   : > { %2581 = vmatmul.bf16.gmra.mxu1 %v3551_v25  ;;  %v2239_v48 = vpop.f32.mrf.mxu2 }
 0x24f   : > { %v2288_v24 = vpop.f32.mrf.mxu3  ;;  %v2240_v22 = vadd.f32 %v2239_v48, %v2191_v21 }
 0x251   : > { %v2289_v60 = vadd.f32 %v2288_v24, %v2240_v22  ;;  %v2339_v37 = vpop.f32.mrf.mxu0 }
 0x253   : > { %v2388_v15 = vpop.f32.mrf.mxu1  ;;  %v2338_v63 = vadd.f32 %v2337_v31, %v2289_v60 }
 0x255   : > { %v4963_v16 = vadd.f32 %v2386_v50, %v2338_v63  ;;  %v2198_v63 = vadd.f32 %v4855_v27, %v4837_v18 }
 0x256   : > { %v2241_v19 = vpop.f32.mrf.mxu2 }
 0x257   : > { %v2290_v23 = vpop.f32.mrf.mxu3  ;;  %v2242_v17 = vadd.f32 %v2241_v19, %v2193_v30 }
 0x259   : > { %v2291_v1 = vadd.f32 %v2290_v23, %v2242_v17  ;;  %v2342_v47 = vpop.f32.mrf.mxu0 }
 0x25b   : > { %v2391_v32 = vpop.f32.mrf.mxu1  ;;  %v2340_v31 = vadd.f32 %v2339_v37, %v2291_v1  ;;  %2439 = vmatmul.bf16.gmra.mxu2 %v3575_v10 }
 0x25c   : > { %2488 = vmatmul.bf16.gmra.mxu3 %v3579_v49  ;;  %2537 = vmatmul.bf16.gmra.mxu0 %v3583_v14  ;;  %v1767_v14 = vmax.f32 %v4713_v5, 0.0 }
 0x25d   : > { %v4969_v25 = vadd.f32 %v2388_v15, %v2340_v31 }
 0x25e   : > { %2586 = vmatmul.bf16.gmra.mxu1 %v3587_v29  ;;  %v2244_v50 = vpop.f32.mrf.mxu2 }
 0x25f   : > { %v2293_v46 = vpop.f32.mrf.mxu3  ;;  %v2245_v21 = vadd.f32 %v2244_v50, %v2196_v55 }
 0x261   : > { %v2294_v48 = vadd.f32 %v2293_v46, %v2245_v21  ;;  %v2344_v24 = vpop.f32.mrf.mxu0 }
 0x263   : > { %v2393_v22 = vpop.f32.mrf.mxu1  ;;  %v2343_v60 = vadd.f32 %v2342_v47, %v2294_v48  ;;  %v1768_v48 = vmax.f32 %v4726_v54, 0.0 }
 0x265   : > { %v4973_v37 = vadd.f32 %v2391_v32, %v2343_v60 }
 0x266   : > { %v2246_v45 = vpop.f32.mrf.mxu2 }
 0x267   : > { %v2295_v42 = vpop.f32.mrf.mxu3  ;;  %v2247_v13 = vadd.f32 %v2246_v45, %v2198_v63 }
 0x269   : > { %v2296_v52 = vadd.f32 %v2295_v42, %v2247_v13  ;;  %v2503_v41 = vpop.f32.mrf.mxu0 }
 0x26b   : > { %v2552_v30 = vpop.f32.mrf.mxu1  ;;  %v2345_v15 = vadd.f32 %v2344_v24, %v2296_v52 }
 0x26d   : > { %v4975_v62 = vadd.f32 %v2393_v22, %v2345_v15 }
 0x26e   : > { %v2405_v11 = vpop.f32.mrf.mxu2 }
 0x26f   : > { %v2454_v19 = vpop.f32.mrf.mxu3  ;;  %v2406_v23 = vadd.f32 %v2405_v11, %v4867_v12 }
 0x271   : > { %v2455_v38 = vadd.f32 %v2454_v19, %v2406_v23  ;;  %v2505_v43 = vpop.f32.mrf.mxu0 }
 0x273   : > { %v2554_v17 = vpop.f32.mrf.mxu1  ;;  %v2504_v10 = vadd.f32 %v2503_v41, %v2455_v38 }
 0x275   : > { %v2553_v18 = vadd.f32 %v2552_v30, %v2504_v10  ;;  %v1769_v30 = vmax.f32 %v4731_v34, 0.0 }
 0x276   : > { %v2407_v27 = vpop.f32.mrf.mxu2 }
 0x277   : > { %v2456_v49 = vpop.f32.mrf.mxu3  ;;  %v2592_v1 = vmax.f32 %v2553_v18, 0.0  ;;  %v2408_v47 = vadd.f32 %v2407_v27, %v4873_v57  ;;  %v1770_v18 = vmax.f32 %v4744_v7, 0.0 }
 0x279   : > { %v2608_v29 = vmax.f32 %v1767_v14, %v2592_v1  ;;  %v2457_v32 = vadd.f32 %v2456_v49, %v2408_v47  ;;  %v2508_v31 = vpop.f32.mrf.mxu0 }
 0x27b   : > { %v2557_v55 = vpop.f32.mrf.mxu1  ;;  %v2506_v50 = vadd.f32 %v2505_v43, %v2457_v32 }
 0x27d   : > { %v2555_v46 = vadd.f32 %v2554_v17, %v2506_v50  ;;  %v1771_v50 = vmax.f32 %v4749_v0, 0.0 }
 0x27e   : > { %v2410_v21 = vpop.f32.mrf.mxu2 }
 0x27f   : > { %v2459_v12 = vpop.f32.mrf.mxu3  ;;  %v2593_v24 = vmax.f32 %v2555_v46, 0.0  ;;  %v2411_v22 = vadd.f32 %v2410_v21, %v4883_v59 }
 0x281   : > { %v2609_v60 = vmax.f32 %v1768_v48, %v2593_v24  ;;  %v2460_v63 = vadd.f32 %v2459_v12, %v2411_v22  ;;  %v2510_v45 = vpop.f32.mrf.mxu0 }
 0x283   : > { %v2559_v5 = vpop.f32.mrf.mxu1  ;;  %v2624_v42 = vmax.f32 %v2608_v29, %v2609_v60  ;;  %v2509_v13 = vadd.f32 %v2508_v31, %v2460_v63 }
 0x285   : > { %v2558_v57 = vadd.f32 %v2557_v55, %v2509_v13 }
 0x286   : > { %v2412_v52 = vpop.f32.mrf.mxu2 }
 0x287   : > { %v2461_v41 = vpop.f32.mrf.mxu3  ;;  %v2594_v15 = vmax.f32 %v2558_v57, 0.0  ;;  %v2413_v11 = vadd.f32 %v2412_v52, %v4889_v4 }
 0x289   : > { %v2610_v19 = vmax.f32 %v1769_v30, %v2594_v15  ;;  %v2462_v54 = vadd.f32 %v2461_v41, %v2413_v11  ;;  %v2513_v23 = vpop.f32.mrf.mxu0 }
 0x28b   : > { %v2562_v38 = vpop.f32.mrf.mxu1  ;;  %v2511_v59 = vadd.f32 %v2510_v45, %v2462_v54  ;;  %v1773_v54 = vmax.f32 %v4767_v6, 0.0 }
 0x28d   : > { %v2560_v43 = vadd.f32 %v2559_v5, %v2511_v59  ;;  %v1772_v5 = vmax.f32 %v4762_v56, 0.0 }
 0x28e   : > { %v2415_v17 = vpop.f32.mrf.mxu2 }
 0x28f   : > { %v2464_v10 = vpop.f32.mrf.mxu3  ;;  %v2595_v27 = vmax.f32 %v2560_v43, 0.0  ;;  %v2416_v49 = vadd.f32 %v2415_v17, %v4899_v9 }
 0x291   : > { %v2611_v14 = vmax.f32 %v1770_v18, %v2595_v27  ;;  %v2465_v1 = vadd.f32 %v2464_v10, %v2416_v49  ;;  %v2515_v34 = vpop.f32.mrf.mxu0  ;;  %v1774_v49 = vmax.f32 %v4780_v44, 0.0 }
 0x293   : > { %v2564_v47 = vpop.f32.mrf.mxu1  ;;  %v2625_v29 = vmax.f32 %v2610_v19, %v2611_v14  ;;  %v2514_v4 = vadd.f32 %v2513_v23, %v2465_v1 }
 0x295   : > { %v3810_v32 = vpack.c.bf16 %v2625_v29, %v2624_v42  ;;  %v2563_v31 = vadd.f32 %v2562_v38, %v2514_v4 }
 0x296   : > { %v2417_v55 = vpop.f32.mrf.mxu2 }
 0x297   : > { %v2466_v7 = vpop.f32.mrf.mxu3  ;;  %3811 = vst [vmem:[%s4990_s13] sm:$0xff] %v3810_v32   ;;  %v2596_v9 = vmax.f32 %v2563_v31, 0.0  ;;  %v2418_v46 = vadd.f32 %v2417_v55, %v4905_v40 }
 0x299   : > { %v2612_v21 = vmax.f32 %v1771_v50, %v2596_v9  ;;  %v2467_v12 = vadd.f32 %v2466_v7, %v2418_v46  ;;  %v2518_v48 = vpop.f32.mrf.mxu0  ;;  %v1775_v50 = vmax.f32 %v4785_v33, 0.0 }
 0x29b   : > { %v2567_v24 = vpop.f32.mrf.mxu1  ;;  %v2516_v22 = vadd.f32 %v2515_v34, %v2467_v12 }
 0x29d   : > { %v2565_v60 = vadd.f32 %v2564_v47, %v2516_v22 }
 0x29e   : > { %v2420_v63 = vpop.f32.mrf.mxu2 }
 0x29f   : > { %v2469_v45 = vpop.f32.mrf.mxu3  ;;  %v2597_v42 = vmax.f32 %v2565_v60, 0.0  ;;  %v2421_v13 = vadd.f32 %v2420_v63, %v4915_v61  ;;  %v1776_v63 = vmax.f32 %v4798_v51, 0.0 }
 0x2a1   : > { %v2613_v57 = vmax.f32 %v1772_v5, %v2597_v42  ;;  %v2470_v52 = vadd.f32 %v2469_v45, %v2421_v13  ;;  %v2520_v0 = vpop.f32.mrf.mxu0 }
 0x2a3   : > { %v2569_v41 = vpop.f32.mrf.mxu1  ;;  %v2626_v30 = vmax.f32 %v2612_v21, %v2613_v57  ;;  %v2519_v15 = vadd.f32 %v2518_v48, %v2470_v52 }
 0x2a5   : > { %v2568_v40 = vadd.f32 %v2567_v24, %v2519_v15  ;;  %v1777_v15 = vmax.f32 %v4803_v35, 0.0 }
 0x2a6   : > { %v2422_v11 = vpop.f32.mrf.mxu2 }
 0x2a7   : > { %v2471_v19 = vpop.f32.mrf.mxu3  ;;  %v2598_v23 = vmax.f32 %v2568_v40, 0.0  ;;  %v2423_v38 = vadd.f32 %v2422_v11, %v4921_v3 }
 0x2a9   : > { %v2614_v59 = vmax.f32 %v1773_v54, %v2598_v23  ;;  %v2472_v43 = vadd.f32 %v2471_v19, %v2423_v38  ;;  %v2523_v56 = vpop.f32.mrf.mxu0 }
 0x2ab   : > { %v2572_v17 = vpop.f32.mrf.mxu1  ;;  %v2521_v10 = vadd.f32 %v2520_v0, %v2472_v43 }
 0x2ad   : > { %v2570_v61 = vadd.f32 %v2569_v41, %v2521_v10 }
 0x2ae   : > { %v2425_v18 = vpop.f32.mrf.mxu2 }
 0x2af   : > { %v2474_v27 = vpop.f32.mrf.mxu3  ;;  %v2599_v14 = vmax.f32 %v2570_v61, 0.0  ;;  %v2426_v1 = vadd.f32 %v2425_v18, %v4931_v39 }
 0x2b1   : > { %v2615_v34 = vmax.f32 %v1774_v49, %v2599_v14  ;;  %v2475_v47 = vadd.f32 %v2474_v27, %v2426_v1  ;;  %v2525_v6 = vpop.f32.mrf.mxu0 }
 0x2b3   : > { %v2574_v29 = vpop.f32.mrf.mxu1  ;;  %v2627_v4 = vmax.f32 %v2614_v59, %v2615_v34  ;;  %v2524_v3 = vadd.f32 %v2523_v56, %v2475_v47  ;;  %v1778_v56 = vmax.f32 %v4816_v8, 0.0  ;;  %v1779_v47 = vmax.f32 %v4821_v26, 0.0 }
 0x2b5   : > { %v3815_v32 = vpack.c.bf16 %v2627_v4, %v2626_v30  ;;  %v2573_v31 = vadd.f32 %v2572_v17, %v2524_v3 }
 0x2b6   : > { %v2427_v55 = vpop.f32.mrf.mxu2 }
 0x2b7   : > { %v2476_v7 = vpop.f32.mrf.mxu3  ;;  %3827 = vst [vmem:[%s4990_s13 + $0x8] sm:$0xff] %v3815_v32   ;;  %v2600_v9 = vmax.f32 %v2573_v31, 0.0  ;;  %v2428_v46 = vadd.f32 %v2427_v55, %v4937_v28 }
 0x2b9   : > { %v2616_v44 = vmax.f32 %v1775_v50, %v2600_v9  ;;  %v2477_v21 = vadd.f32 %v2476_v7, %v2428_v46  ;;  %v2528_v12 = vpop.f32.mrf.mxu0  ;;  %v1780_v7 = vmax.f32 %v4834_v53, 0.0 }
 0x2bb   : > { %v2577_v39 = vpop.f32.mrf.mxu1  ;;  %v2526_v48 = vadd.f32 %v2525_v6, %v2477_v21 }
 0x2bd   : > { %v2575_v24 = vadd.f32 %v2574_v29, %v2526_v48 }
 0x2be   : > { %v2430_v22 = vpop.f32.mrf.mxu2 }
 0x2bf   : > { %v2479_v60 = vpop.f32.mrf.mxu3  ;;  %v2601_v45 = vmax.f32 %v2575_v24, 0.0  ;;  %v2431_v5 = vadd.f32 %v2430_v22, %v4947_v58  ;;  %v1781_v24 = vmax.f32 %v4839_v2, 0.0 }
 0x2c1   : > { %v2617_v42 = vmax.f32 %v1776_v63, %v2601_v45  ;;  %v2480_v13 = vadd.f32 %v2479_v60, %v2431_v5  ;;  %v2530_v33 = vpop.f32.mrf.mxu0 }
 0x2c3   : > { %v2628_v57 = vmax.f32 %v2616_v44, %v2617_v42  ;;  %v2529_v52 = vadd.f32 %v2528_v12, %v2480_v13  ;;  %v2579_v0 = vpop.f32.mrf.mxu1 }
 0x2c5   : > { %v2578_v28 = vadd.f32 %v2577_v39, %v2529_v52 }
 0x2c6   : > { %v2432_v41 = vpop.f32.mrf.mxu2 }
 0x2c7   : > { %v2481_v30 = vpop.f32.mrf.mxu3  ;;  %v2602_v40 = vmax.f32 %v2578_v28, 0.0  ;;  %v2433_v11 = vadd.f32 %v2432_v41, %v4953_v36 }
 0x2c9   : > { %v2618_v19 = vmax.f32 %v1777_v15, %v2602_v40  ;;  %v2482_v54 = vadd.f32 %v2481_v30, %v2433_v11  ;;  %v2533_v23 = vpop.f32.mrf.mxu0 }
 0x2cb   : > { %v2531_v51 = vadd.f32 %v2530_v33, %v2482_v54  ;;  %v2582_v58 = vpop.f32.mrf.mxu1  ;;  %v1782_v33 = vmax.f32 %v4850_v20, 0.0 }
 0x2cd   : > { %v2580_v38 = vadd.f32 %v2579_v0, %v2531_v51 }
 0x2ce   : > { %v2435_v59 = vpop.f32.mrf.mxu2 }
 0x2cf   : > { %v2484_v43 = vpop.f32.mrf.mxu3  ;;  %v2603_v17 = vmax.f32 %v2580_v38, 0.0  ;;  %v2436_v10 = vadd.f32 %v2435_v59, %v4963_v16 }
 0x2d1   : > { %v2619_v61 = vmax.f32 %v1778_v56, %v2603_v17  ;;  %v2485_v18 = vadd.f32 %v2484_v43, %v2436_v10  ;;  %v2535_v14 = vpop.f32.mrf.mxu0 }
 0x2d3   : > { %v2629_v35 = vmax.f32 %v2618_v19, %v2619_v61  ;;  %v2534_v27 = vadd.f32 %v2533_v23, %v2485_v18  ;;  %v2584_v4 = vpop.f32.mrf.mxu1 }
 0x2d5   : > { %v3820_v49 = vpack.c.bf16 %v2629_v35, %v2628_v57  ;;  %v2583_v36 = vadd.f32 %v2582_v58, %v2534_v27 }
 0x2d6   : > { %v2437_v1 = vpop.f32.mrf.mxu2 }
 0x2d7   : > { %v2486_v34 = vpop.f32.mrf.mxu3  ;;  %3828 = vst [vmem:[%s4990_s13 + $0x10] sm:$0xff] %v3820_v49   ;;  %v2604_v6 = vmax.f32 %v2583_v36, 0.0  ;;  %v2438_v29 = vadd.f32 %v2437_v1, %v4969_v25 }
 0x2d9   : > { %v2620_v8 = vmax.f32 %v1779_v47, %v2604_v6  ;;  %v2487_v3 = vadd.f32 %v2486_v34, %v2438_v29  ;;  %v2538_v46 = vpop.f32.mrf.mxu0 }
 0x2db   : > { %v2536_v32 = vadd.f32 %v2535_v14, %v2487_v3  ;;  %v2587_v26 = vpop.f32.mrf.mxu1 }
 0x2dd   : > { %v2585_v16 = vadd.f32 %v2584_v4, %v2536_v32 }
 0x2de   : > { %v2440_v31 = vpop.f32.mrf.mxu2 }
 0x2df   : > { %v2489_v55 = vpop.f32.mrf.mxu3  ;;  %v2605_v50 = vmax.f32 %v2585_v16, 0.0  ;;  %v2441_v9 = vadd.f32 %v2440_v31, %v4973_v37 }
 0x2e1   : > { %v2621_v44 = vmax.f32 %v1780_v7, %v2605_v50  ;;  %v2490_v21 = vadd.f32 %v2489_v55, %v2441_v9  ;;  %v2540_v5 = vpop.f32.mrf.mxu0 }
 0x2e3   : > { %v2630_v12 = vmax.f32 %v2620_v8, %v2621_v44  ;;  %v2539_v39 = vadd.f32 %v2538_v46, %v2490_v21  ;;  %v2589_v37 = vpop.f32.mrf.mxu1 }
 0x2e5   : > { %v2588_v48 = vadd.f32 %v2587_v26, %v2539_v39 }
 0x2e6   : > { %v2442_v25 = vpop.f32.mrf.mxu2 }
 0x2e7   : > { %v2606_v22 = vmax.f32 %v2588_v48, 0.0  ;;  %v2443_v60 = vadd.f32 %v2442_v25, %v4975_v62  ;;  %v2491_v63 = vpop.f32.mrf.mxu3 }
 0x2e9   : > { %v2622_v45 = vmax.f32 %v1781_v24, %v2606_v22  ;;  %v2492_v53 = vadd.f32 %v2491_v63, %v2443_v60 }
 0x2eb   : > { %v2541_v42 = vadd.f32 %v2540_v5, %v2492_v53 }
 0x2ed   : > { %v2590_v13 = vadd.f32 %v2589_v37, %v2541_v42 }
 0x2ef   : > { %v2607_v57 = vmax.f32 %v2590_v13, 0.0 }
 0x2f1   : > { %v2623_v52 = vmax.f32 %v1782_v33, %v2607_v57 }
 0x2f3   : > { %v2631_v0 = vmax.f32 %v2622_v45, %v2623_v52 }
 0x2f5   : > { %v3825_v28 = vpack.c.bf16 %v2631_v0, %v2630_v12 }
 0x2f7   : > { %3829 = vst [vmem:[%s4990_s13 + $0x18] sm:$0xff] %v3825_v28  }
 0x2f8 PF: > { %s14_s15 = sadd.s32 1, %s3863_s15  }
 0x2f9   : > { %p11_p4 = scmp.ge.s32.totalorder %s14_s15, 4  }
 0x2fb   :  { %13 = sbr.rel (!%p11_p4) target bundleno = 1 (0x1), region = 69 }

// kernel: simple_cnn_forward.5
= control target key start
LH: loop header
LB: loop body
LE: loop exit
PB: predicated region body
PF: predicated region fallthrough
CT: control target
= control target key end

     0   :  { %10 = vsyncpa [#allocation4], 0  ;;  %s3949_s18 = smov 0   ;;  %s4588_s0 = inlined_call_operand.vmem [shape: bf16[2,8192], index: 0, kind: input, shape index: {}]   ;;  %s4589_s1 = inlined_call_operand.vmem [shape: bf16[8192,256], index: 1, kind: input, shape index: {}]   ;;  %s4590_s2 = inlined_call_operand.vmem [shape: f32[1,256], index: 2, kind: input, shape index: {}]   ;;  %s4591_s3 = inlined_call_operand.vmem [shape: bf16[256,128], index: 3, kind: input, shape index: {}]   ;;  %s4592_s4 = inlined_call_operand.vmem [shape: f32[1,128], index: 4, kind: input, shape index: {}]   ;;  %s4593_s5 = inlined_call_operand.hbm [shape: f32[2,128], index: 5, kind: output, shape index: {}]  }
   0x1 LB: > { %s3955_s19 = sadd.s32 4294967295, %s3915_s18   ;;  %p2480_p0 = scmp.ge.s32.totalorder %s3915_s18, 1  ;;  %s3915_s18 = sphi %s3949_s18, %s16_s18  }
   0x2   : > { %p195_p1 = scmp.lt.s32.totalorder %s3915_s18, 5 }
   0x4   : > { %p196_p2 = pnand %p2480_p0, %p195_p1 }
   0x5   : > { %s2481_s20 = sshll.u32 (!%p196_p2), %s3955_s19, 4  ;;  %s2482_s21 = sshll.u32 (!%p196_p2), %s3955_s19, 8 }
   0x6   : > { %199 = sbr.rel (%p196_p2) target bundleno = 594 (0x252), region = 40  ;;  %p224_p3 = scmp.lt.s32.totalorder (!%p196_p2), %s2481_s20, 63 }
   0x7   : > { %p229_p4 = scmp.lt.s32.totalorder (!%p196_p2), %s2482_s21, 1023  ;;  %p2485_p5 = scmp.ne.s32.totalorder (!%p196_p2), %s3955_s19, 0 }
   0xb   : > { %s4595_s20 = smov (!%p224_p3, %s2481_s20), 63  ;;  %s4597_s21 = smov (!%p229_p4, %s2482_s21), 1023 }
   0xc   : > { %s3964_s24 = scalar_lea.vmem %s4588_s0, %s4595_s20  ;;  %s3579_s25 = sshll.u32 %s4597_s21, 3 }
   0xd   : > { %s3969_s28 = scalar_lea.vmem %s4589_s1, %s3579_s25  ;;  %238 = sbr.rel (%p2485_p5) target bundleno = 20 (0x14), region = 44 }
  0x12   : > { %v3917_v0 = vmov 0.0  }
  0x13   : > { %239 = vst [vmem:[#allocation2] sm:$0xf] %v3917_v0 }
  0x14 PF: > { %v2544_v1 = vld [vmem:[%s3969_s28 + $0x70] sm:$0xf]  ;;  %v3595_v2 = vld [vmem:[%s3969_s28 + $0x74] sm:$0xf0]  ;;  %v2536_v12 = vld [vmem:[%s3969_s28 + $0x60] sm:$0xf] }
  0x15   : > { %v2608_v3 = vld [vmem:[%s3969_s28 + $0xf0] sm:$0xf]  ;;  %v2545_v4 = vor.u32 %v3595_v2, %v2544_v1  ;;  %v3611_v5 = vld [vmem:[%s3969_s28 + $0xf4] sm:$0xf0]  ;;  %v3593_v14 = vld [vmem:[%s3969_s28 + $0x64] sm:$0xf0] }
  0x16   : > { %v2672_v6 = vld [vmem:[%s3969_s28 + $0x170] sm:$0xf]  ;;  %v3627_v7 = vld [vmem:[%s3969_s28 + $0x174] sm:$0xf0]  ;;  %v2609_v8 = vor.u32 %v3611_v5, %v2608_v3  ;;  %v2600_v15 = vld [vmem:[%s3969_s28 + $0xe0] sm:$0xf]  ;;  %v2537_v17 = vor.u32 %v3593_v14, %v2536_v12 }
  0x17   : > { %v2673_v9 = vor.u32 %v3627_v7, %v2672_v6  ;;  %v2736_v10 = vld [vmem:[%s3969_s28 + $0x1f0] sm:$0xf]  ;;  %v3643_v11 = vld [vmem:[%s3969_s28 + $0x1f4] sm:$0xf0]  ;;  %1815 = vmatpush.bf16.msra.mxu0 %v2545_v4  ;;  %v3609_v16 = vld [vmem:[%s3969_s28 + $0xe4] sm:$0xf0] }
  0x18   : > { %v2737_v13 = vor.u32 %v3643_v11, %v2736_v10  ;;  %1828 = vmatpush.bf16.msra.mxu1 %v2609_v8  ;;  %v2601_v18 = vor.u32 %v3609_v16, %v2600_v15  ;;  %v2664_v19 = vld [vmem:[%s3969_s28 + $0x160] sm:$0xf]  ;;  %v3625_v20 = vld [vmem:[%s3969_s28 + $0x164] sm:$0xf0]  ;;  %v2528_v24 = vld [vmem:[%s3969_s28 + $0x50] sm:$0xf] }
  0x19   : > { %1841 = vmatpush.bf16.msra.mxu2 %v2673_v9  ;;  %v2728_v21 = vld [vmem:[%s3969_s28 + $0x1e0] sm:$0xf]  ;;  %v2665_v22 = vor.u32 %v3625_v20, %v2664_v19  ;;  %v3641_v23 = vld [vmem:[%s3969_s28 + $0x1e4] sm:$0xf0]  ;;  %v3591_v25 = vld [vmem:[%s3969_s28 + $0x54] sm:$0xf0] }
  0x1a   : > { %1854 = vmatpush.bf16.msra.mxu3 %v2737_v13  ;;  %v2729_v26 = vor.u32 %v3641_v23, %v2728_v21  ;;  %v2592_v27 = vld [vmem:[%s3969_s28 + $0xd0] sm:$0xf]  ;;  %v3607_v28 = vld [vmem:[%s3969_s28 + $0xd4] sm:$0xf0]  ;;  %v2529_v30 = vor.u32 %v3591_v25, %v2528_v24  ;;  %v2520_v36 = vld [vmem:[%s3969_s28 + $0x40] sm:$0xf] }
  0x1b   : > { %v2656_v29 = vld [vmem:[%s3969_s28 + $0x150] sm:$0xf]  ;;  %1816 = vmatpush.bf16.msra.mxu0 %v2537_v17  ;;  %v3623_v31 = vld [vmem:[%s3969_s28 + $0x154] sm:$0xf0]  ;;  %v2593_v34 = vor.u32 %v3607_v28, %v2592_v27  ;;  %v3589_v37 = vld [vmem:[%s3969_s28 + $0x44] sm:$0xf0] }
  0x1c   : > { %v2720_v32 = vld [vmem:[%s3969_s28 + $0x1d0] sm:$0xf]  ;;  %v3639_v33 = vld [vmem:[%s3969_s28 + $0x1d4] sm:$0xf0]  ;;  %1829 = vmatpush.bf16.msra.mxu1 %v2601_v18  ;;  %v2657_v35 = vor.u32 %v3623_v31, %v2656_v29  ;;  %v2584_v38 = vld [vmem:[%s3969_s28 + $0xc0] sm:$0xf]  ;;  %v2521_v45 = vor.u32 %v3589_v37, %v2520_v36 }
  0x1d   : > { %1842 = vmatpush.bf16.msra.mxu2 %v2665_v22  ;;  %v2721_v39 = vor.u32 %v3639_v33, %v2720_v32  ;;  %v3605_v40 = vld [vmem:[%s3969_s28 + $0xc4] sm:$0xf0]  ;;  %v2648_v41 = vld [vmem:[%s3969_s28 + $0x140] sm:$0xf]  ;;  %v2512_v48 = vld [vmem:[%s3969_s28 + $0x30] sm:$0xf] }
  0x1e   : > { %1855 = vmatpush.bf16.msra.mxu3 %v2729_v26  ;;  %v3621_v42 = vld [vmem:[%s3969_s28 + $0x144] sm:$0xf0]  ;;  %v2712_v43 = vld [vmem:[%s3969_s28 + $0x1c0] sm:$0xf]  ;;  %v2585_v46 = vor.u32 %v3605_v40, %v2584_v38  ;;  %v3587_v49 = vld [vmem:[%s3969_s28 + $0x34] sm:$0xf0] }
  0x1f   : > { %v3637_v44 = vld [vmem:[%s3969_s28 + $0x1c4] sm:$0xf0]  ;;  %1817 = vmatpush.bf16.msra.mxu0 %v2529_v30  ;;  %v2649_v47 = vor.u32 %v3621_v42, %v2648_v41  ;;  %v2576_v50 = vld [vmem:[%s3969_s28 + $0xb0] sm:$0xf]  ;;  %v3603_v52 = vld [vmem:[%s3969_s28 + $0xb4] sm:$0xf0]  ;;  %v2513_v57 = vor.u32 %v3587_v49, %v2512_v48 }
  0x20   : > { %1830 = vmatpush.bf16.msra.mxu1 %v2593_v34  ;;  %v2713_v51 = vor.u32 %v3637_v44, %v2712_v43  ;;  %v2640_v53 = vld [vmem:[%s3969_s28 + $0x130] sm:$0xf]  ;;  %v3619_v54 = vld [vmem:[%s3969_s28 + $0x134] sm:$0xf0]  ;;  %v2577_v58 = vor.u32 %v3603_v52, %v2576_v50  ;;  %v2504_v60 = vld [vmem:[%s3969_s28 + $0x20] sm:$0xf] }
  0x21   : > { %1843 = vmatpush.bf16.msra.mxu2 %v2657_v35  ;;  %v2704_v55 = vld [vmem:[%s3969_s28 + $0x1b0] sm:$0xf]  ;;  %v3635_v56 = vld [vmem:[%s3969_s28 + $0x1b4] sm:$0xf0]  ;;  %v2641_v59 = vor.u32 %v3619_v54, %v2640_v53  ;;  %v3585_v61 = vld [vmem:[%s3969_s28 + $0x24] sm:$0xf0] }
  0x22   : > { %1856 = vmatpush.bf16.msra.mxu3 %v2721_v39  ;;  %v2568_v62 = vld [vmem:[%s3969_s28 + $0xa0] sm:$0xf]  ;;  %v2705_v63 = vor.u32 %v3635_v56, %v2704_v55  ;;  %v3601_v0 = vld [vmem:[%s3969_s28 + $0xa4] sm:$0xf0]  ;;  %v2505_v5 = vor.u32 %v3585_v61, %v2504_v60  ;;  %v2496_v8 = vld [vmem:[%s3969_s28 + $0x10] sm:$0xf] }
  0x23   : > { %1818 = vmatpush.bf16.msra.mxu0 %v2521_v45  ;;  %v2632_v1 = vld [vmem:[%s3969_s28 + $0x120] sm:$0xf]  ;;  %v3617_v2 = vld [vmem:[%s3969_s28 + $0x124] sm:$0xf0]  ;;  %v2569_v6 = vor.u32 %v3601_v0, %v2568_v62  ;;  %v3583_v9 = vld [vmem:[%s3969_s28 + $0x14] sm:$0xf0] }
  0x24   : > { %1831 = vmatpush.bf16.msra.mxu1 %v2585_v46  ;;  %v2696_v3 = vld [vmem:[%s3969_s28 + $0x1a0] sm:$0xf]  ;;  %v3633_v4 = vld [vmem:[%s3969_s28 + $0x1a4] sm:$0xf0]  ;;  %v2633_v7 = vor.u32 %v3617_v2, %v2632_v1  ;;  %v2560_v10 = vld [vmem:[%s3969_s28 + $0x90] sm:$0xf]  ;;  %v2497_v17 = vor.u32 %v3583_v9, %v2496_v8 }
  0x25   : > { %1844 = vmatpush.bf16.msra.mxu2 %v2649_v47  ;;  %v2697_v11 = vor.u32 %v3633_v4, %v2696_v3  ;;  %v3599_v12 = vld [vmem:[%s3969_s28 + $0x94] sm:$0xf0]  ;;  %v2624_v13 = vld [vmem:[%s3969_s28 + $0x110] sm:$0xf]  ;;  %v2488_v18 = vld [vmem:[%s3969_s28] sm:$0xf] }
  0x26   : > { %1857 = vmatpush.bf16.msra.mxu3 %v2713_v51  ;;  %v3615_v14 = vld [vmem:[%s3969_s28 + $0x114] sm:$0xf0]  ;;  %v2688_v15 = vld [vmem:[%s3969_s28 + $0x190] sm:$0xf]  ;;  %v3581_v19 = vld [vmem:[%s3969_s28 + $0x4] sm:$0xf0]  ;;  %v2561_v20 = vor.u32 %v3599_v12, %v2560_v10 }
  0x27   : > { %1819 = vmatpush.bf16.msra.mxu0 %v2513_v57  ;;  %v3631_v16 = vld [vmem:[%s3969_s28 + $0x194] sm:$0xf0]  ;;  %v2625_v21 = vor.u32 %v3615_v14, %v2624_v13  ;;  %v2552_v22 = vld [vmem:[%s3969_s28 + $0x80] sm:$0xf]  ;;  %v3597_v23 = vld [vmem:[%s3969_s28 + $0x84] sm:$0xf0]  ;;  %v2489_v32 = vor.u32 %v3581_v19, %v2488_v18 }
  0x28   : > { %1832 = vmatpush.bf16.msra.mxu1 %v2577_v58  ;;  %v2616_v24 = vld [vmem:[%s3969_s28 + $0x100] sm:$0xf]  ;;  %v2689_v25 = vor.u32 %v3631_v16, %v2688_v15  ;;  %v3613_v26 = vld [vmem:[%s3969_s28 + $0x104] sm:$0xf0]  ;;  %v2800_v29 = vld [vmem:[%s3969_s28 + $0x270] sm:$0xf]  ;;  %v2553_v36 = vor.u32 %v3597_v23, %v2552_v22 }
  0x29   : > { %1845 = vmatpush.bf16.msra.mxu2 %v2641_v59  ;;  %v2680_v27 = vld [vmem:[%s3969_s28 + $0x180] sm:$0xf]  ;;  %v3629_v28 = vld [vmem:[%s3969_s28 + $0x184] sm:$0xf0]  ;;  %v3659_v30 = vld [vmem:[%s3969_s28 + $0x274] sm:$0xf0]  ;;  %v2617_v37 = vor.u32 %v3613_v26, %v2616_v24 }
  0x2a   : > { %1858 = vmatpush.bf16.msra.mxu3 %v2705_v63  ;;  %v2864_v31 = vld [vmem:[%s3969_s28 + $0x2f0] sm:$0xf]  ;;  %v3675_v33 = vld [vmem:[%s3969_s28 + $0x2f4] sm:$0xf0]  ;;  %v2681_v40 = vor.u32 %v3629_v28, %v2680_v27  ;;  %v2801_v41 = vor.u32 %v3659_v30, %v2800_v29  ;;  %v2792_v44 = vld [vmem:[%s3969_s28 + $0x260] sm:$0xf] }
  0x2b   : > { %1820 = vmatpush.bf16.msra.mxu0 %v2505_v5  ;;  %v2928_v34 = vld [vmem:[%s3969_s28 + $0x370] sm:$0xf]  ;;  %v3691_v35 = vld [vmem:[%s3969_s28 + $0x374] sm:$0xf0]  ;;  %v2865_v42 = vor.u32 %v3675_v33, %v2864_v31  ;;  %v3657_v45 = vld [vmem:[%s3969_s28 + $0x264] sm:$0xf0] }
  0x2c   : > { %1833 = vmatpush.bf16.msra.mxu1 %v2569_v6  ;;  %v2992_v38 = vld [vmem:[%s3969_s28 + $0x3f0] sm:$0xf]  ;;  %v3707_v39 = vld [vmem:[%s3969_s28 + $0x3f4] sm:$0xf0]  ;;  %v2929_v43 = vor.u32 %v3691_v35, %v2928_v34  ;;  %v2856_v46 = vld [vmem:[%s3969_s28 + $0x2e0] sm:$0xf]  ;;  %v2793_v53 = vor.u32 %v3657_v45, %v2792_v44 }
  0x2d   : > { %1846 = vmatpush.bf16.msra.mxu2 %v2633_v7  ;;  %v2993_v47 = vor.u32 %v3707_v39, %v2992_v38  ;;  %v3673_v48 = vld [vmem:[%s3969_s28 + $0x2e4] sm:$0xf0]  ;;  %v2920_v49 = vld [vmem:[%s3969_s28 + $0x360] sm:$0xf]  ;;  %v2784_v54 = vld [vmem:[%s3969_s28 + $0x250] sm:$0xf] }
  0x2e   : > { %1859 = vmatpush.bf16.msra.mxu3 %v2697_v11  ;;  %v3689_v50 = vld [vmem:[%s3969_s28 + $0x364] sm:$0xf0]  ;;  %v2984_v51 = vld [vmem:[%s3969_s28 + $0x3e0] sm:$0xf]  ;;  %v3655_v55 = vld [vmem:[%s3969_s28 + $0x254] sm:$0xf0]  ;;  %v2857_v56 = vor.u32 %v3673_v48, %v2856_v46 }
  0x2f   : > { %1821 = vmatpush.bf16.msra.mxu0 %v2497_v17  ;;  %v3705_v52 = vld [vmem:[%s3969_s28 + $0x3e4] sm:$0xf0]  ;;  %v2921_v57 = vor.u32 %v3689_v50, %v2920_v49  ;;  %v2848_v58 = vld [vmem:[%s3969_s28 + $0x2d0] sm:$0xf]  ;;  %v3671_v59 = vld [vmem:[%s3969_s28 + $0x2d4] sm:$0xf0]  ;;  %v2785_v2 = vor.u32 %v3655_v55, %v2784_v54 }
  0x30   : > { %1834 = vmatpush.bf16.msra.mxu1 %v2561_v20  ;;  %v241_v60 = vld [vmem:[%s3964_s24] sm:$0xff]  ;;  %v2985_v61 = vor.u32 %v3705_v52, %v2984_v51  ;;  %v2912_v62 = vld [vmem:[%s3969_s28 + $0x350] sm:$0xf]  ;;  %v3687_v63 = vld [vmem:[%s3969_s28 + $0x354] sm:$0xf0]  ;;  %v2849_v3 = vor.u32 %v3671_v59, %v2848_v58  ;;  %vm2234_vm0 = vcmask 1041408  }
  0x31   : > { %1847 = vmatpush.bf16.msra.mxu2 %v2625_v21  ;;  %500 = vst [vmem:[#allocation1] ss:$9 sm:$0xff] %v241_v60  ;;  %v2976_v0 = vld [vmem:[%s3969_s28 + $0x3d0] sm:$0xf]  ;;  %v3703_v1 = vld [vmem:[%s3969_s28 + $0x3d4] sm:$0xf0]  ;;  %v2913_v4 = vor.u32 %v3687_v63, %v2912_v62 }
  0x32   : > { %1860 = vmatpush.bf16.msra.mxu3 %v2689_v25  ;;  %v2776_v5 = vld [vmem:[%s3969_s28 + $0x240] sm:$0xf]  ;;  %v3653_v6 = vld [vmem:[%s3969_s28 + $0x244] sm:$0xf0]  ;;  %v2977_v8 = vor.u32 %v3703_v1, %v2976_v0  ;;  %v2768_v14 = vld [vmem:[%s3969_s28 + $0x230] sm:$0xf] }
  0x33   : > { %1822 = vmatpush.bf16.msra.mxu0 %v2489_v32  ;;  %v2840_v7 = vld [vmem:[%s3969_s28 + $0x2c0] sm:$0xf]  ;;  %v3669_v9 = vld [vmem:[%s3969_s28 + $0x2c4] sm:$0xf0]  ;;  %v2777_v15 = vor.u32 %v3653_v6, %v2776_v5  ;;  %v3651_v16 = vld [vmem:[%s3969_s28 + $0x234] sm:$0xf0] }
  0x34   : > { %1835 = vmatpush.bf16.msra.mxu1 %v2553_v36  ;;  %v2904_v10 = vld [vmem:[%s3969_s28 + $0x340] sm:$0xf]  ;;  %v3685_v11 = vld [vmem:[%s3969_s28 + $0x344] sm:$0xf0]  ;;  %v2832_v17 = vld [vmem:[%s3969_s28 + $0x2b0] sm:$0xf]  ;;  %v2841_v19 = vor.u32 %v3669_v9, %v2840_v7  ;;  %v2769_v30 = vor.u32 %v3651_v16, %v2768_v14 }
  0x35   : > { %1848 = vmatpush.bf16.msra.mxu2 %v2617_v37  ;;  %v2968_v12 = vld [vmem:[%s3969_s28 + $0x3c0] sm:$0xf]  ;;  %v3701_v13 = vld [vmem:[%s3969_s28 + $0x3c4] sm:$0xf0]  ;;  %v3667_v18 = vld [vmem:[%s3969_s28 + $0x2b4] sm:$0xf0]  ;;  %v2905_v20 = vor.u32 %v3685_v11, %v2904_v10 }
  0x36   : > { %1861 = vmatpush.bf16.msra.mxu3 %v2681_v40  ;;  %v2969_v24 = vor.u32 %v3701_v13, %v2968_v12  ;;  %v2896_v25 = vld [vmem:[%s3969_s28 + $0x330] sm:$0xf]  ;;  %v3683_v26 = vld [vmem:[%s3969_s28 + $0x334] sm:$0xf0]  ;;  %v2833_v31 = vor.u32 %v3667_v18, %v2832_v17  ;;  %v2760_v33 = vld [vmem:[%s3969_s28 + $0x220] sm:$0xf] }
  0x37   : > { %1867 = vmatpush.bf16.msrb.mxu0 %v2801_v41  ;;  %v2960_v28 = vld [vmem:[%s3969_s28 + $0x3b0] sm:$0xf]  ;;  %v3699_v29 = vld [vmem:[%s3969_s28 + $0x3b4] sm:$0xf0]  ;;  %v2897_v32 = vor.u32 %v3683_v26, %v2896_v25  ;;  %v3649_v34 = vld [vmem:[%s3969_s28 + $0x224] sm:$0xf0] }
  0x38   : > { %1880 = vmatpush.bf16.msrb.mxu1 %v2865_v42  ;;  %v4073_v21 = vld [vmem:[#allocation1 + $0x12] sm:$0xff]  ;;  %v4075_v22 = vld [vmem:[#allocation1] sm:$0xff]  ;;  %v4082_v27 = vld [vmem:[#allocation1 + $0x9] sm:$0xff]  ;;  %v2961_v36 = vor.u32 %v3699_v29, %v2960_v28  ;;  %v2761_v42 = vor.u32 %v3649_v34, %v2760_v33  ;;  %p3510_p6 = scmp.ne.s32.totalorder %s3955_s19, 3 }
  0x39   : > { %1893 = vmatpush.bf16.msrb.mxu2 %v2929_v43  ;;  %v4077_v23 = vld [vmem:[#allocation1 + $0x1b] sm:$0xff]  ;;  %1823 = vmatmul.bf16.vlgmr.msra.gmra.mxu0 %v4075_v22  ;;  %v3665_v37 = vld [vmem:[%s3969_s28 + $0x2a4] sm:$0xf0]  ;;  %v2752_v43 = vld [vmem:[%s3969_s28 + $0x210] sm:$0xf] }
  0x3a   : > { %1906 = vmatpush.bf16.msrb.mxu3 %v2993_v47  ;;  %1849 = vmatmul.bf16.vlgmr.msra.gmra.mxu2 %v4073_v21  ;;  %v2824_v35 = vld [vmem:[%s3969_s28 + $0x2a0] sm:$0xf]  ;;  %v3681_v39 = vld [vmem:[%s3969_s28 + $0x324] sm:$0xf0]  ;;  %v3647_v46 = vld [vmem:[%s3969_s28 + $0x214] sm:$0xf0] }
  0x3b   : > { %1868 = vmatpush.bf16.msrb.mxu0 %v2793_v53  ;;  %1862 = vmatmul.bf16.vlgmr.msra.gmra.mxu3 %v4077_v23  ;;  %v2888_v38 = vld [vmem:[%s3969_s28 + $0x320] sm:$0xf]  ;;  %v3697_v41 = vld [vmem:[%s3969_s28 + $0x3a4] sm:$0xf0]  ;;  %v2825_v44 = vor.u32 %v3665_v37, %v2824_v35  ;;  %v2816_v47 = vld [vmem:[%s3969_s28 + $0x290] sm:$0xf] }
  0x3c   : > { %1881 = vmatpush.bf16.msrb.mxu1 %v2857_v56  ;;  %v2952_v40 = vld [vmem:[%s3969_s28 + $0x3a0] sm:$0xf]  ;;  %v2889_v45 = vor.u32 %v3681_v39, %v2888_v38  ;;  %v3663_v48 = vld [vmem:[%s3969_s28 + $0x294] sm:$0xf0]  ;;  %v2880_v50 = vld [vmem:[%s3969_s28 + $0x310] sm:$0xf]  ;;  %v2753_v56 = vor.u32 %v3647_v46, %v2752_v43 }
  0x3d   : > { %1894 = vmatpush.bf16.msrb.mxu2 %v2921_v57  ;;  %1836 = vmatmul.bf16.vlgmr.msra.gmra.mxu1 %v4082_v27  ;;  %v2953_v49 = vor.u32 %v3697_v41, %v2952_v40  ;;  %v3679_v51 = vld [vmem:[%s3969_s28 + $0x314] sm:$0xf0]  ;;  %v2944_v52 = vld [vmem:[%s3969_s28 + $0x390] sm:$0xf]  ;;  %v2744_v54 = vld [vmem:[%s3969_s28 + $0x200] sm:$0xf]  ;;  %v2817_v63 = vor.u32 %v3663_v48, %v2816_v47 }
  0x3e   : > { %1907 = vmatpush.bf16.msrb.mxu3 %v2985_v61  ;;  %v3695_v53 = vld [vmem:[%s3969_s28 + $0x394] sm:$0xf0]  ;;  %v3645_v55 = vld [vmem:[%s3969_s28 + $0x204] sm:$0xf0]  ;;  %v2808_v57 = vld [vmem:[%s3969_s28 + $0x280] sm:$0xf]  ;;  %v2881_v0 = vor.u32 %v3679_v51, %v2880_v50 }
  0x3f   : > { %1869 = vmatpush.bf16.msrb.mxu0 %v2785_v2  ;;  %v3661_v58 = vld [vmem:[%s3969_s28 + $0x284] sm:$0xf0]  ;;  %v2872_v59 = vld [vmem:[%s3969_s28 + $0x300] sm:$0xf]  ;;  %v4111_v61 = vld [vmem:[#allocation1 + $0x36] sm:$0xff]  ;;  %v2745_v10 = vor.u32 %v3645_v55, %v2744_v54 }
  0x40   : > { %1882 = vmatpush.bf16.msrb.mxu1 %v2849_v3  ;;  %v3677_v60 = vld [vmem:[%s3969_s28 + $0x304] sm:$0xf0]  ;;  %v4116_v2 = vld [vmem:[#allocation1 + $0x3f] sm:$0xff]  ;;  %v4118_v3 = vld [vmem:[#allocation1 + $0x2d] sm:$0xff]  ;;  %v2809_v14 = vor.u32 %v3661_v58, %v2808_v57 }
  0x41   : > { %1895 = vmatpush.bf16.msrb.mxu2 %v2913_v4  ;;  %v242_v62 = vld [vmem:[%s3964_s24 + $0x8] sm:$0xff]  ;;  %v2945_v4 = vor.u32 %v3695_v53, %v2944_v52  ;;  %v2936_v5 = vld [vmem:[%s3969_s28 + $0x380] sm:$0xf]  ;;  %v3056_v7 = vld [vmem:[%s3969_s28 + $0x470] sm:$0xf] }
  0x42   : > { %1908 = vmatpush.bf16.msrb.mxu3 %v2977_v8  ;;  %v4114_v1 = vld [vmem:[#allocation1 + $0x24] sm:$0xff]  ;;  %v3723_v8 = vld [vmem:[%s3969_s28 + $0x474] sm:$0xf0]  ;;  %v3120_v9 = vld [vmem:[%s3969_s28 + $0x4f0] sm:$0xf] }
  0x43   : > { %1870 = vmatpush.bf16.msrb.mxu0 %v2777_v15  ;;  %v3693_v6 = vld [vmem:[%s3969_s28 + $0x384] sm:$0xf0]  ;;  %510 = vst [vmem:[#allocation1] ss:$9 sm:$0xff] %v242_v62  ;;  %v3739_v11 = vld [vmem:[%s3969_s28 + $0x4f4] sm:$0xf0]  ;;  %v2873_v15 = vor.u32 %v3677_v60, %v2872_v59 }
  0x44   : > { %1883 = vmatpush.bf16.msrb.mxu1 %v2841_v19  ;;  %v3184_v12 = vld [vmem:[%s3969_s28 + $0x570] sm:$0xf]  ;;  %v3755_v13 = vld [vmem:[%s3969_s28 + $0x574] sm:$0xf0]  ;;  %v2937_v18 = vor.u32 %v3693_v6, %v2936_v5  ;;  %v3057_v19 = vor.u32 %v3723_v8, %v3056_v7  ;;  %v3048_v25 = vld [vmem:[%s3969_s28 + $0x460] sm:$0xf] }
  0x45   : > { %1896 = vmatpush.bf16.msrb.mxu2 %v2905_v20  ;;  %v3248_v16 = vld [vmem:[%s3969_s28 + $0x5f0] sm:$0xf]  ;;  %v3771_v17 = vld [vmem:[%s3969_s28 + $0x5f4] sm:$0xf0]  ;;  %v3121_v20 = vor.u32 %v3739_v11, %v3120_v9  ;;  %v3721_v26 = vld [vmem:[%s3969_s28 + $0x464] sm:$0xf0] }
  0x46   : > { %1909 = vmatpush.bf16.msrb.mxu3 %v2969_v24  ;;  %v3185_v24 = vor.u32 %v3755_v13, %v3184_v12  ;;  %v3112_v28 = vld [vmem:[%s3969_s28 + $0x4e0] sm:$0xf]  ;;  %v3249_v29 = vor.u32 %v3771_v17, %v3248_v16  ;;  %v3769_v34 = vld [vmem:[%s3969_s28 + $0x5e4] sm:$0xf0]  ;;  %v3049_v35 = vor.u32 %v3721_v26, %v3048_v25  ;;  %v3040_v38 = vld [vmem:[%s3969_s28 + $0x450] sm:$0xf] }
  0x47   : > { %1871 = vmatpush.bf16.msrb.mxu0 %v2769_v30  ;;  %v3737_v30 = vld [vmem:[%s3969_s28 + $0x4e4] sm:$0xf0]  ;;  %v3240_v33 = vld [vmem:[%s3969_s28 + $0x5e0] sm:$0xf]  ;;  %v3719_v39 = vld [vmem:[%s3969_s28 + $0x454] sm:$0xf0] }
  0x48   : > { %1884 = vmatpush.bf16.msrb.mxu1 %v2833_v31  ;;  %v3176_v31 = vld [vmem:[%s3969_s28 + $0x560] sm:$0xf]  ;;  %v3104_v40 = vld [vmem:[%s3969_s28 + $0x4d0] sm:$0xf]  ;;  %v3241_v41 = vor.u32 %v3769_v34, %v3240_v33  ;;  %v3767_v46 = vld [vmem:[%s3969_s28 + $0x5d4] sm:$0xf0]  ;;  %v3041_v47 = vor.u32 %v3719_v39, %v3040_v38 }
  0x49   : > { %1897 = vmatpush.bf16.msrb.mxu2 %v2897_v32  ;;  %v3753_v32 = vld [vmem:[%s3969_s28 + $0x564] sm:$0xf0]  ;;  %v3168_v43 = vld [vmem:[%s3969_s28 + $0x550] sm:$0xf]  ;;  %v3032_v50 = vld [vmem:[%s3969_s28 + $0x440] sm:$0xf] }
  0x4a   : > { %1910 = vmatpush.bf16.msrb.mxu3 %v2961_v36  ;;  %v3113_v36 = vor.u32 %v3737_v30, %v3112_v28  ;;  %v3177_v37 = vor.u32 %v3753_v32, %v3176_v31  ;;  %v3717_v51 = vld [vmem:[%s3969_s28 + $0x444] sm:$0xf0]  ;;  %v3096_v52 = vld [vmem:[%s3969_s28 + $0x4c0] sm:$0xf]  ;;  %v3731_v6 = vld [vmem:[%s3969_s28 + $0x4b4] sm:$0xf0] }
  0x4b   : > { %1872 = vmatpush.bf16.msrb.mxu0 %v2761_v42  ;;  %v3735_v42 = vld [vmem:[%s3969_s28 + $0x4d4] sm:$0xf0]  ;;  %v3733_v54 = vld [vmem:[%s3969_s28 + $0x4c4] sm:$0xf0]  ;;  %v3160_v55 = vld [vmem:[%s3969_s28 + $0x540] sm:$0xf]  ;;  %v3033_v59 = vor.u32 %v3717_v51, %v3032_v50 }
  0x4c   : > { %1885 = vmatpush.bf16.msrb.mxu1 %v2825_v44  ;;  %v3751_v44 = vld [vmem:[%s3969_s28 + $0x554] sm:$0xf0]  ;;  %v3105_v48 = vor.u32 %v3735_v42, %v3104_v40  ;;  %v3224_v57 = vld [vmem:[%s3969_s28 + $0x5c0] sm:$0xf]  ;;  %v3765_v58 = vld [vmem:[%s3969_s28 + $0x5c4] sm:$0xf0]  ;;  %v3097_v60 = vor.u32 %v3733_v54, %v3096_v52 }
  0x4d   : > { %1898 = vmatpush.bf16.msrb.mxu2 %v2889_v45  ;;  %v3232_v45 = vld [vmem:[%s3969_s28 + $0x5d0] sm:$0xf]  ;;  %v3225_v5 = vor.u32 %v3765_v58, %v3224_v57  ;;  %v3747_v8 = vld [vmem:[%s3969_s28 + $0x534] sm:$0xf0]  ;;  %v3080_v16 = vld [vmem:[%s3969_s28 + $0x4a0] sm:$0xf] }
  0x4e   : > { %1911 = vmatpush.bf16.msrb.mxu3 %v2953_v49  ;;  %v3169_v49 = vor.u32 %v3751_v44, %v3168_v43  ;;  %v3233_v53 = vor.u32 %v3767_v46, %v3232_v45  ;;  %v3152_v7 = vld [vmem:[%s3969_s28 + $0x530] sm:$0xf]  ;;  %v3761_v25 = vld [vmem:[%s3969_s28 + $0x5a4] sm:$0xf0]  ;;  %v3711_v31 = vld [vmem:[%s3969_s28 + $0x414] sm:$0xf0] }
  0x4f   : > { %1873 = vmatpush.bf16.msrb.mxu0 %v2753_v56  ;;  %v3749_v56 = vld [vmem:[%s3969_s28 + $0x544] sm:$0xf0]  ;;  %v3216_v9 = vld [vmem:[%s3969_s28 + $0x5b0] sm:$0xf]  ;;  %v3153_v13 = vor.u32 %v3747_v8, %v3152_v7  ;;  %v3727_v34 = vld [vmem:[%s3969_s28 + $0x494] sm:$0xf0] }
  0x50   : > { %1886 = vmatpush.bf16.msrb.mxu1 %v2817_v63  ;;  %v3161_v62 = vor.u32 %v3749_v56, %v3160_v55  ;;  %v3024_v63 = vld [vmem:[%s3969_s28 + $0x430] sm:$0xf]  ;;  %v3759_v38 = vld [vmem:[%s3969_s28 + $0x594] sm:$0xf0]  ;;  %v3000_v40 = vld [vmem:[%s3969_s28 + $0x400] sm:$0xf] }
  0x51   : > { %1899 = vmatpush.bf16.msrb.mxu2 %v2881_v0  ;;  %v3715_v0 = vld [vmem:[%s3969_s28 + $0x434] sm:$0xf0]  ;;  %v3008_v30 = vld [vmem:[%s3969_s28 + $0x410] sm:$0xf]  ;;  %v3064_v44 = vld [vmem:[%s3969_s28 + $0x480] sm:$0xf] }
  0x52   : > { %1912 = vmatpush.bf16.msrb.mxu3 %v2945_v4  ;;  %v3088_v4 = vld [vmem:[%s3969_s28 + $0x4b0] sm:$0xf]  ;;  %v3025_v11 = vor.u32 %v3715_v0, %v3024_v63  ;;  %v3009_v39 = vor.u32 %v3711_v31, %v3008_v30  ;;  %v3725_v45 = vld [vmem:[%s3969_s28 + $0x484] sm:$0xf0]  ;;  %v3128_v46 = vld [vmem:[%s3969_s28 + $0x500] sm:$0xf] }
  0x53   : > { %1874 = vmatpush.bf16.msrb.mxu0 %v2745_v10  ;;  %v3763_v10 = vld [vmem:[%s3969_s28 + $0x5b4] sm:$0xf0]  ;;  %v3089_v12 = vor.u32 %v3731_v6, %v3088_v4  ;;  %v3072_v32 = vld [vmem:[%s3969_s28 + $0x490] sm:$0xf]  ;;  %v3757_v50 = vld [vmem:[%s3969_s28 + $0x584] sm:$0xf0]  ;;  %v3065_v58 = vor.u32 %v3725_v45, %v3064_v44 }
  0x54   : > { %1887 = vmatpush.bf16.msrb.mxu1 %v2809_v14  ;;  %v3016_v14 = vld [vmem:[%s3969_s28 + $0x420] sm:$0xf]  ;;  %v3217_v17 = vor.u32 %v3763_v10, %v3216_v9  ;;  %v3073_v42 = vor.u32 %v3727_v34, %v3072_v32  ;;  %v3312_v51 = vld [vmem:[%s3969_s28 + $0x670] sm:$0xf]  ;;  %v3787_v52 = vld [vmem:[%s3969_s28 + $0x674] sm:$0xf0] }
  0x55   : > { %1900 = vmatpush.bf16.msrb.mxu2 %v2873_v15  ;;  %v3713_v15 = vld [vmem:[%s3969_s28 + $0x424] sm:$0xf0]  ;;  %v3803_v55 = vld [vmem:[%s3969_s28 + $0x6f4] sm:$0xf0]  ;;  %v3440_v56 = vld [vmem:[%s3969_s28 + $0x770] sm:$0xf]  ;;  %v3313_v0 = vor.u32 %v3787_v52, %v3312_v51 }
  0x56   : > { %1913 = vmatpush.bf16.msrb.mxu3 %v2937_v18  ;;  %1875 = vmatmul.bf16.vlgmr.msrb.gmra.mxu0 %v4114_v1  ;;  %v3729_v18 = vld [vmem:[%s3969_s28 + $0x4a4] sm:$0xf0]  ;;  %v3017_v26 = vor.u32 %v3713_v15, %v3016_v14  ;;  %v3819_v57 = vld [vmem:[%s3969_s28 + $0x774] sm:$0xf0]  ;;  %v3304_v6 = vld [vmem:[%s3969_s28 + $0x660] sm:$0xf] }
  0x57   : > { %1919 = vmatpush.bf16.msra.mxu0 %v3057_v19  ;;  %1888 = vmatmul.bf16.vlgmr.msrb.gmra.mxu1 %v4118_v3  ;;  %v3144_v19 = vld [vmem:[%s3969_s28 + $0x520] sm:$0xf]  ;;  %v3081_v28 = vor.u32 %v3729_v18, %v3080_v16  ;;  %v3785_v7 = vld [vmem:[%s3969_s28 + $0x664] sm:$0xf0]  ;;  %v513_v16 = vld [vmem:[#allocation1 + $0x12] sm:$0xff] }
  0x58   : > { %1932 = vmatpush.bf16.msra.mxu1 %v3121_v20  ;;  %1901 = vmatmul.bf16.vlgmr.msrb.gmra.mxu2 %v4111_v61  ;;  %v3745_v20 = vld [vmem:[%s3969_s28 + $0x524] sm:$0xf0]  ;;  %v3368_v8 = vld [vmem:[%s3969_s28 + $0x6e0] sm:$0xf]  ;;  %v3799_v30 = vld [vmem:[%s3969_s28 + $0x6d4] sm:$0xf0] }
  0x59   : > { %1945 = vmatpush.bf16.msra.mxu2 %v3185_v24  ;;  %1914 = vmatmul.bf16.vlgmr.msrb.gmra.mxu3 %v4116_v2  ;;  %v3208_v24 = vld [vmem:[%s3969_s28 + $0x5a0] sm:$0xf]  ;;  %v3801_v10 = vld [vmem:[%s3969_s28 + $0x6e4] sm:$0xf0]  ;;  %v3424_v31 = vld [vmem:[%s3969_s28 + $0x750] sm:$0xf] }
  0x5a   : > { %1958 = vmatpush.bf16.msra.mxu3 %v3249_v29  ;;  %v3145_v29 = vor.u32 %v3745_v20, %v3144_v19  ;;  %v3209_v33 = vor.u32 %v3761_v25, %v3208_v24  ;;  %v3496_v14 = vld [vmem:[%s3969_s28 + $0x7e0] sm:$0xf]  ;;  %v3833_v15 = vld [vmem:[%s3969_s28 + $0x7e4] sm:$0xf0]  ;;  %v3305_v19 = vor.u32 %v3785_v7, %v3304_v6  ;;  %v3369_v20 = vor.u32 %v3801_v10, %v3368_v8  ;;  %v3296_v25 = vld [vmem:[%s3969_s28 + $0x650] sm:$0xf] }
  0x5b   : > { %1920 = vmatpush.bf16.msra.mxu0 %v3049_v35  ;;  %v3136_v35 = vld [vmem:[%s3969_s28 + $0x510] sm:$0xf]  ;;  %v514_v18 = vld [vmem:[#allocation1 + $0x1b] sm:$0xff]  ;;  %v3813_v44 = vld [vmem:[%s3969_s28 + $0x744] sm:$0xf0] }
  0x5c   : > { %1933 = vmatpush.bf16.msra.mxu1 %v3113_v36  ;;  %v3743_v36 = vld [vmem:[%s3969_s28 + $0x514] sm:$0xf0]  ;;  %v3480_v45 = vld [vmem:[%s3969_s28 + $0x7c0] sm:$0xf]  ;;  %v3344_v52 = vld [vmem:[%s3969_s28 + $0x6b0] sm:$0xf] }
  0x5d   : > { %1946 = vmatpush.bf16.msra.mxu2 %v3177_v37  ;;  %v3200_v37 = vld [vmem:[%s3969_s28 + $0x590] sm:$0xf]  ;;  %v3137_v43 = vor.u32 %v3743_v36, %v3136_v35  ;;  %v3815_v32 = vld [vmem:[%s3969_s28 + $0x754] sm:$0xf0]  ;;  %v3793_v6 = vld [vmem:[%s3969_s28 + $0x6a4] sm:$0xf0] }
  0x5e   : > { %1959 = vmatpush.bf16.msra.mxu3 %v3241_v41  ;;  %v3709_v41 = vld [vmem:[%s3969_s28 + $0x404] sm:$0xf0]  ;;  %v3831_v34 = vld [vmem:[%s3969_s28 + $0x7d4] sm:$0xf0]  ;;  %v3400_v7 = vld [vmem:[%s3969_s28 + $0x720] sm:$0xf] }
  0x5f   : > { %1921 = vmatpush.bf16.msra.mxu0 %v3041_v47  ;;  %v3201_v47 = vor.u32 %v3759_v38, %v3200_v37  ;;  %v3001_v54 = vor.u32 %v3709_v41, %v3000_v40  ;;  %v3425_v37 = vor.u32 %v3815_v32, %v3424_v31  ;;  %v3288_v38 = vld [vmem:[%s3969_s28 + $0x640] sm:$0xf]  ;;  %v3779_v51 = vld [vmem:[%s3969_s28 + $0x634] sm:$0xf0]  ;;  %v3809_v8 = vld [vmem:[%s3969_s28 + $0x724] sm:$0xf0] }
  0x60   : > { %1934 = vmatpush.bf16.msra.mxu1 %v3105_v48  ;;  %v3741_v48 = vld [vmem:[%s3969_s28 + $0x504] sm:$0xf0]  ;;  %v3352_v40 = vld [vmem:[%s3969_s28 + $0x6c0] sm:$0xf] }
  0x61   : > { %1947 = vmatpush.bf16.msra.mxu2 %v3169_v49  ;;  %v3192_v49 = vld [vmem:[%s3969_s28 + $0x580] sm:$0xf]  ;;  %v3825_v10 = vld [vmem:[%s3969_s28 + $0x7a4] sm:$0xf0] }
  0x62   : > { %1960 = vmatpush.bf16.msra.mxu3 %v3233_v53  ;;  %v3376_v53 = vld [vmem:[%s3969_s28 + $0x6f0] sm:$0xf]  ;;  %v3193_v63 = vor.u32 %v3757_v50, %v3192_v49  ;;  %v3320_v32 = vld [vmem:[%s3969_s28 + $0x680] sm:$0xf] }
  0x63   : > { %1922 = vmatpush.bf16.msra.mxu0 %v3033_v59  ;;  %v3129_v59 = vor.u32 %v3741_v48, %v3128_v46  ;;  %v3377_v4 = vor.u32 %v3803_v55, %v3376_v53  ;;  %v3829_v46 = vld [vmem:[%s3969_s28 + $0x7c4] sm:$0xf0]  ;;  %v3280_v50 = vld [vmem:[%s3969_s28 + $0x630] sm:$0xf] }
  0x64   : > { %1935 = vmatpush.bf16.msra.mxu1 %v3097_v60  ;;  %v3504_v60 = vld [vmem:[%s3969_s28 + $0x7f0] sm:$0xf]  ;;  %v3481_v53 = vor.u32 %v3829_v46, %v3480_v45  ;;  %v2674_v45 = vld [vmem:[%s3969_s28 + $0x178] sm:$0xf0] }
  0x65   : > { %1948 = vmatpush.bf16.msra.mxu2 %v3161_v62  ;;  %v3835_v62 = vld [vmem:[%s3969_s28 + $0x7f4] sm:$0xf0]  ;;  %v3408_v55 = vld [vmem:[%s3969_s28 + $0x730] sm:$0xf] }
  0x66   : > { %1961 = vmatpush.bf16.msra.mxu3 %v3225_v5  ;;  %v3441_v5 = vor.u32 %v3819_v57, %v3440_v56  ;;  %v3505_v9 = vor.u32 %v3835_v62, %v3504_v60  ;;  %v3811_v56 = vld [vmem:[%s3969_s28 + $0x734] sm:$0xf0]  ;;  %v3472_v57 = vld [vmem:[%s3969_s28 + $0x7b0] sm:$0xf] }
  0x67   : > { %1923 = vmatpush.bf16.msra.mxu0 %v3025_v11  ;;  %v3432_v11 = vld [vmem:[%s3969_s28 + $0x760] sm:$0xf]  ;;  %v3409_v62 = vor.u32 %v3811_v56, %v3408_v55  ;;  %v2538_v55 = vld [vmem:[%s3969_s28 + $0x68] sm:$0xf0]  ;;  %v3608_v56 = vld [vmem:[%s3969_s28 + $0xe4] sm:$0xf] }
  0x68   : > { %1936 = vmatpush.bf16.msra.mxu1 %v3089_v12  ;;  %v3817_v12 = vld [vmem:[%s3969_s28 + $0x764] sm:$0xf0] }
  0x69   : > { %1949 = vmatpush.bf16.msra.mxu2 %v3153_v13  ;;  %v511_v13 = vld [vmem:[#allocation1] sm:$0xff]  ;;  %v3433_v24 = vor.u32 %v3817_v12, %v3432_v11 }
  0x6a   : > { %1962 = vmatpush.bf16.msra.mxu3 %v3217_v17  ;;  %v512_v17 = vld [vmem:[#allocation1 + $0x9] sm:$0xff] }
  0x6b   : > { %1924 = vmatpush.bf16.msra.mxu0 %v3017_v26  ;;  %v3783_v26 = vld [vmem:[%s3969_s28 + $0x654] sm:$0xf0] }
  0x6c   : > { %1937 = vmatpush.bf16.msra.mxu1 %v3081_v28  ;;  %v3360_v28 = vld [vmem:[%s3969_s28 + $0x6d0] sm:$0xf]  ;;  %v3297_v35 = vor.u32 %v3783_v26, %v3296_v25  ;;  %v3823_v25 = vld [vmem:[%s3969_s28 + $0x794] sm:$0xf0] }
  0x6d   : > { %1950 = vmatpush.bf16.msra.mxu2 %v3145_v29  ;;  %v3497_v29 = vor.u32 %v3833_v15, %v3496_v14  ;;  %v3361_v36 = vor.u32 %v3799_v30, %v3360_v28  ;;  %v3264_v14 = vld [vmem:[%s3969_s28 + $0x610] sm:$0xf]  ;;  %v3775_v15 = vld [vmem:[%s3969_s28 + $0x614] sm:$0xf0]  ;;  %v3256_v28 = vld [vmem:[%s3969_s28 + $0x600] sm:$0xf] }
  0x6e   : > { %1963 = vmatpush.bf16.msra.mxu3 %v3209_v33  ;;  %v3488_v33 = vld [vmem:[%s3969_s28 + $0x7d0] sm:$0xf]  ;;  %v3265_v26 = vor.u32 %v3775_v15, %v3264_v14  ;;  %v2594_v14 = vld [vmem:[%s3969_s28 + $0xd8] sm:$0xf0]  ;;  %v3622_v15 = vld [vmem:[%s3969_s28 + $0x154] sm:$0xf] }
  0x6f   : > { %1925 = vmatpush.bf16.msra.mxu0 %v3009_v39  ;;  %v3781_v39 = vld [vmem:[%s3969_s28 + $0x644] sm:$0xf0]  ;;  %v3489_v41 = vor.u32 %v3831_v34, %v3488_v33  ;;  %v3384_v34 = vld [vmem:[%s3969_s28 + $0x700] sm:$0xf] }
  0x70   : > { %1938 = vmatpush.bf16.msra.mxu1 %v3073_v42  ;;  %v3797_v42 = vld [vmem:[%s3969_s28 + $0x6c4] sm:$0xf0] }
  0x71   : > { %1951 = vmatpush.bf16.msra.mxu2 %v3137_v43  ;;  %v3416_v43 = vld [vmem:[%s3969_s28 + $0x740] sm:$0xf]  ;;  %v3353_v48 = vor.u32 %v3797_v42, %v3352_v40  ;;  %v3789_v33 = vld [vmem:[%s3969_s28 + $0x684] sm:$0xf0]  ;;  %v2546_v40 = vld [vmem:[%s3969_s28 + $0x78] sm:$0xf0] }
  0x72   : > { %1964 = vmatpush.bf16.msra.mxu3 %v3201_v47  ;;  %v3289_v47 = vor.u32 %v3781_v39, %v3288_v38  ;;  %v3417_v49 = vor.u32 %v3813_v44, %v3416_v43  ;;  %v3821_v38 = vld [vmem:[%s3969_s28 + $0x784] sm:$0xf0]  ;;  %v3594_v39 = vld [vmem:[%s3969_s28 + $0x74] sm:$0xf]  ;;  %v2610_v43 = vld [vmem:[%s3969_s28 + $0xf8] sm:$0xf0]  ;;  %v3321_v46 = vor.u32 %v3789_v33, %v3320_v32 }
  0x73   : > { %1926 = vmatpush.bf16.msra.mxu0 %v3001_v54  ;;  %v3795_v54 = vld [vmem:[%s3969_s28 + $0x6b4] sm:$0xf0]  ;;  %v3626_v44 = vld [vmem:[%s3969_s28 + $0x174] sm:$0xf]  ;;  %v2650_v32 = vld [vmem:[%s3969_s28 + $0x148] sm:$0xf0] }
  0x74   : > { %1939 = vmatpush.bf16.msra.mxu1 %v3065_v58  ;;  %v3827_v58 = vld [vmem:[%s3969_s28 + $0x7b4] sm:$0xf0]  ;;  %v3345_v60 = vor.u32 %v3795_v54, %v3344_v52  ;;  %v3592_v54 = vld [vmem:[%s3969_s28 + $0x64] sm:$0xf] }
  0x75   : > { %1952 = vmatpush.bf16.msra.mxu2 %v3129_v59  ;;  %v3281_v59 = vor.u32 %v3779_v51, %v3280_v50  ;;  %v2549_v51 = vor.u32 %v3594_v39, %v2546_v40  ;;  %v3636_v33 = vld [vmem:[%s3969_s28 + $0x1c4] sm:$0xf]  ;;  %v2514_v39 = vld [vmem:[%s3969_s28 + $0x38] sm:$0xf0]  ;;  %v3602_v40 = vld [vmem:[%s3969_s28 + $0xb4] sm:$0xf] }
  0x76   : > { %1965 = vmatpush.bf16.msra.mxu3 %v3193_v63  ;;  %1927 = vmatmul.bf16.vlgmr.msra.gmra.mxu0 %v511_v13  ;;  %v3272_v63 = vld [vmem:[%s3969_s28 + $0x620] sm:$0xf]  ;;  %v3401_v13 = vor.u32 %v3809_v8, %v3400_v7  ;;  %v2541_v7 = vor.u32 %v3592_v54, %v2538_v55  ;;  %v2570_v54 = vld [vmem:[%s3969_s28 + $0xa8] sm:$0xf0]  ;;  %v3616_v55 = vld [vmem:[%s3969_s28 + $0x124] sm:$0xf] }
  0x77   : > { %1971 = vmatpush.bf16.msrb.mxu0 %v3313_v0  ;;  %1940 = vmatmul.bf16.vlgmr.msra.gmra.mxu1 %v512_v17  ;;  %v3777_v0 = vld [vmem:[%s3969_s28 + $0x624] sm:$0xf0] }
  0x78   : > { %1984 = vmatpush.bf16.msrb.mxu1 %v3377_v4  ;;  %1953 = vmatmul.bf16.vlgmr.msra.gmra.mxu2 %v513_v16  ;;  %v3336_v4 = vld [vmem:[%s3969_s28 + $0x6a0] sm:$0xf]  ;;  %v3273_v11 = vor.u32 %v3777_v0, %v3272_v63  ;;  %v3328_v16 = vld [vmem:[%s3969_s28 + $0x690] sm:$0xf]  ;;  %v3640_v63 = vld [vmem:[%s3969_s28 + $0x1e4] sm:$0xf] }
  0x79   : > { %1997 = vmatpush.bf16.msrb.mxu2 %v3441_v5  ;;  %1966 = vmatmul.bf16.vlgmr.msra.gmra.mxu3 %v514_v18  ;;  %v3473_v5 = vor.u32 %v3827_v58, %v3472_v57  ;;  %v3337_v12 = vor.u32 %v3793_v6, %v3336_v4  ;;  %v3791_v18 = vld [vmem:[%s3969_s28 + $0x694] sm:$0xf0]  ;;  %v2602_v58 = vld [vmem:[%s3969_s28 + $0xe8] sm:$0xf0]  ;;  %v518_v6 = vld [vmem:[#allocation1 + $0x3f] sm:$0xff] }
  0x7a   : > { %2010 = vmatpush.bf16.msrb.mxu3 %v3505_v9  ;;  %v3464_v9 = vld [vmem:[%s3969_s28 + $0x7a0] sm:$0xf]  ;;  %v3329_v30 = vor.u32 %v3791_v18, %v3328_v16  ;;  %v2730_v0 = vld [vmem:[%s3969_s28 + $0x1e8] sm:$0xf0]  ;;  %v517_v4 = vld [vmem:[#allocation1 + $0x36] sm:$0xff]  ;;  %v2605_v8 = vor.u32 %v3608_v56, %v2602_v58 }
  0x7b   : > { %1972 = vmatpush.bf16.msrb.mxu0 %v3305_v19  ;;  %v3465_v17 = vor.u32 %v3825_v10, %v3464_v9  ;;  %v3392_v19 = vld [vmem:[%s3969_s28 + $0x710] sm:$0xf]  ;;  %v3590_v10 = vld [vmem:[%s3969_s28 + $0x54] sm:$0xf]  ;;  %v2658_v16 = vld [vmem:[%s3969_s28 + $0x158] sm:$0xf0] }
  0x7c   : > { %1985 = vmatpush.bf16.msrb.mxu1 %v3369_v20  ;;  %v3807_v20 = vld [vmem:[%s3969_s28 + $0x714] sm:$0xf0]  ;;  %v2722_v18 = vld [vmem:[%s3969_s28 + $0x1d8] sm:$0xf0]  ;;  %v2634_v56 = vld [vmem:[%s3969_s28 + $0x128] sm:$0xf0] }
  0x7d   : > { %1998 = vmatpush.bf16.msrb.mxu2 %v3433_v24  ;;  %v3456_v24 = vld [vmem:[%s3969_s28 + $0x790] sm:$0xf]  ;;  %v3393_v31 = vor.u32 %v3807_v20, %v3392_v19  ;;  %v2698_v58 = vld [vmem:[%s3969_s28 + $0x1a8] sm:$0xf0] }
  0x7e   : > { %2011 = vmatpush.bf16.msrb.mxu3 %v3497_v29  ;;  %v3773_v29 = vld [vmem:[%s3969_s28 + $0x604] sm:$0xf0] }
  0x7f   : > { %1973 = vmatpush.bf16.msrb.mxu0 %v3297_v35  ;;  %v3457_v35 = vor.u32 %v3823_v25, %v3456_v24  ;;  %v3257_v42 = vor.u32 %v3773_v29, %v3256_v28  ;;  %v2661_v24 = vor.u32 %v3622_v15, %v2658_v16  ;;  %v3588_v25 = vld [vmem:[%s3969_s28 + $0x44] sm:$0xf] }
  0x80   : > { %1986 = vmatpush.bf16.msrb.mxu1 %v3361_v36  ;;  %v3805_v36 = vld [vmem:[%s3969_s28 + $0x704] sm:$0xf0]  ;;  %v3604_v28 = vld [vmem:[%s3969_s28 + $0xc4] sm:$0xf] }
  0x81   : > { %1999 = vmatpush.bf16.msrb.mxu2 %v3425_v37  ;;  %v3448_v37 = vld [vmem:[%s3969_s28 + $0x780] sm:$0xf]  ;;  %v3596_v16 = vld [vmem:[%s3969_s28 + $0x84] sm:$0xf] }
  0x82   : > { %2012 = vmatpush.bf16.msrb.mxu3 %v3489_v41  ;;  %v3610_v41 = vld [vmem:[%s3969_s28 + $0xf4] sm:$0xf]  ;;  %v3449_v50 = vor.u32 %v3821_v38, %v3448_v37 }
  0x83   : > { %1974 = vmatpush.bf16.msrb.mxu0 %v3289_v47  ;;  %v3385_v47 = vor.u32 %v3805_v36, %v3384_v34  ;;  %v2613_v52 = vor.u32 %v3610_v41, %v2610_v43  ;;  %v2714_v34 = vld [vmem:[%s3969_s28 + $0x1c8] sm:$0xf0]  ;;  %v3586_v38 = vld [vmem:[%s3969_s28 + $0x34] sm:$0xf] }
  0x84   : > { %1987 = vmatpush.bf16.msrb.mxu1 %v3353_v48  ;;  %v3642_v48 = vld [vmem:[%s3969_s28 + $0x1f4] sm:$0xf]  ;;  %v2717_v41 = vor.u32 %v3636_v33, %v2714_v34  ;;  %v2930_v33 = vld [vmem:[%s3969_s28 + $0x378] sm:$0xf0] }
  0x85   : > { %2000 = vmatpush.bf16.msrb.mxu2 %v3417_v49  ;;  %v2738_v49 = vld [vmem:[%s3969_s28 + $0x1f8] sm:$0xf0]  ;;  %v3618_v43 = vld [vmem:[%s3969_s28 + $0x134] sm:$0xf] }
  0x86   : > { %2013 = vmatpush.bf16.msrb.mxu3 %v3481_v53  ;;  %v2677_v53 = vor.u32 %v3626_v44, %v2674_v45  ;;  %v2741_v57 = vor.u32 %v3642_v48, %v2738_v49  ;;  %v2642_v44 = vld [vmem:[%s3969_s28 + $0x138] sm:$0xf0]  ;;  %v3634_v45 = vld [vmem:[%s3969_s28 + $0x1b4] sm:$0xf] }
  0x87   : > { %1975 = vmatpush.bf16.msrb.mxu0 %v3281_v59  ;;  %v3624_v59 = vld [vmem:[%s3969_s28 + $0x164] sm:$0xf]  ;;  %v2645_v49 = vor.u32 %v3618_v43, %v2642_v44  ;;  %v2794_v43 = vld [vmem:[%s3969_s28 + $0x268] sm:$0xf0] }
  0x88   : > { %1988 = vmatpush.bf16.msrb.mxu1 %v3345_v60  ;;  %v2666_v60 = vld [vmem:[%s3969_s28 + $0x168] sm:$0xf0]  ;;  %v3672_v44 = vld [vmem:[%s3969_s28 + $0x2e4] sm:$0xf] }
  0x89   : > { %2001 = vmatpush.bf16.msrb.mxu2 %v3409_v62  ;;  %v515_v62 = vld [vmem:[#allocation1 + $0x24] sm:$0xff]  ;;  %v2669_v9 = vor.u32 %v3624_v59, %v2666_v60 }
  0x8a   : > { %2014 = vmatpush.bf16.msrb.mxu3 %v3473_v5  ;;  %v516_v5 = vld [vmem:[#allocation1 + $0x2d] sm:$0xff] }
  0x8b   : > { %1976 = vmatpush.bf16.msrb.mxu0 %v3273_v11  ;;  %v2530_v11 = vld [vmem:[%s3969_s28 + $0x58] sm:$0xf0] }
  0x8c   : > { %1989 = vmatpush.bf16.msrb.mxu1 %v3337_v12  ;;  %v3606_v12 = vld [vmem:[%s3969_s28 + $0xd4] sm:$0xf]  ;;  %v2533_v19 = vor.u32 %v3590_v10, %v2530_v11  ;;  %v2690_v10 = vld [vmem:[%s3969_s28 + $0x198] sm:$0xf0] }
  0x8d   : > { %2002 = vmatpush.bf16.msrb.mxu2 %v3401_v13  ;;  %v2733_v13 = vor.u32 %v3640_v63, %v2730_v0  ;;  %v2597_v20 = vor.u32 %v3606_v12, %v2594_v14  ;;  %v3582_v63 = vld [vmem:[%s3969_s28 + $0x14] sm:$0xf]  ;;  %v2498_v0 = vld [vmem:[%s3969_s28 + $0x18] sm:$0xf0]  ;;  %v3580_v12 = vld [vmem:[%s3969_s28 + $0x4] sm:$0xf] }
  0x8e   : > { %2015 = vmatpush.bf16.msrb.mxu3 %v3465_v17  ;;  %v3638_v17 = vld [vmem:[%s3969_s28 + $0x1d4] sm:$0xf]  ;;  %v2501_v11 = vor.u32 %v3582_v63, %v2498_v0  ;;  %v2978_v63 = vld [vmem:[%s3969_s28 + $0x3d8] sm:$0xf0] }
  0x8f   : > { %1977 = vmatpush.bf16.msrb.mxu0 %v3265_v26  ;;  %v2522_v26 = vld [vmem:[%s3969_s28 + $0x48] sm:$0xf0]  ;;  %v2725_v29 = vor.u32 %v3638_v17, %v2722_v18  ;;  %v3612_v18 = vld [vmem:[%s3969_s28 + $0x104] sm:$0xf] }
  0x90   : > { %1990 = vmatpush.bf16.msrb.mxu1 %v3329_v30  ;;  %v2586_v30 = vld [vmem:[%s3969_s28 + $0xc8] sm:$0xf0] }
  0x91   : > { %2003 = vmatpush.bf16.msrb.mxu2 %v3393_v31  ;;  %v3620_v31 = vld [vmem:[%s3969_s28 + $0x144] sm:$0xf]  ;;  %v2589_v36 = vor.u32 %v3604_v28, %v2586_v30  ;;  %v2554_v17 = vld [vmem:[%s3969_s28 + $0x88] sm:$0xf0]  ;;  %v2802_v28 = vld [vmem:[%s3969_s28 + $0x278] sm:$0xf0] }
  0x92   : > { %2016 = vmatpush.bf16.msrb.mxu3 %v3457_v35  ;;  %v2525_v35 = vor.u32 %v3588_v25, %v2522_v26  ;;  %v2653_v37 = vor.u32 %v3620_v31, %v2650_v32  ;;  %v2682_v25 = vld [vmem:[%s3969_s28 + $0x188] sm:$0xf0]  ;;  %v3658_v26 = vld [vmem:[%s3969_s28 + $0x274] sm:$0xf]  ;;  %v2866_v31 = vld [vmem:[%s3969_s28 + $0x2f8] sm:$0xf0]  ;;  %v2557_v34 = vor.u32 %v3596_v16, %v2554_v17 }
  0x93   : > { %1978 = vmatpush.bf16.msrb.mxu0 %v3257_v42  ;;  %v2578_v42 = vld [vmem:[%s3969_s28 + $0xb8] sm:$0xf0]  ;;  %v3690_v32 = vld [vmem:[%s3969_s28 + $0x374] sm:$0xf] }
  0x94   : > { %1991 = vmatpush.bf16.msrb.mxu1 %v3321_v46  ;;  %v2706_v46 = vld [vmem:[%s3969_s28 + $0x1b8] sm:$0xf0]  ;;  %v2581_v48 = vor.u32 %v3602_v40, %v2578_v42  ;;  %v3656_v42 = vld [vmem:[%s3969_s28 + $0x264] sm:$0xf]  ;;  %v3666_v16 = vld [vmem:[%s3969_s28 + $0x2b4] sm:$0xf] }
  0x95   : > { %2004 = vmatpush.bf16.msrb.mxu2 %v3385_v47  ;;  %v2517_v47 = vor.u32 %v3586_v38, %v2514_v39  ;;  %v2805_v39 = vor.u32 %v3658_v26, %v2802_v28 }
  0x96   : > { %2017 = vmatpush.bf16.msrb.mxu3 %v3449_v50  ;;  %1979 = vmatmul.bf16.vlgmr.msrb.gmra.mxu0 %v515_v62  ;;  %v3584_v50 = vld [vmem:[%s3969_s28 + $0x24] sm:$0xf]  ;;  %v2637_v62 = vor.u32 %v3616_v55, %v2634_v56  ;;  %v2786_v55 = vld [vmem:[%s3969_s28 + $0x258] sm:$0xf0]  ;;  %v3670_v56 = vld [vmem:[%s3969_s28 + $0x2d4] sm:$0xf] }
  0x97   : > { %2023 = vmatpush.bf16.msra.mxu0 %v2549_v51  ;;  %1992 = vmatmul.bf16.vlgmr.msrb.gmra.mxu1 %v516_v5  ;;  %v2506_v51 = vld [vmem:[%s3969_s28 + $0x28] sm:$0xf0] }
  0x98   : > { %2036 = vmatpush.bf16.msra.mxu1 %v2613_v52  ;;  %2005 = vmatmul.bf16.vlgmr.msrb.gmra.mxu2 %v517_v4  ;;  %v3600_v52 = vld [vmem:[%s3969_s28 + $0xa4] sm:$0xf]  ;;  %v2509_v59 = vor.u32 %v3584_v50, %v2506_v51  ;;  %v3598_v4 = vld [vmem:[%s3969_s28 + $0x94] sm:$0xf]  ;;  %v2986_v50 = vld [vmem:[%s3969_s28 + $0x3e8] sm:$0xf0]  ;;  %v2797_v51 = vor.u32 %v3656_v42, %v2794_v43 }
  0x99   : > { %2049 = vmatpush.bf16.msra.mxu2 %v2677_v53  ;;  %2018 = vmatmul.bf16.vlgmr.msrb.gmra.mxu3 %v518_v6  ;;  %v2709_v53 = vor.u32 %v3634_v45, %v2706_v46  ;;  %v2573_v60 = vor.u32 %v3600_v52, %v2570_v54  ;;  %v2562_v6 = vld [vmem:[%s3969_s28 + $0x98] sm:$0xf0]  ;;  %v2858_v46 = vld [vmem:[%s3969_s28 + $0x2e8] sm:$0xf0]  ;;  %v3654_v54 = vld [vmem:[%s3969_s28 + $0x254] sm:$0xf] }
  0x9a   : > { %2062 = vmatpush.bf16.msra.mxu3 %v2741_v57  ;;  %v3632_v57 = vld [vmem:[%s3969_s28 + $0x1a4] sm:$0xf]  ;;  %v2565_v14 = vor.u32 %v3598_v4, %v2562_v6  ;;  %v2861_v52 = vor.u32 %v3672_v44, %v2858_v46  ;;  %v2789_v0 = vor.u32 %v3654_v54, %v2786_v55  ;;  %v2778_v6 = vld [vmem:[%s3969_s28 + $0x248] sm:$0xf0]  ;;  %v3646_v43 = vld [vmem:[%s3969_s28 + $0x214] sm:$0xf] }
  0x9b   : > { %2024 = vmatpush.bf16.msra.mxu0 %v2541_v7  ;;  %v2701_v5 = vor.u32 %v3632_v57, %v2698_v58  ;;  %v3614_v7 = vld [vmem:[%s3969_s28 + $0x114] sm:$0xf]  ;;  %v2850_v58 = vld [vmem:[%s3969_s28 + $0x2d8] sm:$0xf0]  ;;  %v3644_v55 = vld [vmem:[%s3969_s28 + $0x204] sm:$0xf] }
  0x9c   : > { %2037 = vmatpush.bf16.msra.mxu1 %v2605_v8  ;;  %v2626_v8 = vld [vmem:[%s3969_s28 + $0x118] sm:$0xf0]  ;;  %v2853_v4 = vor.u32 %v3670_v56, %v2850_v58  ;;  %v2746_v56 = vld [vmem:[%s3969_s28 + $0x208] sm:$0xf0] }
  0x9d   : > { %2050 = vmatpush.bf16.msra.mxu2 %v2669_v9  ;;  %v3630_v9 = vld [vmem:[%s3969_s28 + $0x194] sm:$0xf]  ;;  %v2629_v15 = vor.u32 %v3614_v7, %v2626_v8  ;;  %v3668_v7 = vld [vmem:[%s3969_s28 + $0x2c4] sm:$0xf]  ;;  %v2842_v8 = vld [vmem:[%s3969_s28 + $0x2c8] sm:$0xf0] }
  0x9e   : > { %2063 = vmatpush.bf16.msra.mxu3 %v2733_v13  ;;  %v2490_v13 = vld [vmem:[%s3969_s28 + $0x8] sm:$0xf0]  ;;  %v2754_v44 = vld [vmem:[%s3969_s28 + $0x218] sm:$0xf0] }
  0x9f   : > { %2025 = vmatpush.bf16.msra.mxu0 %v2533_v19  ;;  %v2693_v19 = vor.u32 %v3630_v9, %v2690_v10  ;;  %v2493_v30 = vor.u32 %v3580_v12, %v2490_v13  ;;  %v2906_v9 = vld [vmem:[%s3969_s28 + $0x348] sm:$0xf0]  ;;  %v3700_v10 = vld [vmem:[%s3969_s28 + $0x3c4] sm:$0xf]  ;;  %v2845_v12 = vor.u32 %v3668_v7, %v2842_v8  ;;  %v2757_v54 = vor.u32 %v3646_v43, %v2754_v44  ;;  %v3058_v8 = vld [vmem:[%s3969_s28 + $0x478] sm:$0xf0] }
  0xa0   : > { %2038 = vmatpush.bf16.msra.mxu1 %v2597_v20  ;;  %v2618_v20 = vld [vmem:[%s3969_s28 + $0x108] sm:$0xf0]  ;;  %v3734_v43 = vld [vmem:[%s3969_s28 + $0x4d4] sm:$0xf] }
  0xa1   : > { %2051 = vmatpush.bf16.msra.mxu2 %v2661_v24  ;;  %v3628_v24 = vld [vmem:[%s3969_s28 + $0x184] sm:$0xf] }
  0xa2   : > { %2064 = vmatpush.bf16.msra.mxu3 %v2725_v29  ;;  %v3674_v29 = vld [vmem:[%s3969_s28 + $0x2f4] sm:$0xf]  ;;  %v2685_v38 = vor.u32 %v3628_v24, %v2682_v25  ;;  %v2962_v25 = vld [vmem:[%s3969_s28 + $0x3b8] sm:$0xf0] }
  0xa3   : > { %2026 = vmatpush.bf16.msra.mxu0 %v2525_v35  ;;  %v2621_v35 = vor.u32 %v3612_v18, %v2618_v20  ;;  %v2869_v40 = vor.u32 %v3674_v29, %v2866_v31  ;;  %v2834_v18 = vld [vmem:[%s3969_s28 + $0x2b8] sm:$0xf0]  ;;  %v3698_v24 = vld [vmem:[%s3969_s28 + $0x3b4] sm:$0xf]  ;;  %v2762_v31 = vld [vmem:[%s3969_s28 + $0x228] sm:$0xf0] }
  0xa4   : > { %2039 = vmatpush.bf16.msra.mxu1 %v2589_v36  ;;  %v3706_v36 = vld [vmem:[%s3969_s28 + $0x3f4] sm:$0xf]  ;;  %v2898_v20 = vld [vmem:[%s3969_s28 + $0x338] sm:$0xf0]  ;;  %v2837_v28 = vor.u32 %v3666_v16, %v2834_v18 }
  0xa5   : > { %2052 = vmatpush.bf16.msra.mxu2 %v2653_v37  ;;  %v2994_v37 = vld [vmem:[%s3969_s28 + $0x3f8] sm:$0xf0]  ;;  %v3770_v16 = vld [vmem:[%s3969_s28 + $0x5f4] sm:$0xf] }
  0xa6   : > { %2065 = vmatpush.bf16.msra.mxu3 %v2717_v41  ;;  %v2933_v41 = vor.u32 %v3690_v32, %v2930_v33  ;;  %v2997_v45 = vor.u32 %v3706_v36, %v2994_v37  ;;  %v3664_v32 = vld [vmem:[%s3969_s28 + $0x2a4] sm:$0xf]  ;;  %v2965_v33 = vor.u32 %v3698_v24, %v2962_v25  ;;  %v2890_v36 = vld [vmem:[%s3969_s28 + $0x328] sm:$0xf0] }
  0xa7   : > { %2027 = vmatpush.bf16.msra.mxu0 %v2517_v47  ;;  %v3688_v47 = vld [vmem:[%s3969_s28 + $0x364] sm:$0xf] }
  0xa8   : > { %2040 = vmatpush.bf16.msra.mxu1 %v2581_v48  ;;  %v2922_v48 = vld [vmem:[%s3969_s28 + $0x368] sm:$0xf0]  ;;  %v3696_v37 = vld [vmem:[%s3969_s28 + $0x3a4] sm:$0xf] }
  0xa9   : > { %2053 = vmatpush.bf16.msra.mxu2 %v2645_v49  ;;  %v3704_v49 = vld [vmem:[%s3969_s28 + $0x3e4] sm:$0xf] }
  0xaa   : > { %2066 = vmatpush.bf16.msra.mxu3 %v2709_v53  ;;  %v2925_v53 = vor.u32 %v3688_v47, %v2922_v48  ;;  %v2989_v57 = vor.u32 %v3704_v49, %v2986_v50  ;;  %v2818_v48 = vld [vmem:[%s3969_s28 + $0x298] sm:$0xf0]  ;;  %v3678_v49 = vld [vmem:[%s3969_s28 + $0x314] sm:$0xf] }
  0xab   : > { %2028 = vmatpush.bf16.msra.mxu0 %v2509_v59  ;;  %v3686_v59 = vld [vmem:[%s3969_s28 + $0x354] sm:$0xf]  ;;  %v2882_v50 = vld [vmem:[%s3969_s28 + $0x318] sm:$0xf0] }
  0xac   : > { %2041 = vmatpush.bf16.msra.mxu1 %v2573_v60  ;;  %v2914_v60 = vld [vmem:[%s3969_s28 + $0x358] sm:$0xf0]  ;;  %v2885_v58 = vor.u32 %v3678_v49, %v2882_v50 }
  0xad   : > { %2054 = vmatpush.bf16.msra.mxu2 %v2637_v62  ;;  %v3702_v62 = vld [vmem:[%s3969_s28 + $0x3d4] sm:$0xf]  ;;  %v3234_v49 = vld [vmem:[%s3969_s28 + $0x5d8] sm:$0xf0] }
  0xae   : > { %2067 = vmatpush.bf16.msra.mxu3 %v2701_v5  ;;  %v2917_v5 = vor.u32 %v3686_v59, %v2914_v60  ;;  %v3660_v59 = vld [vmem:[%s3969_s28 + $0x284] sm:$0xf]  ;;  %v2810_v60 = vld [vmem:[%s3969_s28 + $0x288] sm:$0xf0] }
  0xaf   : > { %2029 = vmatpush.bf16.msra.mxu0 %v2501_v11 }
  0xb0   : > { %2042 = vmatpush.bf16.msra.mxu1 %v2565_v14  ;;  %v3650_v14 = vld [vmem:[%s3969_s28 + $0x234] sm:$0xf] }
  0xb1   : > { %2055 = vmatpush.bf16.msra.mxu2 %v2629_v15  ;;  %v2770_v15 = vld [vmem:[%s3969_s28 + $0x238] sm:$0xf0] }
  0xb2   : > { %2068 = vmatpush.bf16.msra.mxu3 %v2693_v19  ;;  %v3682_v19 = vld [vmem:[%s3969_s28 + $0x334] sm:$0xf]  ;;  %v2773_v26 = vor.u32 %v3650_v14, %v2770_v15  ;;  %v2813_v14 = vor.u32 %v3660_v59, %v2810_v60 }
  0xb3   : > { %2030 = vmatpush.bf16.msra.mxu0 %v2493_v30  ;;  %v2901_v29 = vor.u32 %v3682_v19, %v2898_v20  ;;  %v3648_v30 = vld [vmem:[%s3969_s28 + $0x224] sm:$0xf] }
  0xb4   : > { %2043 = vmatpush.bf16.msra.mxu1 %v2557_v34  ;;  %v2826_v34 = vld [vmem:[%s3969_s28 + $0x2a8] sm:$0xf0] }
  0xb5   : > { %2056 = vmatpush.bf16.msra.mxu2 %v2621_v35  ;;  %v3680_v35 = vld [vmem:[%s3969_s28 + $0x324] sm:$0xf] }
  0xb6   : > { %2069 = vmatpush.bf16.msra.mxu3 %v2685_v38  ;;  %2031 = vmatmul.bf16.vlgmr.msra.gmra.mxu0 %v4075_v22  ;;  %v2981_v22 = vor.u32 %v3702_v62, %v2978_v63  ;;  %v2954_v38 = vld [vmem:[%s3969_s28 + $0x3a8] sm:$0xf0]  ;;  %v2893_v42 = vor.u32 %v3680_v35, %v2890_v36  ;;  %v3676_v62 = vld [vmem:[%s3969_s28 + $0x304] sm:$0xf] }
  0xb7   : > { %2075 = vmatpush.bf16.msrb.mxu0 %v2805_v39  ;;  %2044 = vmatmul.bf16.vlgmr.msra.gmra.mxu1 %v4082_v27  ;;  %v2970_v27 = vld [vmem:[%s3969_s28 + $0x3c8] sm:$0xf0]  ;;  %v2765_v39 = vor.u32 %v3648_v30, %v2762_v31  ;;  %v2957_v47 = vor.u32 %v3696_v37, %v2954_v38 }
  0xb8   : > { %2088 = vmatpush.bf16.msrb.mxu1 %v2869_v40  ;;  %2057 = vmatmul.bf16.vlgmr.msra.gmra.mxu2 %v4073_v21  ;;  %v3652_v21 = vld [vmem:[%s3969_s28 + $0x244] sm:$0xf]  ;;  %v2973_v17 = vor.u32 %v3700_v10, %v2970_v27  ;;  %v1824_v40 = vpop.f32.mrf.mxu0  ;;  %v3122_v10 = vld [vmem:[%s3969_s28 + $0x4f8] sm:$0xf0]  ;;  %v3754_v27 = vld [vmem:[%s3969_s28 + $0x574] sm:$0xf] }
  0xb9   : > { %2101 = vmatpush.bf16.msrb.mxu2 %v2933_v41  ;;  %2070 = vmatmul.bf16.vlgmr.msra.gmra.mxu3 %v4077_v23  ;;  %v3684_v23 = vld [vmem:[%s3969_s28 + $0x344] sm:$0xf]  ;;  %v2781_v11 = vor.u32 %v3652_v21, %v2778_v6  ;;  %v2829_v41 = vor.u32 %v3664_v32, %v2826_v34  ;;  %v2938_v21 = vld [vmem:[%s3969_s28 + $0x388] sm:$0xf0] }
  0xba   : > { %2114 = vmatpush.bf16.msrb.mxu3 %v2997_v45  ;;  %v2909_v13 = vor.u32 %v3684_v23, %v2906_v9  ;;  %v3662_v45 = vld [vmem:[%s3969_s28 + $0x294] sm:$0xf]  ;;  %v1837_v46 = vpop.f32.mrf.mxu1  ;;  %v2749_v9 = vor.u32 %v3644_v55, %v2746_v56  ;;  %v3114_v31 = vld [vmem:[%s3969_s28 + $0x4e8] sm:$0xf0]  ;;  %v3752_v32 = vld [vmem:[%s3969_s28 + $0x564] sm:$0xf] }
  0xbb   : > { %2076 = vmatpush.bf16.msrb.mxu0 %v2797_v51  ;;  %v1838_v51 = vadd.f32 %v1837_v46, %v1824_v40  ;;  %v3738_v23 = vld [vmem:[%s3969_s28 + $0x4f4] sm:$0xf]  ;;  %v3768_v34 = vld [vmem:[%s3969_s28 + $0x5e4] sm:$0xf]  ;;  %v3242_v35 = vld [vmem:[%s3969_s28 + $0x5e8] sm:$0xf0] }
  0xbc   : > { %2089 = vmatpush.bf16.msrb.mxu1 %v2861_v52  ;;  %v3694_v52 = vld [vmem:[%s3969_s28 + $0x394] sm:$0xf]  ;;  %v3125_v24 = vor.u32 %v3738_v23, %v3122_v10  ;;  %v3245_v44 = vor.u32 %v3768_v34, %v3242_v35  ;;  %v3748_v55 = vld [vmem:[%s3969_s28 + $0x544] sm:$0xf]  ;;  %v3162_v56 = vld [vmem:[%s3969_s28 + $0x548] sm:$0xf0] }
  0xbd   : > { %2102 = vmatpush.bf16.msrb.mxu2 %v2925_v53  ;;  %v2946_v53 = vld [vmem:[%s3969_s28 + $0x398] sm:$0xf0]  ;;  %v1850_v63 = vpop.f32.mrf.mxu2  ;;  %v3750_v46 = vld [vmem:[%s3969_s28 + $0x554] sm:$0xf] }
  0xbe   : > { %2115 = vmatpush.bf16.msrb.mxu3 %v2989_v57  ;;  %v2821_v57 = vor.u32 %v3662_v45, %v2818_v48  ;;  %v1851_v6 = vadd.f32 %v1850_v63, %v1838_v51  ;;  %v1863_v7 = vpop.f32.mrf.mxu3  ;;  %v3106_v45 = vld [vmem:[%s3969_s28 + $0x4d8] sm:$0xf0]  ;;  %v3766_v48 = vld [vmem:[%s3969_s28 + $0x5d4] sm:$0xf] }
  0xbf   : > { %2077 = vmatpush.bf16.msrb.mxu0 %v2789_v0  ;;  %v2949_v0 = vor.u32 %v3694_v52, %v2946_v53  ;;  %v3716_v52 = vld [vmem:[%s3969_s28 + $0x444] sm:$0xf]  ;;  %v3034_v53 = vld [vmem:[%s3969_s28 + $0x448] sm:$0xf0]  ;;  %v3714_v63 = vld [vmem:[%s3969_s28 + $0x434] sm:$0xf] }
  0xc0   : > { %2090 = vmatpush.bf16.msrb.mxu1 %v2853_v4  ;;  %v2874_v4 = vld [vmem:[%s3969_s28 + $0x308] sm:$0xf0]  ;;  %v3762_v23 = vld [vmem:[%s3969_s28 + $0x5b4] sm:$0xf]  ;;  %v3010_v35 = vld [vmem:[%s3969_s28 + $0x418] sm:$0xf0] }
  0xc1   : > { %2103 = vmatpush.bf16.msrb.mxu2 %v2917_v5  ;;  %v3692_v5 = vld [vmem:[%s3969_s28 + $0x384] sm:$0xf]  ;;  %v2877_v15 = vor.u32 %v3676_v62, %v2874_v4  ;;  %v3165_v62 = vor.u32 %v3748_v55, %v3162_v56  ;;  %v3730_v4 = vld [vmem:[%s3969_s28 + $0x4b4] sm:$0xf]  ;;  %v3314_v56 = vld [vmem:[%s3969_s28 + $0x678] sm:$0xf0] }
  0xc2   : > { %2116 = vmatpush.bf16.msrb.mxu3 %v2981_v22  ;;  %v3722_v22 = vld [vmem:[%s3969_s28 + $0x474] sm:$0xf]  ;;  %v1839_v18 = vpop.f32.mrf.mxu1  ;;  %v2941_v19 = vor.u32 %v3692_v5, %v2938_v21 }
  0xc3   : > { %2078 = vmatpush.bf16.msrb.mxu0 %v2781_v11  ;;  %v3186_v11 = vld [vmem:[%s3969_s28 + $0x578] sm:$0xf0]  ;;  %v3061_v20 = vor.u32 %v3722_v22, %v3058_v8  ;;  %v3746_v22 = vld [vmem:[%s3969_s28 + $0x534] sm:$0xf]  ;;  %v3082_v18 = vld [vmem:[%s3969_s28 + $0x4a8] sm:$0xf0] }
  0xc4   : > { %2091 = vmatpush.bf16.msrb.mxu1 %v2845_v12  ;;  %v4392_v12 = vadd.f32 %v1863_v7, %v1851_v6  ;;  %v3189_v25 = vor.u32 %v3754_v27, %v3186_v11  ;;  %v3090_v7 = vld [vmem:[%s3969_s28 + $0x4b8] sm:$0xf0]  ;;  %v3710_v34 = vld [vmem:[%s3969_s28 + $0x414] sm:$0xf] }
  0xc5   : > { %2104 = vmatpush.bf16.msrb.mxu2 %v2909_v13  ;;  %v1826_v13 = vpop.f32.mrf.mxu0  ;;  %v1852_v36 = vpop.f32.mrf.mxu2  ;;  %v3154_v8 = vld [vmem:[%s3969_s28 + $0x538] sm:$0xf0]  ;;  %v3093_v11 = vor.u32 %v3730_v4, %v3090_v7  ;;  %v3786_v55 = vld [vmem:[%s3969_s28 + $0x674] sm:$0xf] }
  0xc6   : > { %2117 = vmatpush.bf16.msrb.mxu3 %v2973_v17  ;;  %v3250_v17 = vld [vmem:[%s3969_s28 + $0x5f8] sm:$0xf0]  ;;  %v1865_v38 = vpop.f32.mrf.mxu3  ;;  %v3712_v13 = vld [vmem:[%s3969_s28 + $0x424] sm:$0xf]  ;;  %v3726_v36 = vld [vmem:[%s3969_s28 + $0x494] sm:$0xf] }
  0xc7   : > { %2079 = vmatpush.bf16.msrb.mxu0 %v2773_v26  ;;  %v3720_v26 = vld [vmem:[%s3969_s28 + $0x464] sm:$0xf]  ;;  %v3253_v30 = vor.u32 %v3770_v16, %v3250_v17  ;;  %v3506_v4 = vld [vmem:[%s3969_s28 + $0x7f8] sm:$0xf0] }
  0xc8   : > { %2092 = vmatpush.bf16.msrb.mxu1 %v2837_v28  ;;  %v3050_v28 = vld [vmem:[%s3969_s28 + $0x468] sm:$0xf0] }
  0xc9   : > { %2105 = vmatpush.bf16.msrb.mxu2 %v2901_v29  ;;  %v3736_v29 = vld [vmem:[%s3969_s28 + $0x4e4] sm:$0xf]  ;;  %v3053_v37 = vor.u32 %v3720_v26, %v3050_v28  ;;  %v3210_v28 = vld [vmem:[%s3969_s28 + $0x5a8] sm:$0xf0] }
  0xca   : > { %2118 = vmatpush.bf16.msrb.mxu3 %v2965_v33  ;;  %v3178_v33 = vld [vmem:[%s3969_s28 + $0x568] sm:$0xf0]  ;;  %v3760_v26 = vld [vmem:[%s3969_s28 + $0x5a4] sm:$0xf] }
  0xcb   : > { %2080 = vmatpush.bf16.msrb.mxu0 %v2765_v39  ;;  %v3117_v39 = vor.u32 %v3736_v29, %v3114_v31  ;;  %v3181_v40 = vor.u32 %v3752_v32, %v3178_v33  ;;  %v3213_v38 = vor.u32 %v3760_v26, %v3210_v28  ;;  %v3814_v26 = vld [vmem:[%s3969_s28 + $0x754] sm:$0xf]  ;;  %v3426_v28 = vld [vmem:[%s3969_s28 + $0x758] sm:$0xf0] }
  0xcc   : > { %2093 = vmatpush.bf16.msrb.mxu1 %v2829_v41  ;;  %v3718_v41 = vld [vmem:[%s3969_s28 + $0x454] sm:$0xf] }
  0xcd   : > { %2106 = vmatpush.bf16.msrb.mxu2 %v2893_v42  ;;  %v3042_v42 = vld [vmem:[%s3969_s28 + $0x458] sm:$0xf0] }
  0xce   : > { %2119 = vmatpush.bf16.msrb.mxu3 %v2957_v47  ;;  %v3170_v47 = vld [vmem:[%s3969_s28 + $0x558] sm:$0xf0]  ;;  %v3045_v50 = vor.u32 %v3718_v41, %v3042_v42  ;;  %v3758_v42 = vld [vmem:[%s3969_s28 + $0x594] sm:$0xf] }
  0xcf   : > { %2081 = vmatpush.bf16.msrb.mxu0 %v2757_v54  ;;  %v3173_v51 = vor.u32 %v3750_v46, %v3170_v47  ;;  %v3098_v54 = vld [vmem:[%s3969_s28 + $0x4c8] sm:$0xf0]  ;;  %v3138_v41 = vld [vmem:[%s3969_s28 + $0x518] sm:$0xf0] }
  0xd0   : > { %2094 = vmatpush.bf16.msrb.mxu1 %v2821_v57  ;;  %v3764_v57 = vld [vmem:[%s3969_s28 + $0x5c4] sm:$0xf]  ;;  %v3002_v46 = vld [vmem:[%s3969_s28 + $0x408] sm:$0xf0] }
  0xd1   : > { %2107 = vmatpush.bf16.msrb.mxu2 %v2885_v58  ;;  %v3226_v58 = vld [vmem:[%s3969_s28 + $0x5c8] sm:$0xf0] }
  0xd2   : > { %2120 = vmatpush.bf16.msrb.mxu3 %v2949_v0  ;;  %v3026_v0 = vld [vmem:[%s3969_s28 + $0x438] sm:$0xf0]  ;;  %v3229_v6 = vor.u32 %v3764_v57, %v3226_v58  ;;  %v3802_v57 = vld [vmem:[%s3969_s28 + $0x6f4] sm:$0xf] }
  0xd3   : > { %2082 = vmatpush.bf16.msrb.mxu0 %v2749_v9  ;;  %v1876_v59 = vpop.f32.mrf.mxu0  ;;  %v3218_v9 = vld [vmem:[%s3969_s28 + $0x5b8] sm:$0xf0]  ;;  %v3029_v27 = vor.u32 %v3714_v63, %v3026_v0  ;;  %v3834_v0 = vld [vmem:[%s3969_s28 + $0x7f4] sm:$0xf] }
  0xd4   : > { %2095 = vmatpush.bf16.msrb.mxu1 %v2813_v14  ;;  %v1877_v5 = vadd.f32 %v1876_v59, %v4392_v12  ;;  %v1889_v21 = vpop.f32.mrf.mxu1  ;;  %v3157_v12 = vor.u32 %v3746_v22, %v3154_v8  ;;  %v3018_v14 = vld [vmem:[%s3969_s28 + $0x428] sm:$0xf0]  ;;  %v3221_v17 = vor.u32 %v3762_v23, %v3218_v9  ;;  %v3818_v59 = vld [vmem:[%s3969_s28 + $0x774] sm:$0xf]  ;;  %v3784_v22 = vld [vmem:[%s3969_s28 + $0x664] sm:$0xf]  ;;  %v3509_v9 = vor.u32 %v3834_v0, %v3506_v4 }
  0xd5   : > { %2108 = vmatpush.bf16.msrb.mxu2 %v2877_v15  ;;  %v3728_v15 = vld [vmem:[%s3969_s28 + $0x4a4] sm:$0xf]  ;;  %v3021_v29 = vor.u32 %v3712_v13, %v3018_v14  ;;  %v3306_v8 = vld [vmem:[%s3969_s28 + $0x668] sm:$0xf0] }
  0xd6   : > { %2121 = vmatpush.bf16.msrb.mxu3 %v2941_v19  ;;  %2083 = vmatmul.bf16.vlgmr.msrb.gmra.mxu0 %v4114_v1  ;;  %v3732_v1 = vld [vmem:[%s3969_s28 + $0x4c4] sm:$0xf]  ;;  %v1890_v10 = vadd.f32 %v1889_v21, %v1877_v5  ;;  %v3085_v32 = vor.u32 %v3728_v15, %v3082_v18  ;;  %v3317_v21 = vor.u32 %v3786_v55, %v3314_v56  ;;  %v3498_v13 = vld [vmem:[%s3969_s28 + $0x7e8] sm:$0xf0]  ;;  %v3298_v18 = vld [vmem:[%s3969_s28 + $0x658] sm:$0xf0] }
  0xd7   : > { %2127 = vmatpush.bf16.msra.mxu0 %v3061_v20  ;;  %2096 = vmatmul.bf16.vlgmr.msrb.gmra.mxu1 %v4118_v3  ;;  %v3037_v3 = vor.u32 %v3716_v52, %v3034_v53  ;;  %v3101_v60 = vor.u32 %v3732_v1, %v3098_v54  ;;  %v3744_v19 = vld [vmem:[%s3969_s28 + $0x524] sm:$0xf]  ;;  %v3146_v20 = vld [vmem:[%s3969_s28 + $0x528] sm:$0xf0]  ;;  %v3309_v14 = vor.u32 %v3784_v22, %v3306_v8  ;;  %v3346_v55 = vld [vmem:[%s3969_s28 + $0x6b8] sm:$0xf0] }
  0xd8   : > { %2140 = vmatpush.bf16.msra.mxu1 %v3125_v24  ;;  %2109 = vmatmul.bf16.vlgmr.msrb.gmra.mxu2 %v4111_v61  ;;  %v3109_v61 = vor.u32 %v3734_v43, %v3106_v45  ;;  %v3149_v33 = vor.u32 %v3744_v19, %v3146_v20  ;;  %v3202_v43 = vld [vmem:[%s3969_s28 + $0x598] sm:$0xf0]  ;;  %v3708_v45 = vld [vmem:[%s3969_s28 + $0x404] sm:$0xf]  ;;  %v3130_v53 = vld [vmem:[%s3969_s28 + $0x508] sm:$0xf0] }
  0xd9   : > { %2153 = vmatpush.bf16.msra.mxu2 %v3189_v25  ;;  %2122 = vmatmul.bf16.vlgmr.msrb.gmra.mxu3 %v4116_v2  ;;  %v3237_v2 = vor.u32 %v3766_v48, %v3234_v49  ;;  %v3724_v49 = vld [vmem:[%s3969_s28 + $0x484] sm:$0xf]  ;;  %v3205_v52 = vor.u32 %v3758_v42, %v3202_v43  ;;  %v3005_v58 = vor.u32 %v3708_v45, %v3002_v46  ;;  %v3798_v19 = vld [vmem:[%s3969_s28 + $0x6d4] sm:$0xf]  ;;  %v3354_v42 = vld [vmem:[%s3969_s28 + $0x6c8] sm:$0xf0] }
  0xda   : > { %2166 = vmatpush.bf16.msra.mxu3 %v3253_v30  ;;  %v3756_v1 = vld [vmem:[%s3969_s28 + $0x584] sm:$0xf]  ;;  %v3810_v56 = vld [vmem:[%s3969_s28 + $0x734] sm:$0xf] }
  0xdb   : > { %2128 = vmatpush.bf16.msra.mxu0 %v3053_v37  ;;  %v1902_v16 = vpop.f32.mrf.mxu2  ;;  %v1878_v31 = vpop.f32.mrf.mxu0  ;;  %v3800_v23 = vld [vmem:[%s3969_s28 + $0x6e4] sm:$0xf] }
  0xdc   : > { %2141 = vmatpush.bf16.msra.mxu1 %v3117_v39  ;;  %v1903_v24 = vadd.f32 %v1902_v16, %v1890_v10  ;;  %v1915_v25 = vpop.f32.mrf.mxu3  ;;  %v1891_v37 = vpop.f32.mrf.mxu1  ;;  %v3074_v39 = vld [vmem:[%s3969_s28 + $0x498] sm:$0xf0]  ;;  %v3370_v10 = vld [vmem:[%s3969_s28 + $0x6e8] sm:$0xf0]  ;;  %v3868_v20 = vld [vmem:[#allocation1] sm:$0xff] }
  0xdd   : > { %2154 = vmatpush.bf16.msra.mxu2 %v3181_v40  ;;  %v3742_v40 = vld [vmem:[%s3969_s28 + $0x514] sm:$0xf]  ;;  %v3077_v47 = vor.u32 %v3726_v36, %v3074_v39  ;;  %v3373_v15 = vor.u32 %v3800_v23, %v3370_v10  ;;  %v3870_v31 = vld [vmem:[#allocation1 + $0x9] sm:$0xff]  ;;  %v3429_v37 = vor.u32 %v3814_v26, %v3426_v28  ;;  %v3812_v43 = vld [vmem:[%s3969_s28 + $0x744] sm:$0xf] }
  0xde   : > { %2167 = vmatpush.bf16.msra.mxu3 %v3245_v44  ;;  %v4441_v30 = vadd.f32 %v1915_v25, %v1903_v24  ;;  %v3013_v44 = vor.u32 %v3710_v34, %v3010_v35  ;;  %v3141_v48 = vor.u32 %v3742_v40, %v3138_v41  ;;  %v3362_v25 = vld [vmem:[%s3969_s28 + $0x6d8] sm:$0xf0]  ;;  %v3290_v39 = vld [vmem:[%s3969_s28 + $0x648] sm:$0xf0]  ;;  %v3796_v40 = vld [vmem:[%s3969_s28 + $0x6c4] sm:$0xf] }
  0xdf   : > { %2129 = vmatpush.bf16.msra.mxu0 %v3045_v50  ;;  %v3066_v50 = vld [vmem:[%s3969_s28 + $0x488] sm:$0xf0]  ;;  %v3871_v34 = vld [vmem:[#allocation1 + $0x1b] sm:$0xff]  ;;  %v3365_v36 = vor.u32 %v3798_v19, %v3362_v25  ;;  %v3828_v46 = vld [vmem:[%s3969_s28 + $0x7c4] sm:$0xf] }
  0xe0   : > { %2142 = vmatpush.bf16.msra.mxu1 %v3109_v61  ;;  %v3740_v61 = vld [vmem:[%s3969_s28 + $0x504] sm:$0xf]  ;;  %v3330_v19 = vld [vmem:[%s3969_s28 + $0x698] sm:$0xf0]  ;;  %v3822_v25 = vld [vmem:[%s3969_s28 + $0x794] sm:$0xf] }
  0xe1   : > { %2155 = vmatpush.bf16.msra.mxu2 %v3173_v51  ;;  %v3133_v63 = vor.u32 %v3740_v61, %v3130_v53  ;;  %v3357_v61 = vor.u32 %v3796_v40, %v3354_v42  ;;  %v3282_v53 = vld [vmem:[%s3969_s28 + $0x638] sm:$0xf0]  ;;  %v3792_v0 = vld [vmem:[%s3969_s28 + $0x6a4] sm:$0xf] }
  0xe2   : > { %2168 = vmatpush.bf16.msra.mxu3 %v3237_v2  ;;  %v3194_v2 = vld [vmem:[%s3969_s28 + $0x588] sm:$0xf0]  ;;  %v3824_v23 = vld [vmem:[%s3969_s28 + $0x7a4] sm:$0xf]  ;;  %v3458_v26 = vld [vmem:[%s3969_s28 + $0x798] sm:$0xf0] }
  0xe3   : > { %2130 = vmatpush.bf16.msra.mxu0 %v3037_v3  ;;  %v1904_v51 = vpop.f32.mrf.mxu2  ;;  %v3378_v3 = vld [vmem:[%s3969_s28 + $0x6f8] sm:$0xf0]  ;;  %v3197_v5 = vor.u32 %v3756_v1, %v3194_v2  ;;  %v3794_v1 = vld [vmem:[%s3969_s28 + $0x6b4] sm:$0xf]  ;;  %v3820_v40 = vld [vmem:[%s3969_s28 + $0x784] sm:$0xf] }
  0xe4   : > { %2143 = vmatpush.bf16.msra.mxu1 %v3101_v60  ;;  %v1917_v54 = vpop.f32.mrf.mxu3  ;;  %v3442_v60 = vld [vmem:[%s3969_s28 + $0x778] sm:$0xf0] }
  0xe5   : > { %2156 = vmatpush.bf16.msra.mxu2 %v3165_v62  ;;  %v3069_v62 = vor.u32 %v3724_v49, %v3066_v50  ;;  %v3445_v7 = vor.u32 %v3818_v59, %v3442_v60  ;;  %v3349_v59 = vor.u32 %v3794_v1, %v3346_v55 }
  0xe6   : > { %2169 = vmatpush.bf16.msra.mxu3 %v3229_v6  ;;  %v3381_v6 = vor.u32 %v3802_v57, %v3378_v3  ;;  %v3826_v57 = vld [vmem:[%s3969_s28 + $0x7b4] sm:$0xf] }
  0xe7   : > { %2131 = vmatpush.bf16.msra.mxu0 %v3029_v27  ;;  %v3816_v27 = vld [vmem:[%s3969_s28 + $0x764] sm:$0xf] }
  0xe8   : > { %2144 = vmatpush.bf16.msra.mxu1 %v3093_v11  ;;  %v3434_v11 = vld [vmem:[%s3969_s28 + $0x768] sm:$0xf0] }
  0xe9   : > { %2157 = vmatpush.bf16.msra.mxu2 %v3157_v12  ;;  %v3832_v12 = vld [vmem:[%s3969_s28 + $0x7e4] sm:$0xf]  ;;  %v3437_v16 = vor.u32 %v3816_v27, %v3434_v11 }
  0xea   : > { %2170 = vmatpush.bf16.msra.mxu3 %v3221_v17  ;;  %v3782_v17 = vld [vmem:[%s3969_s28 + $0x654] sm:$0xf]  ;;  %v3501_v24 = vor.u32 %v3832_v12, %v3498_v13 }
  0xeb   : > { %2132 = vmatpush.bf16.msra.mxu0 %v3021_v29  ;;  %v3869_v29 = vld [vmem:[#allocation1 + $0x12] sm:$0xff]  ;;  %v3301_v35 = vor.u32 %v3782_v17, %v3298_v18 }
  0xec   : > { %2145 = vmatpush.bf16.msra.mxu1 %v3085_v32  ;;  %v3830_v32 = vld [vmem:[%s3969_s28 + $0x7d4] sm:$0xf] }
  0xed   : > { %2158 = vmatpush.bf16.msra.mxu2 %v3149_v33  ;;  %v3490_v33 = vld [vmem:[%s3969_s28 + $0x7d8] sm:$0xf0]  ;;  %v3790_v17 = vld [vmem:[%s3969_s28 + $0x694] sm:$0xf] }
  0xee   : > { %2171 = vmatpush.bf16.msra.mxu3 %v3213_v38  ;;  %v3780_v38 = vld [vmem:[%s3969_s28 + $0x644] sm:$0xf]  ;;  %v3493_v41 = vor.u32 %v3830_v32, %v3490_v33  ;;  %v3258_v33 = vld [vmem:[%s3969_s28 + $0x608] sm:$0xf0] }
  0xef   : > { %2133 = vmatpush.bf16.msra.mxu0 %v3013_v44  ;;  %v3418_v44 = vld [vmem:[%s3969_s28 + $0x748] sm:$0xf0]  ;;  %v3293_v49 = vor.u32 %v3780_v38, %v3290_v39  ;;  %v3772_v32 = vld [vmem:[%s3969_s28 + $0x604] sm:$0xf] }
  0xf0   : > { %2146 = vmatpush.bf16.msra.mxu1 %v3077_v47  ;;  %v3482_v47 = vld [vmem:[%s3969_s28 + $0x7c8] sm:$0xf0]  ;;  %v3421_v51 = vor.u32 %v3812_v43, %v3418_v44  ;;  %v3261_v43 = vor.u32 %v3772_v32, %v3258_v33 }
  0xf1   : > { %2159 = vmatpush.bf16.msra.mxu2 %v3141_v48  ;;  %v3485_v2 = vor.u32 %v3828_v46, %v3482_v47  ;;  %v3386_v38 = vld [vmem:[%s3969_s28 + $0x708] sm:$0xf0]  ;;  %v3872_v47 = vld [vmem:[#allocation1 + $0x24] sm:$0xff] }
  0xf2   : > { %2172 = vmatpush.bf16.msra.mxu3 %v3205_v52  ;;  %v3778_v52 = vld [vmem:[%s3969_s28 + $0x634] sm:$0xf] }
  0xf3   : > { %2134 = vmatpush.bf16.msra.mxu0 %v3005_v58  ;;  %v1928_v45 = vpop.f32.mrf.mxu0  ;;  %v3474_v58 = vld [vmem:[%s3969_s28 + $0x7b8] sm:$0xf0]  ;;  %v3285_v3 = vor.u32 %v3778_v52, %v3282_v53 }
  0xf4   : > { %2147 = vmatpush.bf16.msra.mxu1 %v3069_v62  ;;  %v1929_v48 = vadd.f32 %v1928_v45, %v4441_v30  ;;  %v1941_v50 = vpop.f32.mrf.mxu1  ;;  %v3410_v30 = vld [vmem:[%s3969_s28 + $0x738] sm:$0xf0]  ;;  %v3776_v62 = vld [vmem:[%s3969_s28 + $0x624] sm:$0xf]  ;;  %v3477_v4 = vor.u32 %v3826_v57, %v3474_v58 }
  0xf5   : > { %2160 = vmatpush.bf16.msra.mxu2 %v3133_v63  ;;  %v3413_v60 = vor.u32 %v3810_v56, %v3410_v30  ;;  %v3274_v63 = vld [vmem:[%s3969_s28 + $0x628] sm:$0xf0] }
  0xf6   : > { %2173 = vmatpush.bf16.msra.mxu3 %v3197_v5  ;;  %2135 = vmatmul.bf16.vlgmr.msra.gmra.mxu0 %v3868_v20  ;;  %v1942_v54 = vadd.f32 %v1941_v50, %v1929_v48  ;;  %v3277_v27 = vor.u32 %v3776_v62, %v3274_v63  ;;  %v3806_v20 = vld [vmem:[%s3969_s28 + $0x714] sm:$0xf]  ;;  %v3875_v50 = vld [vmem:[#allocation1 + $0x3f] sm:$0xff] }
  0xf7   : > { %2179 = vmatpush.bf16.msrb.mxu0 %v3317_v21  ;;  %2148 = vmatmul.bf16.vlgmr.msra.gmra.mxu1 %v3870_v31  ;;  %v3338_v21 = vld [vmem:[%s3969_s28 + $0x6a8] sm:$0xf0] }
  0xf8   : > { %2192 = vmatpush.bf16.msrb.mxu1 %v3381_v6  ;;  %2161 = vmatmul.bf16.vlgmr.msra.gmra.mxu2 %v3869_v29  ;;  %v3808_v6 = vld [vmem:[%s3969_s28 + $0x724] sm:$0xf]  ;;  %v3341_v13 = vor.u32 %v3792_v0, %v3338_v21  ;;  %v3333_v29 = vor.u32 %v3790_v17, %v3330_v19  ;;  %v3873_v48 = vld [vmem:[#allocation1 + $0x2d] sm:$0xff] }
  0xf9   : > { %2205 = vmatpush.bf16.msrb.mxu2 %v3445_v7  ;;  %2174 = vmatmul.bf16.vlgmr.msra.gmra.mxu3 %v3871_v34  ;;  %v3402_v7 = vld [vmem:[%s3969_s28 + $0x728] sm:$0xf0]  ;;  %v3788_v34 = vld [vmem:[%s3969_s28 + $0x684] sm:$0xf] }
  0xfa   : > { %2218 = vmatpush.bf16.msrb.mxu3 %v3509_v9  ;;  %v3466_v9 = vld [vmem:[%s3969_s28 + $0x7a8] sm:$0xf0] }
  0xfb   : > { %2180 = vmatpush.bf16.msrb.mxu0 %v3309_v14  ;;  %v1954_v5 = vpop.f32.mrf.mxu2  ;;  %v1930_v10 = vpop.f32.mrf.mxu0  ;;  %v3405_v14 = vor.u32 %v3808_v6, %v3402_v7  ;;  %v3469_v18 = vor.u32 %v3824_v23, %v3466_v9 }
  0xfc   : > { %2193 = vmatpush.bf16.msrb.mxu1 %v3373_v15  ;;  %v1955_v22 = vadd.f32 %v1954_v5, %v1942_v54  ;;  %v1967_v8 = vpop.f32.mrf.mxu3  ;;  %v1943_v11 = vpop.f32.mrf.mxu1  ;;  %v3774_v15 = vld [vmem:[%s3969_s28 + $0x614] sm:$0xf] }
  0xfd   : > { %2206 = vmatpush.bf16.msrb.mxu2 %v3437_v16  ;;  %v3266_v16 = vld [vmem:[%s3969_s28 + $0x618] sm:$0xf0] }
  0xfe   : > { %2219 = vmatpush.bf16.msrb.mxu3 %v3501_v24  ;;  %v1968_v12 = vadd.f32 %v1967_v8, %v1955_v22  ;;  %v3394_v24 = vld [vmem:[%s3969_s28 + $0x718] sm:$0xf0]  ;;  %v3269_v28 = vor.u32 %v3774_v15, %v3266_v16 }
  0xff   : > { %2181 = vmatpush.bf16.msrb.mxu0 %v3301_v35  ;;  %v3397_v31 = vor.u32 %v3806_v20, %v3394_v24  ;;  %v3461_v35 = vor.u32 %v3822_v25, %v3458_v26 }
 0x100   : > { %2194 = vmatpush.bf16.msrb.mxu1 %v3365_v36  ;;  %v3322_v36 = vld [vmem:[%s3969_s28 + $0x688] sm:$0xf0] }
 0x101   : > { %2207 = vmatpush.bf16.msrb.mxu2 %v3429_v37  ;;  %v3804_v37 = vld [vmem:[%s3969_s28 + $0x704] sm:$0xf]  ;;  %v3325_v44 = vor.u32 %v3788_v34, %v3322_v36 }
 0x102   : > { %2220 = vmatpush.bf16.msrb.mxu3 %v3493_v41  ;;  %v3450_v41 = vld [vmem:[%s3969_s28 + $0x788] sm:$0xf0]  ;;  %v3389_v45 = vor.u32 %v3804_v37, %v3386_v38 }
 0x103   : > { %2182 = vmatpush.bf16.msrb.mxu0 %v3293_v49  ;;  %v1956_v39 = vpop.f32.mrf.mxu2  ;;  %v3453_v46 = vor.u32 %v3820_v40, %v3450_v41  ;;  %v3874_v49 = vld [vmem:[#allocation1 + $0x36] sm:$0xff] }
 0x104   : > { %2195 = vmatpush.bf16.msrb.mxu1 %v3357_v61  ;;  %v1969_v42 = vpop.f32.mrf.mxu3 }
 0x105   : > { %2208 = vmatpush.bf16.msrb.mxu2 %v3421_v51 }
 0x106   : > { %2221 = vmatpush.bf16.msrb.mxu3 %v3485_v2 }
 0x107   : > { %2183 = vmatpush.bf16.msrb.mxu0 %v3285_v3 }
 0x108   : > { %2196 = vmatpush.bf16.msrb.mxu1 %v3349_v59 }
 0x109   : > { %2209 = vmatpush.bf16.msrb.mxu2 %v3413_v60 }
 0x10a   : > { %2222 = vmatpush.bf16.msrb.mxu3 %v3477_v4 }
 0x10b   : > { %2184 = vmatpush.bf16.msrb.mxu0 %v3277_v27 }
 0x10c   : > { %2197 = vmatpush.bf16.msrb.mxu1 %v3341_v13 }
 0x10d   : > { %2210 = vmatpush.bf16.msrb.mxu2 %v3405_v14 }
 0x10e   : > { %2223 = vmatpush.bf16.msrb.mxu3 %v3469_v18 }
 0x10f   : > { %2185 = vmatpush.bf16.msrb.mxu0 %v3269_v28 }
 0x110   : > { %2198 = vmatpush.bf16.msrb.mxu1 %v3333_v29 }
 0x111   : > { %2211 = vmatpush.bf16.msrb.mxu2 %v3397_v31 }
 0x112   : > { %2224 = vmatpush.bf16.msrb.mxu3 %v3461_v35 }
 0x113   : > { %2186 = vmatpush.bf16.msrb.mxu0 %v3261_v43  ;;  %v1980_v61 = vpop.f32.mrf.mxu0 }
 0x114   : > { %2199 = vmatpush.bf16.msrb.mxu1 %v3325_v44  ;;  %v1981_v51 = vadd.f32 %v1980_v61, %v1968_v12  ;;  %v1993_v52 = vpop.f32.mrf.mxu1  ;;  %v240_v44 = vld [vmem:[#allocation2] sm:$0xf] }
 0x115   : > { %2212 = vmatpush.bf16.msrb.mxu2 %v3389_v45 }
 0x116   : > { %2225 = vmatpush.bf16.msrb.mxu3 %v3453_v46  ;;  %2187 = vmatmul.bf16.vlgmr.msrb.gmra.mxu0 %v3872_v47  ;;  %v1994_v53 = vadd.f32 %v1993_v52, %v1981_v51 }
 0x117   : > { %2200 = vmatmul.bf16.vlgmr.msrb.gmra.mxu1 %v3873_v48 }
 0x118   : > { %2213 = vmatmul.bf16.vlgmr.msrb.gmra.mxu2 %v3874_v49 }
 0x119   : > { %2226 = vmatmul.bf16.vlgmr.msrb.gmra.mxu3 %v3875_v50 }
 0x11b   : > { %v2006_v1 = vpop.f32.mrf.mxu2  ;;  %v1982_v55 = vpop.f32.mrf.mxu0 }
 0x11c   : > { %v2007_v2 = vadd.f32 %v2006_v1, %v1994_v53  ;;  %v2019_v54 = vpop.f32.mrf.mxu3  ;;  %v1995_v56 = vpop.f32.mrf.mxu1 }
 0x11e   : > { %v2020_v30 = vadd.f32 %v2019_v54, %v2007_v2 }
 0x123   : > { %v2008_v57 = vpop.f32.mrf.mxu2 }
 0x124   : > { %v2021_v58 = vpop.f32.mrf.mxu3 }
 0x133   : > { %v2032_v3 = vpop.f32.mrf.mxu0 }
 0x134   : > { %v2045_v59 = vpop.f32.mrf.mxu1 }
 0x135   : > { %v2046_v60 = vadd.f32 %v2045_v59, %v2032_v3 }
 0x13b   : > { %v2058_v62 = vpop.f32.mrf.mxu2  ;;  %v2034_v5 = vpop.f32.mrf.mxu0 }
 0x13c   : > { %v2059_v63 = vadd.f32 %v2058_v62, %v2046_v60  ;;  %v2071_v0 = vpop.f32.mrf.mxu3  ;;  %v2047_v21 = vpop.f32.mrf.mxu1 }
 0x13e   : > { %v2072_v4 = vadd.f32 %v2071_v0, %v2059_v63 }
 0x143   : > { %v2060_v6 = vpop.f32.mrf.mxu2 }
 0x144   : > { %v2073_v7 = vpop.f32.mrf.mxu3 }
 0x153   : > { %v2084_v22 = vpop.f32.mrf.mxu0 }
 0x154   : > { %v2097_v8 = vpop.f32.mrf.mxu1  ;;  %v2085_v15 = vadd.f32 %v2084_v22, %v2072_v4 }
 0x156   : > { %v2098_v19 = vadd.f32 %v2097_v8, %v2085_v15 }
 0x15b   : > { %v2110_v23 = vpop.f32.mrf.mxu2  ;;  %v2086_v10 = vpop.f32.mrf.mxu0 }
 0x15c   : > { %v2123_v9 = vpop.f32.mrf.mxu3  ;;  %v2099_v27 = vpop.f32.mrf.mxu1  ;;  %v2111_v24 = vadd.f32 %v2110_v23, %v2098_v19 }
 0x15e   : > { %v2124_v28 = vadd.f32 %v2123_v9, %v2111_v24 }
 0x163   : > { %v2112_v11 = vpop.f32.mrf.mxu2 }
 0x164   : > { %v2125_v12 = vpop.f32.mrf.mxu3 }
 0x173   : > { %v2136_v13 = vpop.f32.mrf.mxu0 }
 0x174   : > { %v2149_v14 = vpop.f32.mrf.mxu1  ;;  %v2137_v29 = vadd.f32 %v2136_v13, %v2124_v28 }
 0x176   : > { %v2150_v31 = vadd.f32 %v2149_v14, %v2137_v29 }
 0x17b   : > { %v2162_v16 = vpop.f32.mrf.mxu2  ;;  %v2138_v18 = vpop.f32.mrf.mxu0 }
 0x17c   : > { %v2175_v17 = vpop.f32.mrf.mxu3  ;;  %v2151_v20 = vpop.f32.mrf.mxu1  ;;  %v2163_v32 = vadd.f32 %v2162_v16, %v2150_v31 }
 0x17e   : > { %v2176_v33 = vadd.f32 %v2175_v17, %v2163_v32 }
 0x183   : > { %v2164_v25 = vpop.f32.mrf.mxu2 }
 0x184   : > { %v2177_v26 = vpop.f32.mrf.mxu3 }
 0x193   : > { %v2188_v34 = vpop.f32.mrf.mxu0 }
 0x194   : > { %v2201_v35 = vpop.f32.mrf.mxu1  ;;  %v2189_v36 = vadd.f32 %v2188_v34, %v2176_v33 }
 0x196   : > { %v2202_v37 = vadd.f32 %v2201_v35, %v2189_v36 }
 0x19b   : > { %v2214_v38 = vpop.f32.mrf.mxu2  ;;  %v2190_v41 = vpop.f32.mrf.mxu0 }
 0x19c   : > { %v2215_v39 = vadd.f32 %v2214_v38, %v2202_v37  ;;  %v2227_v40 = vpop.f32.mrf.mxu3  ;;  %v2203_v42 = vpop.f32.mrf.mxu1 }
 0x19e   : > { %v2228_v43 = vadd.f32 %v2227_v40, %v2215_v39 }
 0x1a0   : > { %v2233_v45 = vrot.slane %v2228_v43, 6 }
 0x1a1   : > { %2242 = sbr.rel (%p3510_p6) target bundleno = 589 (0x24d), region = 48 }
 0x1a2   : > { %v2235_v46 = vsel %vm2234_vm0, %v2020_v30, %v2233_v45 }
 0x1a3   : > { %v2237_v47 = vadd.f32 %v2235_v46, %v240_v44  ;;  %v2216_v48 = vpop.f32.mrf.mxu2 }
 0x1a4   : > { %v2229_v49 = vpop.f32.mrf.mxu3 }
 0x1a5   : > { %2238 = vst [vmem:[#allocation2] sm:$0xf] %v2237_v47 }
 0x1a6   : > { %v3843_v50 = vld [vmem:[%s4591_s3 + $0x38] sm:$0xff]  ;;  %v3842_v51 = vld [vmem:[%s4591_s3 + $0x30] sm:$0xff]  ;;  %v2244_v53 = vld [vmem:[%s4590_s2] sm:$0x3] }
 0x1a7   : > { %v3851_v61 = vld [vmem:[%s4591_s3 + $0x78] sm:$0xff]  ;;  %2393 = vmatpush.bf16.msra.mxu0 %v3843_v50  ;;  %v3850_v52 = vld [vmem:[%s4591_s3 + $0x70] sm:$0xff]  ;;  %v3841_v1 = vld [vmem:[%s4591_s3 + $0x28] sm:$0xff]  ;;  %v2246_v54 = vperm.slane %v2244_v53, 0  ;;  %v2247_v55 = vperm.slane %v2244_v53, 1 }
 0x1a8   : > { %2406 = vmatpush.bf16.msra.mxu1 %v3851_v61  ;;  %v3849_v2 = vld [vmem:[%s4591_s3 + $0x68] sm:$0xff]  ;;  %v3840_v57 = vld [vmem:[%s4591_s3 + $0x20] sm:$0xff]  ;;  %v3839_v62 = vld [vmem:[%s4591_s3 + $0x18] sm:$0xff] }
 0x1a9   : > { %v2248_v30 = vrot.slane %v2247_v55, 6  ;;  %v3848_v58 = vld [vmem:[%s4591_s3 + $0x60] sm:$0xff]  ;;  %v3847_v63 = vld [vmem:[%s4591_s3 + $0x58] sm:$0xff]  ;;  %v3838_v0 = vld [vmem:[%s4591_s3 + $0x10] sm:$0xff] }
 0x1aa   : > { %v3846_v4 = vld [vmem:[%s4591_s3 + $0x50] sm:$0xff]  ;;  %v3837_v5 = vld [vmem:[%s4591_s3 + $0x8] sm:$0xff]  ;;  %v3836_v6 = vld [vmem:[%s4591_s3] sm:$0xff] }
 0x1ab   : > { %2394 = vmatpush.bf16.msra.mxu0 %v3842_v51  ;;  %v2249_v3 = vsel %vm2234_vm0, %v2246_v54, %v2248_v30  ;;  %v3845_v21 = vld [vmem:[%s4591_s3 + $0x48] sm:$0xff]  ;;  %v3844_v7 = vld [vmem:[%s4591_s3 + $0x40] sm:$0xff] }
 0x1ac   : > { %2407 = vmatpush.bf16.msra.mxu1 %v3850_v52  ;;  %v2243_v56 = vld [vmem:[#allocation2] sm:$0xf]  ;;  %v3876_v10 = vld [vmem:[%s4592_s4] ss:$0 sm:$0xff] }
 0x1ad   : > { %v2251_v59 = vadd.f32 %v2249_v3, %v2243_v56 }
 0x1af   : > { %2395 = vmatpush.bf16.msra.mxu0 %v3841_v1  ;;  %v2252_v60 = vmax.f32 %v2251_v59, 0.0 }
 0x1b0   : > { %2408 = vmatpush.bf16.msra.mxu1 %v3849_v2 }
 0x1b1   : > { %2254 = vst [vmem:[#allocation1] ss:$4 sm:$0xff] %v2252_v60 }
 0x1b3   : > { %2396 = vmatpush.bf16.msra.mxu0 %v3840_v57 }
 0x1b4   : > { %2409 = vmatpush.bf16.msra.mxu1 %v3848_v58 }
 0x1b7   : > { %2397 = vmatpush.bf16.msra.mxu0 %v3839_v62 }
 0x1b8   : > { %2410 = vmatpush.bf16.msra.mxu1 %v3847_v63  ;;  %v2255_v22 = vld.sshfl [vmem:[#allocation1] sm:$0xff pattern:$0x73625140]  ;;  %v2256_v8 = vld.sshfl [vmem:[#allocation1 + $0x8] sm:$0xff pattern:$0x73625140] }
 0x1b9   : > { %v2259_v23 = vpack.c.bf16 %v2255_v22, %v2255_v22  ;;  %v2260_v9 = vpack.c.bf16 %v2256_v8, %v2256_v8 }
 0x1bb   : > { %2398 = vmatpush.bf16.msra.mxu0 %v3838_v0 }
 0x1bc   : > { %2411 = vmatpush.bf16.msra.mxu1 %v3846_v4 }
 0x1bf   : > { %2399 = vmatpush.bf16.msra.mxu0 %v3837_v5 }
 0x1c0   : > { %2412 = vmatpush.bf16.msra.mxu1 %v3845_v21 }
 0x1c3   : > { %2400 = vmatpush.bf16.msra.mxu0 %v3836_v6 }
 0x1c4   : > { %2413 = vmatpush.bf16.msra.mxu1 %v3844_v7 }
 0x1c6   : > { %2401 = vmatmul.bf16.vlgmr.msra.gmra.mxu0 %v2259_v23 }
 0x1c7   : > { %2414 = vmatmul.bf16.vlgmr.msra.gmra.mxu1 %v2260_v9 }
 0x243   : > { %v2402_v27 = vpop.f32.mrf.mxu0 }
 0x244   : > { %v2415_v11 = vpop.f32.mrf.mxu1  ;;  %v2403_v12 = vadd.f32 %v3876_v10, %v2402_v27 }
 0x246   : > { %v2416_v13 = vadd.f32 %v2415_v11, %v2403_v12 }
 0x248   : > { %2419 = vst [vmem:[#allocation3] sm:$0x3] %v2416_v13 }
 0x24b   : > { %v2404_v14 = vpop.f32.mrf.mxu0 }
 0x24c   : > { %v2417_v15 = vpop.f32.mrf.mxu1 }
 0x24d PF: > { %p3856_p7 = scmp.eq.s32.totalorder %s3955_s19, 3  ;;  %s3918_s17 = smov [#allocation3]  }
 0x24e   : > { %s2426_s20 = sshll.u32 %s3918_s17, 4  ;;  %s2428_s23 = sshll.u32 %s4593_s5, 4  ;;  %s2427_s20 = int_to_ptr.vmem [resolvable:$true] %s2426_s20  ;;  %s2429_s23 = int_to_ptr.hbm [resolvable:$true] %s2428_s23 }
 0x24f   : > { %3853 = dma.vmem_to_hbm [thread:$0]  (%p3856_p7), %s2427_s20, 32, %s2429_s23, [#allocation4]  }
 0x250   : > { %3910 = dma.done.wait (%p3856_p7), [#allocation4], 32  }
 0x251   : > { %3912 = vsyncadd (%p3856_p7), [#allocation4], 4294967264 }
 0x252 PF: > { %s16_s18 = sadd.s32 1, %s3915_s18  }
 0x253   : > { %p13_p8 = scmp.ge.s32.totalorder %s16_s18, 6  }
 0x255   :  { %15 = sbr.rel (!%p13_p8) target bundleno = 1 (0x1), region = 78 }
 0x25a   :  { %2442 = vsyncpa [#allocation4], 1 }
 0x25b   :  { %2444 = vsyncpa [#allocation4 + $0x1], 1 }

</bundles_post_ra>
